<compile_context>
chip_gen: v6e
topology: v6e:2x2x1
jax: 0.10.0
libtpu: 0.0.40
codegen_flags: <defaults>
</compile_context>

<pallas_src>
import functools

import jax
import jax.numpy as jnp
from jax.experimental import pallas as pl
from jax.experimental.pallas import tpu as pltpu

NEG_SLOPE = 0.01  # PyTorch nn.LeakyReLU default


def _leaky(x):
    # max(x, a*x) == LeakyReLU(x) for 0 < a < 1  (2 VPU ops instead of 3)
    return jnp.maximum(x, NEG_SLOPE * x)


# ---------------------------------------------------------------------------
# Fused kernel.  Grid = (B // Bt, nt) over the channels-major flattened input
# (4, B*N).  One grid step sees (4, Lt) lanes:
#   * nt == 1: Lt = Bt*N -> Bt whole point clouds; pool + head done locally.
#   * nt  > 1: Bt = 1, Lt = tile_n -> running max in a VMEM scratch, head
#              fused into the last point tile via pl.when.
# ---------------------------------------------------------------------------
def _fused_kernel(x_ref, w1, w2, b2, w3, b3, w5, b5, w6, b6, w7, b7,
                  out_ref, pool_ref, *, n_point, bt, nt, cdt, layer1_on_mxu):
    x = x_ref[...]                                            # (4, Lt) cdt

    # ---- layer 1: 3 -> 64.  Bias folded into weight column 3 (ones row).
    w1v = w1[...]                                             # (64, 4)
    if layer1_on_mxu:
        h = jnp.dot(w1v, x, preferred_element_type=jnp.float32)
    else:
        # VPU path (prefer on v5e where the MXU is the binding unit, or for
        # exact f32): three broadcast FMAs + bias column.
        h = (w1v[:, 0:1] * x[0:1, :] + w1v[:, 1:2] * x[1:2, :]
             + w1v[:, 2:3] * x[2:3, :] + w1v[:, 3:4])
    h = _leaky(h.astype(cdt))                                 # (64, Lt)

    # ---- layers 2/3 on the MXU (f32 accumulation); bias + LeakyReLU + pool
    #      run in compute_dtype (packed bf16 on v6e/v7x halves VALU load).
    h = _leaky(jnp.dot(w2[...], h, preferred_element_type=jnp.float32)
               .astype(cdt) + b2[...])                        # (128, Lt)
    h = _leaky(jnp.dot(w3[...], h, preferred_element_type=jnp.float32)
               .astype(cdt) + b3[...])                        # (256, Lt)

    def head(pooled, o_ref):
        # pooled: (256, k) f32, channels-major -> head rides the MXU.
        h5 = _leaky(jnp.dot(w5[...], pooled,
                            preferred_element_type=jnp.float32) + b5[...])
        h6 = _leaky(jnp.dot(w6[...], h5,
                            preferred_element_type=jnp.float32) + b6[...])
        o_ref[...] = jnp.dot(w7[...], h6,
                             preferred_element_type=jnp.float32) + b7[...]

    if nt == 1:
        # One step = bt whole point clouds: per-cloud lane reduces (aligned
        # slices, XLU), then one fused head matmul chain over all bt columns.
        cols = [jnp.max(h[:, b * n_point:(b + 1) * n_point], axis=1,
                        keepdims=True) for b in range(bt)]
        pooled = cols[0] if bt == 1 else jnp.concatenate(cols, axis=1)
        head(pooled.astype(jnp.float32), out_ref)             # (1, bt)
    else:
        # bt == 1: running max across point tiles, head on the last tile.
        t = pl.program_id(1)
        m = jnp.max(h, axis=1, keepdims=True).astype(jnp.float32)   # (256, 1)

        @pl.when(t == 0)
        def _():
            pool_ref[...] = jnp.full(pool_ref.shape, -jnp.inf, jnp.float32)

        pool_ref[...] = jnp.maximum(pool_ref[...], m)

        @pl.when(t == nt - 1)
        def _():
            head(pool_ref[...], out_ref)


def _choose_tiling(B, N, cdt):
    """Returns (batch_per_step, tile_points)."""
    # Conservative lane cap: fine for v5e's 16 MiB default scoped VMEM and for
    # v7x's 64 MiB physical VMEM; ~452 live channels * lanes * itemsize stays
    # a few MiB per step while >= 2048 lanes amortizes the 0.35us/step cost.
    lane_cap = 2048 * (4 // jnp.dtype(cdt).itemsize)
    if N <= lane_cap:
        bt = 1
        for d in range(1, B + 1):                 # largest divisor of B fitting cap
            if B % d == 0 and d * N <= lane_cap:
                bt = d
        # Leave >= 2 "parallel" grid steps for 2-TensorCore chips (v7x) when
        # the halved tile still has enough lanes to amortize step overhead.
        if bt > 1 and B // bt < 2 and bt % 2 == 0 and (bt // 2) * N >= 1024:
            bt //= 2
        return bt, N
    cap = min(lane_cap, max(512, N // 4))         # keep >= ~4 point tiles
    cap -= cap % 128
    for d in range(cap, 127, -128):
        if N % d == 0:
            return 1, d
    raise ValueError(
        f"N={N} has no 128-aligned point-tile divisor <= {cap} "
        "(TODO(synk): pad + -inf mask for arbitrary N)")


def point_discriminator_1(x_bcn, params, *, compute_dtype=jnp.bfloat16,
                          tile_points=None, batch_per_step=None,
                          layer1_on_mxu=None, vmem_limit_bytes=None):
    """x_bcn: (B, 3, N) float32, same layout as the PyTorch module input."""
    B, C, N = x_bcn.shape
    assert C == 3
    cdt = jnp.dtype(compute_dtype)
    if layer1_on_mxu is None:
        # MXU path for bf16 (v6e/v7x are VALU-bound, MXU has slack; v5e MXU is
        # bf16-native); exact VPU path when running pure f32.
        layer1_on_mxu = (cdt != jnp.dtype(jnp.float32))

    if tile_points is None and batch_per_step is None:
        bt, tile_n = _choose_tiling(B, N, cdt)
    else:
        tile_n = N if tile_points is None else tile_points
        bt = 1 if batch_per_step is None else batch_per_step
    if N % tile_n != 0 or B % bt != 0:
        raise ValueError("tile_points must divide N and batch_per_step divide B")
    if bt > 1 and tile_n != N:
        raise ValueError("batching multiple clouds per step requires tile_points == N")
    nt = N // tile_n
    lt = bt * tile_n                              # lanes per grid step
    if lt % 128 != 0 and lt != B * N:
        raise ValueError("lane tile must be a multiple of 128 "
                         "(TODO(synk): pad + -inf mask for arbitrary N)")

    # Channels-major flattened input with a ones row so conv1 bias folds into
    # the layer-1 weight: rows = (x, y, z, 1).  Tiny array; the one-time
    # transpose/pad in the wrapper buys a fully lane-dense per-step DMA.
    xf = jnp.transpose(x_bcn.astype(jnp.float32), (1, 0, 2)).reshape(3, B * N)
    x_flat = jnp.concatenate(
        [xf, jnp.ones((1, B * N), jnp.float32)], axis=0).astype(cdt)   # (4, B*N)

    (W1, B1), (W2, B2), (W3, B3) = params["conv"]   # math form (cin,cout),(cout,)
    (W5, B5), (W6, B6), (W7, B7) = params["mlp"]

    # Conv weights channels-major (cout, cin); bf16 by default (f32 MXU accum).
    w1 = jnp.concatenate([W1.T, B1.reshape(-1, 1)], axis=1).astype(cdt)  # (64,4)
    w2 = W2.T.astype(cdt); b2 = B2.reshape(-1, 1).astype(cdt)            # (128,64),(128,1)
    w3 = W3.T.astype(cdt); b3 = B3.reshape(-1, 1).astype(cdt)            # (256,128),(256,1)
    # Head stays f32 (tiny), channels-major so it runs as MXU matvecs.
    w5 = W5.T.astype(jnp.float32); b5 = B5.reshape(-1, 1).astype(jnp.float32)  # (128,256),(128,1)
    w6 = W6.T.astype(jnp.float32); b6 = B6.reshape(-1, 1).astype(jnp.float32)  # (64,128),(64,1)
    w7 = W7.T.astype(jnp.float32); b7 = B7.reshape(-1, 1).astype(jnp.float32)  # (1,64),(1,1)

    weights = (w1, w2, b2, w3, b3, w5, b5, w6, b6, w7, b7)

    def full_spec(a):
        return pl.BlockSpec(a.shape, lambda i, t: (0, 0))

    kernel = functools.partial(_fused_kernel, n_point=N, bt=bt, nt=nt, cdt=cdt,
                               layer1_on_mxu=layer1_on_mxu)

    cp_kwargs = dict(dimension_semantics=("parallel", "arbitrary"))
    if vmem_limit_bytes is not None:
        cp_kwargs["vmem_limit_bytes"] = vmem_limit_bytes

    out = pl.pallas_call(
        kernel,
        out_shape=jax.ShapeDtypeStruct((1, B), jnp.float32),
        grid_spec=pltpu.PrefetchScalarGridSpec(
            num_scalar_prefetch=0,
            grid=(B // bt, nt),
            in_specs=[pl.BlockSpec((4, lt), lambda i, t: (0, i * nt + t))]
                     + [full_spec(a) for a in weights],
            out_specs=pl.BlockSpec((1, bt), lambda i, t: (0, i)),
            scratch_shapes=[pltpu.VMEM((256, 1), jnp.float32)],
        ),
        compiler_params=pltpu.CompilerParams(**cp_kwargs),
    )(x_flat, *weights)
    return out.reshape(B, 1)


# ---------------------------------------------------------------------------
# Deterministic synthetic parameters (Conv1d + folded inference BatchNorm1d,
# Linear).  Stored in math form: weight (cin, cout), bias (cout,).
# ---------------------------------------------------------------------------
def make_params(key):
    conv_dims = [(3, 64), (64, 128), (128, 256)]
    mlp_dims = [(256, 128), (128, 64), (64, 1)]
    keys = iter(jax.random.split(key, 6 * len(conv_dims) + 2 * len(mlp_dims)))

    conv = []
    for cin, cout in conv_dims:
        w = jax.random.normal(next(keys), (cin, cout), jnp.float32) / jnp.sqrt(cin)
        b = 0.05 * jax.random.normal(next(keys), (cout,), jnp.float32)
        gamma = 1.0 + 0.1 * jax.random.normal(next(keys), (cout,), jnp.float32)
        beta = 0.1 * jax.random.normal(next(keys), (cout,), jnp.float32)
        rmean = 0.1 * jax.random.normal(next(keys), (cout,), jnp.float32)
        rvar = jnp.abs(1.0 + 0.1 * jax.random.normal(next(keys), (cout,), jnp.float32))
        scale = gamma / jnp.sqrt(rvar + 1e-5)
        w_f = w * scale[None, :]
        b_f = scale * b + (beta - rmean * scale)
        conv.append((w_f, b_f))

    mlp = []
    for cin, cout in mlp_dims:
        w = jax.random.normal(next(keys), (cin, cout), jnp.float32) / jnp.sqrt(cin)
        b = 0.05 * jax.random.normal(next(keys), (cout,), jnp.float32)
        mlp.append((w, b))

    return {"conv": conv, "mlp": mlp}


def reference(x_bcn, params):
    """Pure-JAX reference with the PyTorch forward semantics (BN folded)."""
    h = jnp.transpose(x_bcn, (0, 2, 1)).astype(jnp.float32)   # (B, N, 3)
    for w, b in params["conv"]:
        h = _leaky(h @ w + b)
    h = jnp.max(h, axis=1)                                    # MaxPool1d(num_point)
    n_mlp = len(params["mlp"])
    for i, (w, b) in enumerate(params["mlp"]):
        h = h @ w + b
        if i < n_mlp - 1:
            h = _leaky(h)
    return h                                                  # (B, 1)


if __name__ == "__main__":
    key = jax.random.PRNGKey(0)
    kx, kp = jax.random.split(key)

    B, N = 2, 256                       # num_point = 256 (module default)
    x = jax.random.normal(kx, (B, 3, N), jnp.float32)
    params = make_params(kp)
    ref = reference(x, params)

    # f32 path (layer 1 on the VPU, exact bias fold; MXU f32 accumulation).
    out_f32 = jax.block_until_ready(
        point_discriminator_1(x, params, compute_dtype=jnp.float32))
    assert out_f32.shape == (B, 1)
    assert jnp.allclose(out_f32, ref, atol=5e-3, rtol=5e-3), (out_f32, ref)

    # Default bf16 path: layer 1 + bias via MXU ones-row fold, packed-bf16
    # elementwise, whole batch fused into one grid step at N=256.
    out_bf16 = jax.block_until_ready(point_discriminator_1(x, params))
    assert out_bf16.shape == (B, 1)
    assert jnp.allclose(out_bf16, ref, atol=1.5e-1, rtol=1.5e-1), (out_bf16, ref)

    # Larger point count exercises the multi-tile path (running max in VMEM
    # scratch + head fused into the last point tile).
    N2 = 4096
    x2 = jax.random.normal(kx, (B, 3, N2), jnp.float32)
    ref2 = reference(x2, params)
    out2 = jax.block_until_ready(
        point_discriminator_1(x2, params, compute_dtype=jnp.float32))
    assert jnp.allclose(out2, ref2, atol=1e-2, rtol=1e-2), (out2, ref2)

    print("KERNEL_OK")
</pallas_src>

<mosaic_0001>
module attributes {stable_mosaic.version = 11 : i64} {
  func.func @_fused_kernel(%arg0: i32, %arg1: i32, %arg2: memref<4x512xf32, #tpu.memory_space<vmem>>, %arg3: memref<64x4xf32, #tpu.memory_space<vmem>>, %arg4: memref<128x64xf32, #tpu.memory_space<vmem>>, %arg5: memref<128x1xf32, #tpu.memory_space<vmem>>, %arg6: memref<256x128xf32, #tpu.memory_space<vmem>>, %arg7: memref<256x1xf32, #tpu.memory_space<vmem>>, %arg8: memref<128x256xf32, #tpu.memory_space<vmem>>, %arg9: memref<128x1xf32, #tpu.memory_space<vmem>>, %arg10: memref<64x128xf32, #tpu.memory_space<vmem>>, %arg11: memref<64x1xf32, #tpu.memory_space<vmem>>, %arg12: memref<1x64xf32, #tpu.memory_space<vmem>>, %arg13: memref<1x1xf32, #tpu.memory_space<vmem>>, %arg14: memref<1x2xf32, #tpu.memory_space<vmem>>, %arg15: memref<256x1xf32, #tpu.memory_space<vmem>>) attributes {dimension_semantics = [#tpu.dimension_semantics<parallel>, #tpu.dimension_semantics<arbitrary>], iteration_bounds = array<i64: 1, 1>, scalar_prefetch = 0 : i64, scratch_operands = 1 : i64, tpu.core_type = #tpu.core_type<tc>, window_params = [{transform_indices = @transform_0, window_bounds = array<i64: 4, 512>}, {pipeline_mode = #tpu.pipeline_mode<synchronous>, transform_indices = @transform_1, window_bounds = array<i64: 64, 4>}, {pipeline_mode = #tpu.pipeline_mode<synchronous>, transform_indices = @transform_2, window_bounds = array<i64: 128, 64>}, {pipeline_mode = #tpu.pipeline_mode<synchronous>, transform_indices = @transform_3, window_bounds = array<i64: 128, 1>}, {pipeline_mode = #tpu.pipeline_mode<synchronous>, transform_indices = @transform_4, window_bounds = array<i64: 256, 128>}, {pipeline_mode = #tpu.pipeline_mode<synchronous>, transform_indices = @transform_5, window_bounds = array<i64: 256, 1>}, {pipeline_mode = #tpu.pipeline_mode<synchronous>, transform_indices = @transform_6, window_bounds = array<i64: 128, 256>}, {pipeline_mode = #tpu.pipeline_mode<synchronous>, transform_indices = @transform_7, window_bounds = array<i64: 128, 1>}, {pipeline_mode = #tpu.pipeline_mode<synchronous>, transform_indices = @transform_8, window_bounds = array<i64: 64, 128>}, {pipeline_mode = #tpu.pipeline_mode<synchronous>, transform_indices = @transform_9, window_bounds = array<i64: 64, 1>}, {pipeline_mode = #tpu.pipeline_mode<synchronous>, transform_indices = @transform_10, window_bounds = array<i64: 1, 64>}, {pipeline_mode = #tpu.pipeline_mode<synchronous>, transform_indices = @transform_11, window_bounds = array<i64: 1, 1>}, {transform_indices = @transform_12, window_bounds = array<i64: 1, 2>}]} {
    %c0 = arith.constant 0 : index
    %c0_0 = arith.constant 0 : index
    %0 = vector.load %arg2[%c0, %c0_0] : memref<4x512xf32, #tpu.memory_space<vmem>>, vector<4x512xf32>
    %c0_1 = arith.constant 0 : index
    %c0_2 = arith.constant 0 : index
    %1 = vector.load %arg3[%c0_1, %c0_2] : memref<64x4xf32, #tpu.memory_space<vmem>>, vector<64x4xf32>
    %2 = vector.extract_strided_slice %1 {offsets = [0, 0], sizes = [64, 1], strides = [1, 1]} : vector<64x4xf32> to vector<64x1xf32>
    %3 = vector.extract_strided_slice %0 {offsets = [0, 0], sizes = [1, 512], strides = [1, 1]} : vector<4x512xf32> to vector<1x512xf32>
    %4 = vector.broadcast %2 : vector<64x1xf32> to vector<64x512xf32>
    %5 = vector.broadcast %3 : vector<1x512xf32> to vector<64x512xf32>
    %6 = arith.mulf %4, %5 : vector<64x512xf32>
    %7 = vector.extract_strided_slice %1 {offsets = [0, 1], sizes = [64, 1], strides = [1, 1]} : vector<64x4xf32> to vector<64x1xf32>
    %8 = vector.extract_strided_slice %0 {offsets = [1, 0], sizes = [1, 512], strides = [1, 1]} : vector<4x512xf32> to vector<1x512xf32>
    %9 = vector.broadcast %7 : vector<64x1xf32> to vector<64x512xf32>
    %10 = vector.broadcast %8 : vector<1x512xf32> to vector<64x512xf32>
    %11 = arith.mulf %9, %10 : vector<64x512xf32>
    %12 = arith.addf %6, %11 : vector<64x512xf32>
    %13 = vector.extract_strided_slice %1 {offsets = [0, 2], sizes = [64, 1], strides = [1, 1]} : vector<64x4xf32> to vector<64x1xf32>
    %14 = vector.extract_strided_slice %0 {offsets = [2, 0], sizes = [1, 512], strides = [1, 1]} : vector<4x512xf32> to vector<1x512xf32>
    %15 = vector.broadcast %13 : vector<64x1xf32> to vector<64x512xf32>
    %16 = vector.broadcast %14 : vector<1x512xf32> to vector<64x512xf32>
    %17 = arith.mulf %15, %16 : vector<64x512xf32>
    %18 = arith.addf %12, %17 : vector<64x512xf32>
    %19 = vector.extract_strided_slice %1 {offsets = [0, 3], sizes = [64, 1], strides = [1, 1]} : vector<64x4xf32> to vector<64x1xf32>
    %20 = vector.broadcast %19 : vector<64x1xf32> to vector<64x512xf32>
    %21 = arith.addf %18, %20 : vector<64x512xf32>
    %cst = arith.constant 0.00999999977 : f32
    %22 = vector.broadcast %cst : f32 to vector<64x512xf32>
    %23 = arith.mulf %22, %21 : vector<64x512xf32>
    %24 = arith.maximumf %21, %23 : vector<64x512xf32>
    %c0_3 = arith.constant 0 : index
    %c0_4 = arith.constant 0 : index
    %25 = vector.load %arg4[%c0_3, %c0_4] : memref<128x64xf32, #tpu.memory_space<vmem>>, vector<128x64xf32>
    %cst_5 = arith.constant dense<0.000000e+00> : vector<128x512xf32>
    %26 = tpu.matmul %25, %24, %cst_5 {dimension_numbers = #tpu.dot_dimension_numbers<[1], [0], [0], [1], [0, 0, 1, 1], [], []>} : vector<128x64xf32>, vector<64x512xf32>, vector<128x512xf32> -> vector<128x512xf32>
    %c0_6 = arith.constant 0 : index
    %c0_7 = arith.constant 0 : index
    %27 = vector.load %arg5[%c0_6, %c0_7] : memref<128x1xf32, #tpu.memory_space<vmem>>, vector<128x1xf32>
    %28 = vector.broadcast %27 : vector<128x1xf32> to vector<128x512xf32>
    %29 = arith.addf %26, %28 : vector<128x512xf32>
    %cst_8 = arith.constant 0.00999999977 : f32
    %30 = vector.broadcast %cst_8 : f32 to vector<128x512xf32>
    %31 = arith.mulf %30, %29 : vector<128x512xf32>
    %32 = arith.maximumf %29, %31 : vector<128x512xf32>
    %c0_9 = arith.constant 0 : index
    %c0_10 = arith.constant 0 : index
    %33 = vector.load %arg6[%c0_9, %c0_10] : memref<256x128xf32, #tpu.memory_space<vmem>>, vector<256x128xf32>
    %cst_11 = arith.constant dense<0.000000e+00> : vector<256x512xf32>
    %34 = tpu.matmul %33, %32, %cst_11 {dimension_numbers = #tpu.dot_dimension_numbers<[1], [0], [0], [1], [0, 0, 1, 1], [], []>} : vector<256x128xf32>, vector<128x512xf32>, vector<256x512xf32> -> vector<256x512xf32>
    %c0_12 = arith.constant 0 : index
    %c0_13 = arith.constant 0 : index
    %35 = vector.load %arg7[%c0_12, %c0_13] : memref<256x1xf32, #tpu.memory_space<vmem>>, vector<256x1xf32>
    %36 = vector.broadcast %35 : vector<256x1xf32> to vector<256x512xf32>
    %37 = arith.addf %34, %36 : vector<256x512xf32>
    %cst_14 = arith.constant 0.00999999977 : f32
    %38 = vector.broadcast %cst_14 : f32 to vector<256x512xf32>
    %39 = arith.mulf %38, %37 : vector<256x512xf32>
    %40 = arith.maximumf %37, %39 : vector<256x512xf32>
    %41 = vector.extract_strided_slice %40 {offsets = [0, 0], sizes = [256, 256], strides = [1, 1]} : vector<256x512xf32> to vector<256x256xf32>
    %cst_15 = arith.constant dense<0xFF800000> : vector<256xf32>
    %42 = vector.multi_reduction <maximumf>, %41, %cst_15 [1] : vector<256x256xf32> to vector<256xf32>
    %43 = vector.shape_cast %42 : vector<256xf32> to vector<256x1xf32>
    %44 = vector.extract_strided_slice %40 {offsets = [0, 256], sizes = [256, 256], strides = [1, 1]} : vector<256x512xf32> to vector<256x256xf32>
    %cst_16 = arith.constant dense<0xFF800000> : vector<256xf32>
    %45 = vector.multi_reduction <maximumf>, %44, %cst_16 [1] : vector<256x256xf32> to vector<256xf32>
    %46 = vector.shape_cast %45 : vector<256xf32> to vector<256x1xf32>
    %47 = tpu.concatenate %43, %46 in 1 : vector<256x1xf32>, vector<256x1xf32> -> vector<256x2xf32>
    %c0_17 = arith.constant 0 : index
    %c0_18 = arith.constant 0 : index
    %48 = vector.load %arg8[%c0_17, %c0_18] : memref<128x256xf32, #tpu.memory_space<vmem>>, vector<128x256xf32>
    %cst_19 = arith.constant dense<0.000000e+00> : vector<128x2xf32>
    %49 = tpu.matmul %48, %47, %cst_19 {dimension_numbers = #tpu.dot_dimension_numbers<[1], [0], [0], [1], [0, 0, 1, 1], [], []>} : vector<128x256xf32>, vector<256x2xf32>, vector<128x2xf32> -> vector<128x2xf32>
    %c0_20 = arith.constant 0 : index
    %c0_21 = arith.constant 0 : index
    %50 = vector.load %arg9[%c0_20, %c0_21] : memref<128x1xf32, #tpu.memory_space<vmem>>, vector<128x1xf32>
    %51 = vector.broadcast %50 : vector<128x1xf32> to vector<128x2xf32>
    %52 = arith.addf %49, %51 : vector<128x2xf32>
    %cst_22 = arith.constant 0.00999999977 : f32
    %53 = vector.broadcast %cst_22 : f32 to vector<128x2xf32>
    %54 = arith.mulf %53, %52 : vector<128x2xf32>
    %55 = arith.maximumf %52, %54 : vector<128x2xf32>
    %c0_23 = arith.constant 0 : index
    %c0_24 = arith.constant 0 : index
    %56 = vector.load %arg10[%c0_23, %c0_24] : memref<64x128xf32, #tpu.memory_space<vmem>>, vector<64x128xf32>
    %cst_25 = arith.constant dense<0.000000e+00> : vector<64x2xf32>
    %57 = tpu.matmul %56, %55, %cst_25 {dimension_numbers = #tpu.dot_dimension_numbers<[1], [0], [0], [1], [0, 0, 1, 1], [], []>} : vector<64x128xf32>, vector<128x2xf32>, vector<64x2xf32> -> vector<64x2xf32>
    %c0_26 = arith.constant 0 : index
    %c0_27 = arith.constant 0 : index
    %58 = vector.load %arg11[%c0_26, %c0_27] : memref<64x1xf32, #tpu.memory_space<vmem>>, vector<64x1xf32>
    %59 = vector.broadcast %58 : vector<64x1xf32> to vector<64x2xf32>
    %60 = arith.addf %57, %59 : vector<64x2xf32>
    %cst_28 = arith.constant 0.00999999977 : f32
    %61 = vector.broadcast %cst_28 : f32 to vector<64x2xf32>
    %62 = arith.mulf %61, %60 : vector<64x2xf32>
    %63 = arith.maximumf %60, %62 : vector<64x2xf32>
    %c0_29 = arith.constant 0 : index
    %c0_30 = arith.constant 0 : index
    %64 = vector.load %arg12[%c0_29, %c0_30] : memref<1x64xf32, #tpu.memory_space<vmem>>, vector<1x64xf32>
    %cst_31 = arith.constant dense<0.000000e+00> : vector<1x2xf32>
    %65 = tpu.matmul %64, %63, %cst_31 {dimension_numbers = #tpu.dot_dimension_numbers<[1], [0], [0], [1], [0, 0, 1, 1], [], []>} : vector<1x64xf32>, vector<64x2xf32>, vector<1x2xf32> -> vector<1x2xf32>
    %c0_32 = arith.constant 0 : index
    %c0_33 = arith.constant 0 : index
    %66 = vector.load %arg13[%c0_32, %c0_33] : memref<1x1xf32, #tpu.memory_space<vmem>>, vector<1x1xf32>
    %67 = vector.broadcast %66 : vector<1x1xf32> to vector<1x2xf32>
    %68 = arith.addf %65, %67 : vector<1x2xf32>
    %c0_34 = arith.constant 0 : index
    %c0_35 = arith.constant 0 : index
    %69 = vector.load %arg14[%c0_34, %c0_35] : memref<1x2xf32, #tpu.memory_space<vmem>>, vector<1x2xf32>
    tpu.vector_store %arg14[%c0_34, %c0_35], %68 {strides = array<i32>} : memref<1x2xf32, #tpu.memory_space<vmem>>, vector<1x2xf32>,
    return
  }
  func.func @transform_0(%arg0: i32, %arg1: i32) -> (i32, i32) {
    %c1_i32 = arith.constant 1 : i32
    %0 = arith.muli %arg0, %c1_i32 : i32
    %1 = arith.addi %0, %arg1 : i32
    %c0_i32 = arith.constant 0 : i32
    %c0_i32_0 = arith.constant 0 : i32
    return %c0_i32, %1 : i32, i32
  }
  func.func @transform_1(%arg0: i32, %arg1: i32) -> (i32, i32) {
    %c0_i32 = arith.constant 0 : i32
    %c0_i32_0 = arith.constant 0 : i32
    %c0_i32_1 = arith.constant 0 : i32
    return %c0_i32, %c0_i32_0 : i32, i32
  }
  func.func @transform_2(%arg0: i32, %arg1: i32) -> (i32, i32) {
    %c0_i32 = arith.constant 0 : i32
    %c0_i32_0 = arith.constant 0 : i32
    %c0_i32_1 = arith.constant 0 : i32
    return %c0_i32, %c0_i32_0 : i32, i32
  }
  func.func @transform_3(%arg0: i32, %arg1: i32) -> (i32, i32) {
    %c0_i32 = arith.constant 0 : i32
    %c0_i32_0 = arith.constant 0 : i32
    %c0_i32_1 = arith.constant 0 : i32
    return %c0_i32, %c0_i32_0 : i32, i32
  }
  func.func @transform_4(%arg0: i32, %arg1: i32) -> (i32, i32) {
    %c0_i32 = arith.constant 0 : i32
    %c0_i32_0 = arith.constant 0 : i32
    %c0_i32_1 = arith.constant 0 : i32
    return %c0_i32, %c0_i32_0 : i32, i32
  }
  func.func @transform_5(%arg0: i32, %arg1: i32) -> (i32, i32) {
    %c0_i32 = arith.constant 0 : i32
    %c0_i32_0 = arith.constant 0 : i32
    %c0_i32_1 = arith.constant 0 : i32
    return %c0_i32, %c0_i32_0 : i32, i32
  }
  func.func @transform_6(%arg0: i32, %arg1: i32) -> (i32, i32) {
    %c0_i32 = arith.constant 0 : i32
    %c0_i32_0 = arith.constant 0 : i32
    %c0_i32_1 = arith.constant 0 : i32
    return %c0_i32, %c0_i32_0 : i32, i32
  }
  func.func @transform_7(%arg0: i32, %arg1: i32) -> (i32, i32) {
    %c0_i32 = arith.constant 0 : i32
    %c0_i32_0 = arith.constant 0 : i32
    %c0_i32_1 = arith.constant 0 : i32
    return %c0_i32, %c0_i32_0 : i32, i32
  }
  func.func @transform_8(%arg0: i32, %arg1: i32) -> (i32, i32) {
    %c0_i32 = arith.constant 0 : i32
    %c0_i32_0 = arith.constant 0 : i32
    %c0_i32_1 = arith.constant 0 : i32
    return %c0_i32, %c0_i32_0 : i32, i32
  }
  func.func @transform_9(%arg0: i32, %arg1: i32) -> (i32, i32) {
    %c0_i32 = arith.constant 0 : i32
    %c0_i32_0 = arith.constant 0 : i32
    %c0_i32_1 = arith.constant 0 : i32
    return %c0_i32, %c0_i32_0 : i32, i32
  }
  func.func @transform_10(%arg0: i32, %arg1: i32) -> (i32, i32) {
    %c0_i32 = arith.constant 0 : i32
    %c0_i32_0 = arith.constant 0 : i32
    %c0_i32_1 = arith.constant 0 : i32
    return %c0_i32, %c0_i32_0 : i32, i32
  }
  func.func @transform_11(%arg0: i32, %arg1: i32) -> (i32, i32) {
    %c0_i32 = arith.constant 0 : i32
    %c0_i32_0 = arith.constant 0 : i32
    %c0_i32_1 = arith.constant 0 : i32
    return %c0_i32, %c0_i32_0 : i32, i32
  }
  func.func @transform_12(%arg0: i32, %arg1: i32) -> (i32, i32) {
    %c0_i32 = arith.constant 0 : i32
    %c0_i32_0 = arith.constant 0 : i32
    return %c0_i32, %arg0 : i32, i32
  }
}

</mosaic_0001>

<bundles_post_ra>
// kernel: tpu_custom_call.1
= control target key start
LH: loop header
LB: loop body
LE: loop exit
PB: predicated region body
PF: predicated region fallthrough
CT: control target
= control target key end

     0   :  { %s5068_s0 = inlined_call_operand.vmem [shape: f32[4,512], index: 0, kind: input, shape index: {}]   ;;  %s5069_s1 = inlined_call_operand.vmem [shape: f32[64,4], index: 1, kind: input, shape index: {}]   ;;  %s5070_s2 = inlined_call_operand.vmem [shape: f32[128,64], index: 2, kind: input, shape index: {}]   ;;  %s5071_s3 = inlined_call_operand.vmem [shape: f32[128,1], index: 3, kind: input, shape index: {}]   ;;  %s5072_s4 = inlined_call_operand.vmem [shape: f32[256,128], index: 4, kind: input, shape index: {}]   ;;  %s5073_s5 = inlined_call_operand.vmem [shape: f32[256,1], index: 5, kind: input, shape index: {}]   ;;  %s5074_s6 = inlined_call_operand.vmem [shape: f32[128,256], index: 6, kind: input, shape index: {}]   ;;  %s5075_s7 = inlined_call_operand.vmem [shape: f32[128,1], index: 7, kind: input, shape index: {}]   ;;  %s5076_s8 = inlined_call_operand.vmem [shape: f32[64,128], index: 8, kind: input, shape index: {}]   ;;  %s5077_s9 = inlined_call_operand.vmem [shape: f32[64,1], index: 9, kind: input, shape index: {}]   ;;  %s5078_s10 = inlined_call_operand.vmem [shape: f32[1,64], index: 10, kind: input, shape index: {}]   ;;  %s5079_s11 = inlined_call_operand.<no memory space> [shape: f32[1,1], index: 11, kind: input, shape index: {}]   ;;  %s5080_s12 = inlined_call_operand.hbm [shape: f32[1,2], index: 12, kind: output, shape index: {}]  }
   0x1   :  { %v17_v0 = vstv %s5079_s11 }
   0x2   :  { %18 = vst [vmem:[#allocation3] sm:$0x1] %v17_v0 }
   0x3   :  { %v75_v1 = vld [vmem:[%s5069_s1 + $0x38] sm:$0xff]  ;;  %v74_v2 = vld [vmem:[%s5069_s1 + $0x30] sm:$0xff]  ;;  %v118_v3 = vlaneseq  ;;  %v3275_v4 = vmov 0   ;;  %v73_v6 = vld [vmem:[%s5069_s1 + $0x28] sm:$0xff] }
   0x4   :  { %3229 = vset.pattern.permute.xlu1 %v3275_v4  ;;  %3228 = vset.pattern.permute.xlu0 %v3275_v4 }
   0x5   :  { %113 = vperm.xlu0 %3228, %v75_v1   ;;  %108 = vperm.xlu1 %3229, %v74_v2   ;;  %v3358_v5 = vshrl.u32 %v118_v3, 7 }
   0x6   :  { %19 = vsyncpa [#allocation5], 0  ;;  %v3276_v8 = vmov 1   ;;  %v72_v10 = vld [vmem:[%s5069_s1 + $0x20] sm:$0xff]  ;;  %v3371_v11 = vld [vmem:[%s5068_s0 + $0x8] sm:$0xff]  ;;  %v3277_v17 = vmov 2  }
   0x7   :  { %v224_v7 = vsub.s32 5, %v3358_v5  ;;  %v356_v9 = vsub.s32 6, %v3358_v5  ;;  %v3374_v12 = vsub.s32 1, %v3358_v5  ;;  %v3383_v15 = vsub.s32 2, %v3358_v5  ;;  %v70_v18 = vld [vmem:[%s5069_s1 + $0x10] sm:$0xff]  ;;  %v71_v21 = vld [vmem:[%s5069_s1 + $0x18] sm:$0xff] }
   0x8   :  { %v3278_v20 = vmov 3   ;;  %v68_v22 = vld [vmem:[%s5069_s1] sm:$0xff]  ;;  %v69_v23 = vld [vmem:[%s5069_s1 + $0x8] sm:$0xff]  ;;  %v5081_v24 = vmov 0.0   ;;  %v609_v25 = vld [vmem:[%s5071_s3 + $0x78] sm:$0xff]  ;;  %v124_v29 = vsub.s32 4, %v3358_v5 }
   0x9   :  { %3230 = vset.pattern.permute.xlu1 %v3276_v8  ;;  %103 = vperm.xlu0 %3228, %v73_v6   ;;  %v233_v13 = vrot.slane %v3371_v11, %v224_v7  ;;  %v365_v16 = vrot.slane %v3371_v11, %v356_v9  ;;  %v608_v26 = vld [vmem:[%s5071_s3 + $0x70] sm:$0xff]  ;;  %v606_v27 = vld [vmem:[%s5071_s3 + $0x60] sm:$0xff]  ;;  %v605_v28 = vld [vmem:[%s5071_s3 + $0x58] sm:$0xff]  ;;  %v3431_v33 = vsub.s32 0, %v3358_v5  ;;  %v229_v49 = vrot.slane %v3371_v11, %v3374_v12  ;;  %s3281_s29 = smov [#allocation4]  }
   0xa   :  { %211 = vperm.xlu1 %3230, %v74_v2   ;;  %803 = vmatprep.mubr.f32.mxu0 %v5081_v24  ;;  %v607_v30 = vld [vmem:[%s5071_s3 + $0x68] sm:$0xff]  ;;  %v133_v32 = vrot.slane %v3371_v11, %v124_v29  ;;  %v604_v36 = vld [vmem:[%s5071_s3 + $0x50] sm:$0xff]  ;;  %v601_v37 = vld [vmem:[%s5071_s3 + $0x38] sm:$0xff]  ;;  %v361_v61 = vrot.slane %v3371_v11, %v3383_v15  ;;  %vm690_vm0 = vcmask 523264   ;;  %vm2375_vm1 = vcmask 7168  }
   0xb   :  { %v3380_v14 = vrot.slane %v233_v13, %v3374_v12  ;;  %v3392_v19 = vrot.slane %v365_v16, %v3383_v15  ;;  %869 = vmatprep.mubr.f32.mxu1 %v5081_v24  ;;  %v603_v31 = vld [vmem:[%s5071_s3 + $0x48] sm:$0xff]  ;;  %5086 = vst [vmem:[#allocation7_spill] sm:$0xff] %v3431_v33  ;;  %v602_v41 = vld [vmem:[%s5071_s3 + $0x40] sm:$0xff]  ;;  %v600_v47 = vld [vmem:[%s5071_s3 + $0x30] sm:$0xff]  ;;  %v129_v52 = vrot.slane %v3371_v11, %v3431_v33  ;;  %vm3280_vm2 = vmmov 0  }
   0xc   :  { %v3444_v38 = vrot.slane %v133_v32, %v3431_v33  ;;  %v599_v42 = vld [vmem:[%s5071_s3 + $0x28] sm:$0xff]  ;;  %v597_v48 = vld [vmem:[%s5071_s3 + $0x18] sm:$0xff]  ;;  %v66_v51 = vld [vmem:[%s5068_s0] sm:$0xff]  ;;  %v3486_v56 = vrot.slane %v229_v49, %v3374_v12  ;;  %v3525_v13 = vrot.slane %v361_v61, %v3383_v15  ;;  %s2982_s0 = sshll.u32 %s3281_s29, 4  ;;  %vm2974_vm3 = vcmask 8192   ;;  %s2983_s0 = int_to_ptr.vmem [resolvable:$true] %s2982_s0 }
   0xd   :  { %98 = vperm.xlu0 %3228, %v72_v10   ;;  %v598_v54 = vld [vmem:[%s5071_s3 + $0x20] sm:$0xff]  ;;  %v595_v55 = vld [vmem:[%s5071_s3 + $0x8] sm:$0xff]  ;;  %v121_v58 = vrot.slane %v66_v51, %v3431_v33  ;;  %v125_v59 = vrot.slane %v66_v51, %v124_v29  ;;  %v221_v60 = vrot.slane %v66_v51, %v3374_v12  ;;  %v3497_v63 = vrot.slane %v129_v52, %v3431_v33  ;;  %v596_v3 = vld [vmem:[%s5071_s3 + $0x10] sm:$0xff]  ;;  %s3253_s30 = scalar_lea.vmem %s2983_s0, 16  ;;  %p3258_p1 = scmp.lt.s32.totalorder %s2983_s0, %s2983_s0 }
   0xe   :  { %3231 = vset.pattern.permute.xlu1 %v3277_v17  ;;  %v225_v0 = vrot.slane %v66_v51, %v224_v7  ;;  %v1251_v5 = vld [vmem:[%s5073_s5 + $0xf0] sm:$0xff]  ;;  %v1236_v49 = vld [vmem:[%s5073_s5 + $0x78] sm:$0xff]  ;;  %p3254_p0 = scmp.ne.s32.totalorder %s2983_s0, %s3253_s30 }
   0xf   :  { %347 = vperm.xlu1 %3231, %v75_v1   ;;  %v3516_v7 = vrot.slane %v121_v58, %v3431_v33  ;;  %v3522_v11 = vrot.slane %v221_v60, %v3374_v12 }
  0x11   :  { %88 = vperm.xlu0 %3228, %v70_v18  }
  0x13   :  { %3232 = vset.pattern.permute.xlu1 %v3276_v8 }
  0x14   :  { %207 = vperm.xlu1 %3232, %v73_v6  }
  0x15   :  { %3241 = vset.pattern.permute.xlu0 %v3278_v20 }
  0x16   :  { %471 = vperm.xlu0 %3241, %v73_v6  }
  0x18   :  { %3233 = vset.pattern.permute.xlu1 %v3277_v17 }
  0x19   :  { %343 = vperm.xlu1 %3233, %v74_v2  }
  0x1a   :  { %3242 = vset.pattern.permute.xlu0 %v3276_v8 }
  0x1b   :  { %215 = vperm.xlu0 %3242, %v75_v1  }
  0x1d   :  { %3234 = vset.pattern.permute.xlu1 %v3276_v8 }
  0x1e   :  { %203 = vperm.xlu1 %3234, %v72_v10  }
  0x1f   :  { %199 = vperm.xlu0 %3242, %v71_v21  }
  0x22   :  { %3235 = vset.pattern.permute.xlu1 %v3278_v20 }
  0x23   :  { %479 = vperm.xlu1 %3235, %v75_v1   ;;  %187 = vperm.xlu0 %3242, %v68_v22  }
  0x27   :  { %3236 = vset.pattern.permute.xlu1 %v3275_v4  ;;  %3247 = vset.pattern.permute.xlu0 %v3277_v17 }
  0x28   :  { %93 = vperm.xlu1 %3236, %v71_v21   ;;  %339 = vperm.xlu0 %3247, %v73_v6  }
  0x2c   :  { %3237 = vset.pattern.permute.xlu1 %v3277_v17  ;;  %327 = vperm.xlu0 %3247, %v70_v18  }
  0x2d   :  { %335 = vperm.xlu1 %3237, %v72_v10  }
  0x30   :  { %319 = vperm.xlu0 %3247, %v68_v22  }
  0x31   :  { %3238 = vset.pattern.permute.xlu1 %v3278_v20 }
  0x32   :  { %475 = vperm.xlu1 %3238, %v74_v2  }
  0x34   :  { %3250 = vset.pattern.permute.xlu0 %v3278_v20 }
  0x35   :  { %451 = vperm.xlu0 %3250, %v68_v22  }
  0x36   :  { %3239 = vset.pattern.permute.xlu1 %v3276_v8 }
  0x37   :  { %195 = vperm.xlu1 %3239, %v70_v18  }
  0x39   :  { %3252 = vset.pattern.permute.xlu0 %v3275_v4 }
  0x3a   :  { %677 = vperm.xlu0 %3252, %v607_v30  }
  0x3b   :  { %3240 = vset.pattern.permute.xlu1 %v3277_v17 }
  0x3c   :  { %331 = vperm.xlu1 %3240, %v71_v21  }
  0x3e   :  { %662 = vperm.xlu0 %3252, %v604_v36  }
  0x40   :  { %3243 = vset.pattern.permute.xlu1 %v3275_v4 }
  0x41   :  { %83 = vperm.xlu1 %3243, %v69_v23  }
  0x42   :  { %652 = vperm.xlu0 %3252, %v602_v41  }
  0x45   :  { %3244 = vset.pattern.permute.xlu1 %v3276_v8 }
  0x46   :  { %191 = vperm.xlu1 %3244, %v69_v23   ;;  %642 = vperm.xlu0 %3252, %v600_v47  }
  0x4a   :  { %3245 = vset.pattern.permute.xlu1 %v3278_v20  ;;  %632 = vperm.xlu0 %3252, %v598_v54  }
  0x4b   :  { %467 = vperm.xlu1 %3245, %v72_v10   ;;  %v3519_v10 = vrot.slane %v125_v59, %v3431_v33 }
  0x4e   :  { %622 = vperm.xlu0 %3252, %v596_v3   ;;  %v1249_v3 = vld [vmem:[%s5073_s5 + $0xe0] sm:$0xff] }
  0x4f   :  { %3246 = vset.pattern.permute.xlu1 %v3275_v4 }
  0x50   :  { %78 = vperm.xlu1 %3246, %v68_v22  }
  0x54   :  { %3248 = vset.pattern.permute.xlu1 %v3277_v17  ;;  %v3530_v17 = vrot.slane %v225_v0, %v3374_v12 }
  0x55   :  { %323 = vperm.xlu1 %3248, %v69_v23  }
  0x59   :  { %3249 = vset.pattern.permute.xlu1 %v3278_v20  ;;  %v353_v20 = vrot.slane %v66_v51, %v3383_v15 }
  0x5a   :  { %463 = vperm.xlu1 %3249, %v71_v21   ;;  %v357_v21 = vrot.slane %v66_v51, %v356_v9 }
  0x5c   :  { %v3563_v41 = vrot.slane %v357_v21, %v3383_v15 }
  0x5e   :  { %459 = vperm.xlu1 %3249, %v70_v18  }
  0x62   :  { %455 = vperm.xlu1 %3249, %v69_v23  }
  0x66   :  { %3251 = vset.pattern.permute.xlu1 %v3275_v4  ;;  %v1252_v4 = vld [vmem:[%s5073_s5 + $0xf8] sm:$0xff] }
  0x67   :  { %687 = vperm.xlu1 %3251, %v609_v25  }
  0x6b   :  { %682 = vperm.xlu1 %3251, %v608_v26   ;;  %v594_v26 = vld [vmem:[%s5071_s3] sm:$0xff] }
  0x6c   :  { %612 = vperm.xlu0 %3252, %v594_v26  }
  0x6f   :  { %672 = vperm.xlu1 %3251, %v606_v27  }
  0x70   :  { %1330 = vperm.xlu0 %3252, %v1236_v49  }
  0x73   :  { %667 = vperm.xlu1 %3251, %v605_v28  }
  0x77   :  { %657 = vperm.xlu1 %3251, %v603_v31  }
  0x7b   :  { %647 = vperm.xlu1 %3251, %v601_v37   ;;  %v3560_v37 = vrot.slane %v353_v20, %v3383_v15  ;;  %v1250_v15 = vld [vmem:[%s5073_s5 + $0xe8] sm:$0xff] }
  0x7f   :  { %637 = vperm.xlu1 %3251, %v599_v42  }
  0x80   :  { %v3433_v34 = vpop.permute.xlu1 %108  ;;  %v3435_v35 = vpop.permute.xlu0 %113 }
  0x81   :  { %v181_v43 = vmul.f32 %v3444_v38, %v3433_v34  ;;  %v180_v16 = vmul.f32 %v3497_v63, %v3433_v34  ;;  %v184_v22 = vmul.f32 %v3497_v63, %v3435_v35  ;;  %v185_v23 = vmul.f32 %v3444_v38, %v3435_v35 }
  0x82   :  { %v182_v9 = vmul.f32 %v3516_v7, %v3435_v35  ;;  %v183_v27 = vmul.f32 %v3519_v10, %v3435_v35 }
  0x83   :  { %627 = vperm.xlu1 %3251, %v597_v48  }
  0x84   :  { %v3446_v39 = vpop.permute.xlu0 %103 }
  0x85   :  { %v3448_v40 = vpop.permute.xlu1 %211  ;;  %v177_v57 = vmul.f32 %v3444_v38, %v3446_v39  ;;  %v175_v26 = vmul.f32 %v3519_v10, %v3446_v39 }
  0x86   :  { %v281_v44 = vmul.f32 %v3380_v14, %v3448_v40  ;;  %v280_v6 = vmul.f32 %v3486_v56, %v3448_v40 }
  0x87   :  { %617 = vperm.xlu1 %3251, %v595_v55  }
  0x88   :  { %v3460_v45 = vpop.permute.xlu0 %98  ;;  %v313_v46 = vadd.f32 %v281_v44, %v181_v43  ;;  %v312_v28 = vadd.f32 %v280_v6, %v180_v16 }
  0x89   :  { %v173_v43 = vmul.f32 %v3444_v38, %v3460_v45 }
  0x8a   :  { %v3470_v50 = vpop.permute.xlu1 %347 }
  0x8b   :  { %1410 = vperm.xlu1 %3251, %v1252_v4   ;;  %v415_v59 = vmul.f32 %v3563_v41, %v3470_v50  ;;  %v414_v60 = vmul.f32 %v3560_v37, %v3470_v50 }
  0x8c   :  { %v3477_v53 = vpop.permute.xlu0 %88 }
  0x8f   :  { %v3494_v62 = vpop.permute.xlu1 %207  ;;  %1405 = vperm.xlu1 %3251, %v1251_v5  }
  0x90   :  { %v277_v1 = vmul.f32 %v3380_v14, %v3494_v62  ;;  %v275_v5 = vmul.f32 %v3530_v17, %v3494_v62 }
  0x91   :  { %v3503_v2 = vpop.permute.xlu0 %471 }
  0x92   :  { %v3513_v8 = vadd.f32 %v277_v1, %v177_v57  ;;  %v417_v57 = vmul.f32 %v3392_v19, %v3470_v50  ;;  %v1235_v1 = vld [vmem:[%s5073_s5 + $0x70] sm:$0xff] }
  0x93   :  { %1400 = vperm.xlu1 %3251, %v1250_v15   ;;  %1325 = vperm.xlu0 %3252, %v1235_v1   ;;  %v1233_v15 = vld [vmem:[%s5073_s5 + $0x60] sm:$0xff] }
  0x94   :  { %v3532_v18 = vpop.permute.xlu1 %343 }
  0x95   :  { %v412_v25 = vmul.f32 %v3525_v13, %v3532_v18  ;;  %v413_v12 = vmul.f32 %v3392_v19, %v3532_v18 }
  0x96   :  { %v216_v29 = vpop.permute.xlu0 %215 }
  0x97   :  { %v282_v30 = vmul.f32 %v3522_v11, %v216_v29  ;;  %v283_v31 = vmul.f32 %v3530_v17, %v216_v29  ;;  %v284_v32 = vmul.f32 %v3486_v56, %v216_v29  ;;  %v285_v36 = vmul.f32 %v3380_v14, %v216_v29  ;;  %1395 = vperm.xlu1 %3251, %v1249_v3   ;;  %v1247_v3 = vld [vmem:[%s5073_s5 + $0xd0] sm:$0xff] }
  0x98   :  { %v3565_v42 = vadd.f32 %v412_v25, %v312_v28  ;;  %v3567_v35 = vadd.f32 %v413_v12, %v313_v46  ;;  %v416_v46 = vmul.f32 %v3525_v13, %v3470_v50  ;;  %v1234_v25 = vld [vmem:[%s5073_s5 + $0x68] sm:$0xff]  ;;  %v1248_v12 = vld [vmem:[%s5073_s5 + $0xd8] sm:$0xff]  ;;  %v174_v28 = vmul.f32 %v3516_v7, %v3446_v39 }
  0x99   :  { %v316_v44 = vadd.f32 %v284_v32, %v184_v22  ;;  %v3571_v47 = vpop.permute.xlu1 %203  ;;  %v317_v48 = vadd.f32 %v285_v36, %v185_v23  ;;  %v315_v54 = vadd.f32 %v283_v31, %v183_v27  ;;  %v314_v55 = vadd.f32 %v282_v30, %v182_v9  ;;  %1320 = vperm.xlu0 %3252, %v1234_v25  }
  0x9a   :  { %v273_v51 = vmul.f32 %v3380_v14, %v3571_v47  ;;  %v3583_v52 = vpop.permute.xlu0 %199  ;;  %v176_v22 = vmul.f32 %v3497_v63, %v3446_v39  ;;  %v276_v23 = vmul.f32 %v3486_v56, %v3494_v62  ;;  %v274_v29 = vmul.f32 %v3522_v11, %v3494_v62 }
  0x9b   :  { %v3587_v58 = vadd.f32 %v416_v46, %v316_v44  ;;  %v3593_v61 = vadd.f32 %v417_v57, %v317_v48  ;;  %v447_v16 = vadd.f32 %v415_v59, %v315_v54  ;;  %v446_v20 = vadd.f32 %v414_v60, %v314_v55  ;;  %1390 = vperm.xlu1 %3251, %v1248_v12  }
  0x9c   :  { %v3595_v0 = vadd.f32 %v273_v51, %v173_v43  ;;  %v178_v32 = vmul.f32 %v3516_v7, %v3433_v34  ;;  %v278_v36 = vmul.f32 %v3522_v11, %v3448_v40  ;;  %v172_v43 = vmul.f32 %v3497_v63, %v3460_v45 }
  0x9d   :  { %v272_v44 = vmul.f32 %v3486_v56, %v3571_v47  ;;  %v308_v39 = vadd.f32 %v276_v23, %v176_v22  ;;  %v279_v46 = vmul.f32 %v3530_v17, %v3448_v40  ;;  %v307_v55 = vadd.f32 %v275_v5, %v175_v26  ;;  %1315 = vperm.xlu0 %3252, %v1233_v15   ;;  %v1232_v23 = vld [vmem:[%s5073_s5 + $0x58] sm:$0xff]  ;;  %v1246_v26 = vld [vmem:[%s5073_s5 + $0xc8] sm:$0xff] }
  0x9e   :  { %v3603_v4 = vpop.permute.xlu1 %479  ;;  %v3605_v6 = vpop.permute.xlu0 %187  ;;  %v179_v57 = vmul.f32 %v3519_v10, %v3433_v34  ;;  %v410_v59 = vmul.f32 %v3560_v37, %v3532_v18  ;;  %v306_v1 = vadd.f32 %v274_v29, %v174_v28  ;;  %v411_v40 = vmul.f32 %v3563_v41, %v3532_v18 }
  0x9f   :  { %v511_v50 = vadd.f32 %v3603_v4, %v447_v16  ;;  %v510_v21 = vadd.f32 %v3603_v4, %v446_v20  ;;  %v304_v16 = vadd.f32 %v272_v44, %v172_v43  ;;  %v310_v18 = vadd.f32 %v278_v36, %v178_v32  ;;  %1385 = vperm.xlu1 %3251, %v1247_v3   ;;  %v1231_v44 = vld [vmem:[%s5073_s5 + $0x50] sm:$0xff] }
  0xa0   :  { %v311_v25 = vadd.f32 %v279_v46, %v179_v57  ;;  %v269_v29 = vmul.f32 %v3380_v14, %v3583_v52  ;;  %v1230_v57 = vld [vmem:[%s5073_s5 + $0x48] sm:$0xff] }
  0xa1   :  { %v543_v9 = vmul.f32 0.01, %v511_v50  ;;  %v542_v27 = vmul.f32 0.01, %v510_v21  ;;  %1310 = vperm.xlu0 %3252, %v1232_v23  }
  0xa3   :  { %v3627_v30 = vpop.permute.xlu1 %93  ;;  %v340_v31 = vpop.permute.xlu0 %339  ;;  %v575_v51 = vmax.f32 %v511_v50, %v543_v9  ;;  %v574_v54 = vmax.f32 %v510_v21, %v542_v27  ;;  %v443_v9 = vadd.f32 %v411_v40, %v311_v25  ;;  %v442_v27 = vadd.f32 %v410_v59, %v310_v18  ;;  %1380 = vperm.xlu1 %3251, %v1246_v26  }
  0xa4   :  { %v406_v48 = vmul.f32 %v3560_v37, %v340_v31  ;;  %v407_v62 = vmul.f32 %v3563_v41, %v340_v31  ;;  %v408_v49 = vmul.f32 %v3525_v13, %v340_v31  ;;  %v409_v34 = vmul.f32 %v3392_v19, %v340_v31 }
  0xa5   :  { %755 = vmatprep.subr.mxu0 %v575_v51  ;;  %3205 = vmatprep.subr.mxu1 %v575_v51  ;;  %v169_v31 = vmul.f32 %v3444_v38, %v3627_v30  ;;  %v164_v59 = vmul.f32 %v3497_v63, %v3477_v53 }
  0xa6   :  { %v3649_v60 = vadd.f32 %v408_v49, %v308_v39  ;;  %v439_v50 = vadd.f32 %v407_v62, %v307_v55  ;;  %756 = vmatpush1.msra.mxu0 %v574_v54  ;;  %3213 = vmatpush1.msra.mxu1 %v574_v54  ;;  %v438_v22 = vadd.f32 %v406_v48, %v306_v1  ;;  %v1245_v62 = vld [vmem:[%s5073_s5 + $0xc0] sm:$0xff] }
  0xa7   :  { %v3680_v43 = vadd.f32 %v409_v34, %v3513_v8  ;;  %1305 = vperm.xlu0 %3252, %v1231_v44   ;;  %v3690_v49 = vpop.permute.xlu0 %327  ;;  %v301_v55 = vadd.f32 %v269_v29, %v169_v31  ;;  %1375 = vperm.xlu1 %3251, %v1245_v62  }
  0xa8   :  { %v3656_v20 = vpop.permute.xlu1 %335  ;;  %v503_v28 = vadd.f32 %v3503_v2, %v439_v50  ;;  %v502_v36 = vadd.f32 %v3503_v2, %v438_v22  ;;  %v396_v34 = vmul.f32 %v3525_v13, %v3690_v49  ;;  %v168_v22 = vmul.f32 %v3497_v63, %v3627_v30 }
  0xa9   :  { %v404_v21 = vmul.f32 %v3525_v13, %v3656_v20  ;;  %v405_v5 = vmul.f32 %v3392_v19, %v3656_v20  ;;  %v397_v18 = vmul.f32 %v3392_v19, %v3690_v49 }
  0xaa   :  { %v535_v8 = vmul.f32 0.01, %v503_v28  ;;  %v534_v54 = vmul.f32 0.01, %v502_v36 }
  0xab   :  { %v3664_v12 = vadd.f32 %v404_v21, %v304_v16  ;;  %v3693_v51 = vadd.f32 %v405_v5, %v3595_v0  ;;  %v165_v16 = vmul.f32 %v3444_v38, %v3477_v53  ;;  %1300 = vperm.xlu0 %3252, %v1230_v57   ;;  %v268_v21 = vmul.f32 %v3486_v56, %v3583_v52  ;;  %v1244_v5 = vld [vmem:[%s5073_s5 + $0xb8] sm:$0xff]  ;;  %v1227_v57 = vld [vmem:[%s5073_s5 + $0x30] sm:$0xff] }
  0xac   :  { %v567_v23 = vmax.f32 %v503_v28, %v535_v8  ;;  %v566_v26 = vmax.f32 %v502_v36, %v534_v54  ;;  %1370 = vperm.xlu1 %3251, %v1244_v5   ;;  %v1242_v54 = vld [vmem:[%s5073_s5 + $0xa8] sm:$0xff] }
  0xad   :  { %v3676_v32 = vpop.permute.xlu1 %475  ;;  %v300_v31 = vadd.f32 %v268_v21, %v168_v22  ;;  %v1226_v21 = vld [vmem:[%s5073_s5 + $0x28] sm:$0xff] }
  0xae   :  { %v507_v39 = vadd.f32 %v3676_v32, %v443_v9  ;;  %v506_v48 = vadd.f32 %v3676_v32, %v442_v27  ;;  %v1229_v27 = vld [vmem:[%s5073_s5 + $0x40] sm:$0xff] }
  0xaf   :  { %1295 = vperm.xlu0 %3252, %v1229_v27  }
  0xb0   :  { %v539_v15 = vmul.f32 0.01, %v507_v39  ;;  %v538_v46 = vmul.f32 0.01, %v506_v48 }
  0xb2   :  { %v3700_v1 = vpop.permute.xlu1 %195  ;;  %v571_v3 = vmax.f32 %v507_v39, %v539_v15  ;;  %v570_v40 = vmax.f32 %v506_v48, %v538_v46  ;;  %v1243_v48 = vld [vmem:[%s5073_s5 + $0xb0] sm:$0xff]  ;;  %v1228_v46 = vld [vmem:[%s5073_s5 + $0x38] sm:$0xff] }
  0xb3   :  { %v264_v0 = vmul.f32 %v3486_v56, %v3700_v1  ;;  %v265_v50 = vmul.f32 %v3380_v14, %v3700_v1  ;;  %1365 = vperm.xlu1 %3251, %v1243_v48   ;;  %1290 = vperm.xlu0 %3252, %v1228_v46  }
  0xb4   :  { %757 = vmatprep.subr.mxu0 %v571_v3  ;;  %3206 = vmatprep.subr.mxu1 %v571_v3  ;;  %v270_v3 = vmul.f32 %v3522_v11, %v3571_v47 }
  0xb5   :  { %v296_v25 = vadd.f32 %v264_v0, %v164_v59  ;;  %758 = vmatpush1.msra.mxu0 %v570_v40  ;;  %3214 = vmatpush1.msra.mxu1 %v570_v40  ;;  %v297_v9 = vadd.f32 %v265_v50, %v165_v16  ;;  %v171_v59 = vmul.f32 %v3519_v10, %v3460_v45 }
  0xb6   :  { %759 = vmatprep.subr.mxu0 %v567_v23  ;;  %3207 = vmatprep.subr.mxu1 %v567_v23  ;;  %v271_v40 = vmul.f32 %v3530_v17, %v3571_v47  ;;  %v402_v16 = vmul.f32 %v3560_v37, %v3656_v20  ;;  %v403_v0 = vmul.f32 %v3563_v41, %v3656_v20 }
  0xb7   :  { %v3722_v29 = vpop.permute.xlu1 %331  ;;  %760 = vmatpush1.msra.mxu0 %v566_v26  ;;  %3215 = vmatpush1.msra.mxu1 %v566_v26  ;;  %v3724_v28 = vadd.f32 %v396_v34, %v296_v25  ;;  %v3730_v39 = vadd.f32 %v397_v18, %v297_v9  ;;  %v1240_v26 = vld [vmem:[%s5073_s5 + $0x98] sm:$0xff]  ;;  %v1225_v9 = vld [vmem:[%s5073_s5 + $0x20] sm:$0xff] }
  0xb8   :  { %v400_v36 = vmul.f32 %v3525_v13, %v3722_v29  ;;  %v401_v44 = vmul.f32 %v3392_v19, %v3722_v29  ;;  %1360 = vperm.xlu1 %3251, %v1242_v54   ;;  %1285 = vperm.xlu0 %3252, %v1227_v57   ;;  %v303_v22 = vadd.f32 %v271_v40, %v171_v59  ;;  %v1239_v54 = vld [vmem:[%s5073_s5 + $0x90] sm:$0xff] }
  0xb9   :  { %v163_v57 = vmul.f32 %v3519_v10, %v3477_v53  ;;  %v267_v59 = vmul.f32 %v3530_v17, %v3583_v52  ;;  %v254_v40 = vmul.f32 %v3522_v11, %v3605_v6 }
  0xba   :  { %v3735_v62 = vadd.f32 %v400_v36, %v300_v31  ;;  %v3737_v15 = vadd.f32 %v401_v44, %v301_v55  ;;  %v170_v55 = vmul.f32 %v3516_v7, %v3460_v45  ;;  %v1241_v45 = vld [vmem:[%s5073_s5 + $0xa0] sm:$0xff]  ;;  %v435_v25 = vadd.f32 %v403_v0, %v303_v22  ;;  %v3790_v44 = vpop.permute.xlu0 %319  ;;  %v1224_v22 = vld [vmem:[%s5073_s5 + $0x18] sm:$0xff] }
  0xbb   :  { %v3788_v36 = vmul.f32 %v3516_v7, %v3477_v53  ;;  %v256_v53 = vmul.f32 %v3486_v56, %v3605_v6 }
  0xbc   :  { %v3742_v8 = vpop.permute.xlu1 %83  ;;  %v302_v23 = vadd.f32 %v270_v3, %v170_v55  ;;  %1355 = vperm.xlu1 %3251, %v1241_v45   ;;  %1280 = vperm.xlu0 %3252, %v1226_v21   ;;  %v266_v55 = vmul.f32 %v3522_v11, %v3583_v52  ;;  %v167_v3 = vmul.f32 %v3519_v10, %v3627_v30 }
  0xbd   :  { %v161_v34 = vmul.f32 %v3444_v38, %v3742_v8  ;;  %v388_v52 = vmul.f32 %v3525_v13, %v3790_v44 }
  0xbe   :  { %v434_v18 = vadd.f32 %v402_v16, %v302_v23  ;;  %v255_v16 = vmul.f32 %v3530_v17, %v3605_v6  ;;  %v257_v23 = vmul.f32 %v3380_v14, %v3605_v6  ;;  %v160_v6 = vmul.f32 %v3497_v63, %v3742_v8 }
  0xc0   :  { %1350 = vperm.xlu1 %3251, %v1240_v26   ;;  %1275 = vperm.xlu0 %3252, %v1225_v9   ;;  %v389_v9 = vmul.f32 %v3392_v19, %v3790_v44 }
  0xc1   :  { %v3762_v50 = vpop.permute.xlu1 %191 }
  0xc2   :  { %v261_v47 = vmul.f32 %v3380_v14, %v3762_v50  ;;  %v263_v14 = vmul.f32 %v3530_v17, %v3700_v1 }
  0xc4   :  { %v3774_v20 = vadd.f32 %v261_v47, %v161_v34  ;;  %1345 = vperm.xlu1 %3251, %v1239_v54   ;;  %1270 = vperm.xlu0 %3252, %v1224_v22  }
  0xc6   :  { %v3779_v5 = vpop.permute.xlu1 %467 }
  0xc7   :  { %v499_v27 = vadd.f32 %v3779_v5, %v435_v25  ;;  %v498_v31 = vadd.f32 %v3779_v5, %v434_v18  ;;  %v166_v25 = vmul.f32 %v3516_v7, %v3627_v30  ;;  %v260_v18 = vmul.f32 %v3486_v56, %v3762_v50 }
  0xc9   :  { %v531_v48 = vmul.f32 0.01, %v499_v27  ;;  %v530_v46 = vmul.f32 0.01, %v498_v31 }
  0xcb   :  { %v79_v0 = vpop.permute.xlu1 %78  ;;  %v563_v45 = vmax.f32 %v499_v27, %v531_v48  ;;  %v562_v34 = vmax.f32 %v498_v31, %v530_v46  ;;  %v299_v27 = vadd.f32 %v267_v59, %v167_v3  ;;  %v262_v31 = vmul.f32 %v3522_v11, %v3700_v1 }
  0xcc   :  { %v156_v47 = vmul.f32 %v3497_v63, %v79_v0  ;;  %v157_v21 = vmul.f32 %v3444_v38, %v79_v0  ;;  %v1238_v38 = vld [vmem:[%s5073_s5 + $0x88] sm:$0xff]  ;;  %v155_v56 = vmul.f32 %v3519_v10, %v79_v0  ;;  %v398_v48 = vmul.f32 %v3560_v37, %v3722_v29  ;;  %v1223_v63 = vld [vmem:[%s5073_s5 + $0x10] sm:$0xff] }
  0xcd   :  { %761 = vmatprep.subr.mxu0 %v563_v45  ;;  %3208 = vmatprep.subr.mxu1 %v563_v45  ;;  %v399_v46 = vmul.f32 %v3563_v41, %v3722_v29  ;;  %v292_v3 = vadd.f32 %v260_v18, %v160_v6  ;;  %v154_v45 = vmul.f32 %v3516_v7, %v79_v0 }
  0xce   :  { %v288_v26 = vadd.f32 %v256_v53, %v156_v47  ;;  %762 = vmatpush1.msra.mxu0 %v562_v34  ;;  %3216 = vmatpush1.msra.mxu1 %v562_v34  ;;  %v289_v30 = vadd.f32 %v257_v23, %v157_v21  ;;  %v1237_v53 = vld [vmem:[%s5073_s5 + $0x80] sm:$0xff]  ;;  %v395_v29 = vmul.f32 %v3563_v41, %v3690_v49 }
  0xcf   :  { %1340 = vperm.xlu1 %3251, %v1238_v38   ;;  %v387_v47 = vmul.f32 %v3563_v41, %v3790_v44  ;;  %v298_v21 = vadd.f32 %v266_v55, %v166_v25  ;;  %v295_v0 = vadd.f32 %v263_v14, %v163_v57  ;;  %v287_v23 = vadd.f32 %v255_v16, %v155_v56  ;;  %v1222_v55 = vld [vmem:[%s5073_s5 + $0x8] sm:$0xff] }
  0xd0   :  { %v324_v54 = vpop.permute.xlu1 %323  ;;  %v3838_v59 = vadd.f32 %v388_v52, %v288_v26  ;;  %v3853_v52 = vadd.f32 %v389_v9, %v289_v30  ;;  %1265 = vperm.xlu0 %3252, %v1223_v63   ;;  %v431_v18 = vadd.f32 %v399_v46, %v299_v27  ;;  %v259_v25 = vmul.f32 %v3530_v17, %v3762_v50 }
  0xd1   :  { %v392_v34 = vmul.f32 %v3525_v13, %v324_v54  ;;  %v393_v1 = vmul.f32 %v3392_v19, %v324_v54  ;;  %v394_v19 = vmul.f32 %v3560_v37, %v3690_v49  ;;  %v430_v38 = vadd.f32 %v398_v48, %v298_v21 }
  0xd2   :  { %v386_v57 = vmul.f32 %v3560_v37, %v3790_v44  ;;  %v286_v26 = vadd.f32 %v254_v40, %v154_v45  ;;  %v258_v49 = vmul.f32 %v3522_v11, %v3762_v50  ;;  %v158_v14 = vmul.f32 %v3516_v7, %v3742_v8  ;;  %v1221_v11 = vld [vmem:[%s5073_s5] sm:$0xff]  ;;  %v3885_v50 = vpop.permute.xlu0 %451 }
  0xd3   :  { %v3855_v22 = vadd.f32 %v392_v34, %v292_v3  ;;  %v3858_v13 = vadd.f32 %v393_v1, %v3774_v20  ;;  %1335 = vperm.xlu1 %3251, %v1237_v53   ;;  %v294_v20 = vadd.f32 %v262_v31, %v3788_v36  ;;  %v159_v17 = vmul.f32 %v3519_v10, %v3742_v8 }
  0xd4   :  { %v427_v6 = vadd.f32 %v395_v29, %v295_v0  ;;  %v419_v44 = vadd.f32 %v387_v47, %v287_v23  ;;  %1260 = vperm.xlu0 %3252, %v1222_v55   ;;  %v390_v56 = vmul.f32 %v3560_v37, %v324_v54  ;;  %v391_v36 = vmul.f32 %v3563_v41, %v324_v54 }
  0xd5   :  { %v3869_v16 = vpop.permute.xlu1 %463  ;;  %v426_v7 = vadd.f32 %v394_v19, %v294_v20  ;;  %v291_v48 = vadd.f32 %v259_v25, %v159_v17  ;;  %v418_v10 = vadd.f32 %v386_v57, %v286_v26  ;;  %v290_v37 = vadd.f32 %v258_v49, %v158_v14 }
  0xd6   :  { %v495_v9 = vadd.f32 %v3869_v16, %v431_v18  ;;  %v494_v27 = vadd.f32 %v3869_v16, %v430_v38  ;;  %v483_v34 = vadd.f32 %v3885_v50, %v419_v44  ;;  %v513_v19 = vadd.f32 %v3603_v4, %v3593_v61 }
  0xd7   :  { %v423_v3 = vadd.f32 %v391_v36, %v291_v48  ;;  %v422_v45 = vadd.f32 %v390_v56, %v290_v37  ;;  %v482_v29 = vadd.f32 %v3885_v50, %v418_v10  ;;  %v512_v18 = vadd.f32 %v3603_v4, %v3587_v58 }
  0xd8   :  { %v527_v40 = vmul.f32 0.01, %v495_v9  ;;  %v526_v30 = vmul.f32 0.01, %v494_v27  ;;  %1255 = vperm.xlu0 %3252, %v1221_v11   ;;  %v515_v25 = vmul.f32 0.01, %v483_v34  ;;  %v509_v20 = vadd.f32 %v3676_v32, %v3567_v35 }
  0xd9   :  { %v3887_v31 = vpop.permute.xlu1 %459  ;;  %v514_v57 = vmul.f32 0.01, %v482_v29  ;;  %v508_v26 = vadd.f32 %v3676_v32, %v3565_v42  ;;  %v545_v61 = vmul.f32 0.01, %v513_v19  ;;  %v505_v58 = vadd.f32 %v3503_v2, %v3680_v43  ;;  %v3912_v42 = vld [vmem:[%s5070_s2] sm:$0xff]  ;;  %v3917_v35 = vld [vmem:[%s5070_s2 + $0x58] sm:$0xff] }
  0xda   :  { %v559_v8 = vmax.f32 %v495_v9, %v527_v40  ;;  %v558_v46 = vmax.f32 %v494_v27, %v526_v30  ;;  %v491_v63 = vadd.f32 %v3887_v31, %v427_v6  ;;  %v490_v41 = vadd.f32 %v3887_v31, %v426_v7  ;;  %v3935_v40 = vld [vmem:[%s5070_s2 + $0x8] sm:$0xff]  ;;  %v3945_v11 = vld [vmem:[%s5070_s2 + $0x60] sm:$0xff] }
  0xdb   :  { %v547_v4 = vmax.f32 %v483_v34, %v515_v25  ;;  %v544_v27 = vmul.f32 0.01, %v512_v18  ;;  %v504_v14 = vadd.f32 %v3503_v2, %v3649_v60  ;;  %v546_v17 = vmax.f32 %v482_v29, %v514_v57  ;;  %v583_v25 = vld [vmem:[%s5070_s2 + $0x28] sm:$0xff]  ;;  %v584_v57 = vld [vmem:[%s5070_s2 + $0x30] sm:$0xff] }
  0xdc   :  { %763 = vmatprep.subr.mxu0 %v559_v8  ;;  %3209 = vmatprep.subr.mxu1 %v559_v8  ;;  %v523_v54 = vmul.f32 0.01, %v491_v63  ;;  %v522_v53 = vmul.f32 0.01, %v490_v41  ;;  %v541_v32 = vmul.f32 0.01, %v509_v20  ;;  %v501_v43 = vadd.f32 %v3779_v5, %v3693_v51 }
  0xdd   :  { %v3892_v1 = vpop.permute.xlu1 %455  ;;  %764 = vmatpush1.msra.mxu0 %v558_v46  ;;  %3217 = vmatpush1.msra.mxu1 %v558_v46  ;;  %v500_v2 = vadd.f32 %v3779_v5, %v3664_v12  ;;  %v540_v60 = vmul.f32 0.01, %v508_v26  ;;  %v577_v6 = vmax.f32 %v513_v19, %v545_v61  ;;  %v537_v44 = vmul.f32 0.01, %v505_v58 }
  0xde   :  { %v555_v47 = vmax.f32 %v491_v63, %v523_v54  ;;  %v487_v21 = vadd.f32 %v3892_v1, %v423_v3  ;;  %v486_v0 = vadd.f32 %v3892_v1, %v422_v45  ;;  %v554_v23 = vmax.f32 %v490_v41, %v522_v53  ;;  %v580_v63 = vld [vmem:[%s5070_s2 + $0x10] sm:$0xff]  ;;  %v3966_v54 = vld [vmem:[%s5070_s2 + $0x68] sm:$0xff] }
  0xdf   :  { %v497_v56 = vadd.f32 %v3869_v16, %v3737_v15  ;;  %v496_v36 = vadd.f32 %v3869_v16, %v3735_v62  ;;  %v576_v12 = vmax.f32 %v512_v18, %v544_v27  ;;  %v536_v51 = vmul.f32 0.01, %v504_v14  ;;  %v582_v18 = vld [vmem:[%s5070_s2 + $0x20] sm:$0xff] }
  0xe0   :  { %765 = vmatprep.subr.mxu0 %v555_v47  ;;  %3210 = vmatprep.subr.mxu1 %v555_v47  ;;  %v519_v38 = vmul.f32 0.01, %v487_v21  ;;  %v518_v55 = vmul.f32 0.01, %v486_v0  ;;  %v573_v5 = vmax.f32 %v509_v20, %v541_v32  ;;  %v533_v15 = vmul.f32 0.01, %v501_v43 }
  0xe1   :  { %766 = vmatpush1.msra.mxu0 %v554_v23  ;;  %3218 = vmatpush1.msra.mxu1 %v554_v23  ;;  %v493_v62 = vadd.f32 %v3887_v31, %v3730_v39  ;;  %v492_v16 = vadd.f32 %v3887_v31, %v3724_v28  ;;  %v572_v30 = vmax.f32 %v508_v26, %v540_v60  ;;  %v532_v7 = vmul.f32 0.01, %v500_v2  ;;  %v3979_v47 = vld [vmem:[%s5070_s2 + $0x70] sm:$0xff]  ;;  %v585_v20 = vld [vmem:[%s5070_s2 + $0x38] sm:$0xff]  ;;  %v586_v26 = vld [vmem:[%s5070_s2 + $0x40] sm:$0xff] }
  0xe2   :  { %v551_v49 = vmax.f32 %v487_v21, %v519_v38  ;;  %v550_v9 = vmax.f32 %v486_v0, %v518_v55  ;;  %v569_v48 = vmax.f32 %v505_v58, %v537_v44  ;;  %v529_v10 = vmul.f32 0.01, %v497_v56  ;;  %v593_v55 = vld [vmem:[%s5070_s2 + $0x78] sm:$0xff] }
  0xe3   :  { %v489_v8 = vadd.f32 %v3892_v1, %v3858_v13  ;;  %v488_v39 = vadd.f32 %v3892_v1, %v3855_v22  ;;  %v568_v28 = vmax.f32 %v504_v14, %v536_v51  ;;  %v528_v31 = vmul.f32 0.01, %v496_v36  ;;  %v581_v1 = vld [vmem:[%s5070_s2 + $0x18] sm:$0xff] }
  0xe4   :  { %767 = vmatprep.subr.mxu0 %v551_v49  ;;  %3211 = vmatprep.subr.mxu1 %v551_v49  ;;  %v565_v46 = vmax.f32 %v501_v43, %v533_v15  ;;  %v525_v37 = vmul.f32 0.01, %v493_v62  ;;  %v485_v13 = vadd.f32 %v3885_v50, %v3853_v52  ;;  %v484_v22 = vadd.f32 %v3885_v50, %v3838_v59  ;;  %v587_v49 = vld [vmem:[%s5070_s2 + $0x48] sm:$0xff] }
  0xe5   :  { %768 = vmatpush1.msra.mxu0 %v550_v9  ;;  %3219 = vmatpush1.msra.mxu1 %v550_v9  ;;  %v564_v41 = vmax.f32 %v500_v2, %v532_v7  ;;  %v524_v3 = vmul.f32 0.01, %v492_v16  ;;  %v561_v45 = vmax.f32 %v497_v56, %v529_v10  ;;  %v521_v34 = vmul.f32 0.01, %v489_v8  ;;  %v588_v9 = vld [vmem:[%s5070_s2 + $0x50] sm:$0xff] }
  0xe6   :  { %769 = vmatprep.subr.mxu0 %v547_v4  ;;  %3212 = vmatprep.subr.mxu1 %v547_v4  ;;  %v560_v52 = vmax.f32 %v496_v36, %v528_v31  ;;  %v520_v59 = vmul.f32 0.01, %v488_v39  ;;  %v557_v50 = vmax.f32 %v493_v62, %v525_v37  ;;  %v517_v53 = vmul.f32 0.01, %v485_v13 }
  0xe7   :  { %770 = vmatpush1.msra.mxu0 %v546_v17  ;;  %3220 = vmatpush1.msra.mxu1 %v546_v17  ;;  %v556_v29 = vmax.f32 %v492_v16, %v524_v3  ;;  %v516_v21 = vmul.f32 0.01, %v484_v22  ;;  %v553_v0 = vmax.f32 %v489_v8, %v521_v34  ;;  %v4071_v17 = vpop.permute.xlu1 %687 }
  0xe8   :  { %2996 = vmatmul.mubr.msk.f32.vlgmr.msra.gmra.mxu0 %vm690_vm0, %v3912_v42  ;;  %3007 = vmatmul.mubr.msk.f32.vlgmr.msra.gmra.mxu1 %vm690_vm0, %v3917_v35  ;;  %v552_v23 = vmax.f32 %v488_v39, %v520_v59  ;;  %v549_v19 = vmax.f32 %v485_v13, %v517_v53 }
  0xe9   :  { %916 = vmatprep.subr.mxu1 %v577_v6  ;;  %809 = vmatprep.mubr.f32.mxu0 %v5081_v24  ;;  %v548_v38 = vmax.f32 %v484_v22, %v516_v21 }
  0xea   :  { %917 = vmatpush1.msra.mxu1 %v576_v12  ;;  %875 = vmatprep.mubr.f32.mxu1 %v5081_v24 }
  0xeb   :  { %918 = vmatprep.subr.mxu1 %v573_v5  ;;  %v4079_v6 = vpop.permute.xlu1 %682 }
  0xec   :  { %919 = vmatpush1.msra.mxu1 %v572_v30  ;;  %2997 = vmatmul.mubr.msk.f32.gmra.mxu0 %vm690_vm0, %v3935_v40 }
  0xed   :  { %3008 = vmatmul.mubr.msk.f32.gmra.mxu1 %vm690_vm0, %v3945_v11  ;;  %920 = vmatprep.subr.mxu1 %v569_v48 }
  0xee   :  { %921 = vmatpush1.msra.mxu1 %v568_v28  ;;  %815 = vmatprep.mubr.f32.mxu0 %v5081_v24 }
  0xef   :  { %922 = vmatprep.subr.mxu1 %v565_v46  ;;  %881 = vmatprep.mubr.f32.mxu1 %v5081_v24 }
  0xf0   :  { %923 = vmatpush1.msra.mxu1 %v564_v41  ;;  %2998 = vmatmul.mubr.msk.f32.gmra.mxu0 %vm690_vm0, %v580_v63 }
  0xf1   :  { %3009 = vmatmul.mubr.msk.f32.gmra.mxu1 %vm690_vm0, %v3966_v54  ;;  %924 = vmatprep.subr.mxu1 %v561_v45 }
  0xf2   :  { %925 = vmatpush1.msra.mxu1 %v560_v52  ;;  %821 = vmatprep.mubr.f32.mxu0 %v5081_v24 }
  0xf3   :  { %926 = vmatprep.subr.mxu1 %v557_v50  ;;  %887 = vmatprep.mubr.f32.mxu1 %v5081_v24 }
  0xf4   :  { %927 = vmatpush1.msra.mxu1 %v556_v29  ;;  %2999 = vmatmul.mubr.msk.f32.gmra.mxu0 %vm690_vm0, %v581_v1 }
  0xf5   :  { %3010 = vmatmul.mubr.msk.f32.gmra.mxu1 %vm690_vm0, %v3979_v47  ;;  %928 = vmatprep.subr.mxu1 %v553_v0 }
  0xf6   :  { %929 = vmatpush1.msra.mxu1 %v552_v23  ;;  %827 = vmatprep.mubr.f32.mxu0 %v5081_v24 }
  0xf7   :  { %930 = vmatprep.subr.mxu1 %v549_v19  ;;  %893 = vmatprep.mubr.f32.mxu1 %v5081_v24 }
  0xf8   :  { %931 = vmatpush1.msra.mxu1 %v548_v38  ;;  %3000 = vmatmul.mubr.msk.f32.gmra.mxu0 %vm690_vm0, %v582_v18 }
  0xf9   :  { %3011 = vmatmul.mubr.msk.f32.gmra.mxu1 %vm690_vm0, %v593_v55  ;;  %833 = vmatprep.mubr.f32.mxu0 %v5081_v24 }
  0xfa   :  { %964 = vmatprep.mubr.f32.mxu1 %v5081_v24 }
  0xfc   :  { %3001 = vmatmul.mubr.msk.f32.gmra.mxu0 %vm690_vm0, %v583_v25 }
  0xfd   :  { %3012 = vmatmul.mubr.msk.f32.vlgmr.msra.gmra.mxu1 %vm690_vm0, %v3912_v42  ;;  %839 = vmatprep.mubr.f32.mxu0 %v5081_v24 }
  0xfe   :  { %970 = vmatprep.mubr.f32.mxu1 %v5081_v24 }
 0x100   :  { %3002 = vmatmul.mubr.msk.f32.gmra.mxu0 %vm690_vm0, %v584_v57 }
 0x101   :  { %3013 = vmatmul.mubr.msk.f32.gmra.mxu1 %vm690_vm0, %v3935_v40  ;;  %845 = vmatprep.mubr.f32.mxu0 %v5081_v24  ;;  %v4087_v40 = vpop.permute.xlu1 %672 }
 0x102   :  { %976 = vmatprep.mubr.f32.mxu1 %v5081_v24 }
 0x104   :  { %3003 = vmatmul.mubr.msk.f32.gmra.mxu0 %vm690_vm0, %v585_v20 }
 0x105   :  { %3014 = vmatmul.mubr.msk.f32.gmra.mxu1 %vm690_vm0, %v580_v63  ;;  %851 = vmatprep.mubr.f32.mxu0 %v5081_v24  ;;  %v4106_v41 = vpop.permute.xlu1 %667 }
 0x106   :  { %982 = vmatprep.mubr.f32.mxu1 %v5081_v24 }
 0x108   :  { %3004 = vmatmul.mubr.msk.f32.gmra.mxu0 %vm690_vm0, %v586_v26 }
 0x109   :  { %3015 = vmatmul.mubr.msk.f32.gmra.mxu1 %vm690_vm0, %v581_v1  ;;  %857 = vmatprep.mubr.f32.mxu0 %v5081_v24 }
 0x10a   :  { %988 = vmatprep.mubr.f32.mxu1 %v5081_v24 }
 0x10c   :  { %3005 = vmatmul.mubr.msk.f32.gmra.mxu0 %vm690_vm0, %v587_v49 }
 0x10d   :  { %3016 = vmatmul.mubr.msk.f32.gmra.mxu1 %vm690_vm0, %v582_v18  ;;  %863 = vmatprep.mubr.f32.mxu0 %v5081_v24 }
 0x10e   :  { %994 = vmatprep.mubr.f32.mxu1 %v5081_v24 }
 0x110   :  { %3006 = vmatmul.mubr.msk.f32.gmra.mxu0 %vm690_vm0, %v588_v9 }
 0x111   :  { %3017 = vmatmul.mubr.msk.f32.gmra.mxu1 %vm690_vm0, %v583_v25  ;;  %1477 = vmatprep.mubr.f32.mxu0 %v5081_v24 }
 0x112   :  { %1000 = vmatprep.mubr.f32.mxu1 %v5081_v24 }
 0x115   :  { %3018 = vmatmul.mubr.msk.f32.gmra.mxu1 %vm690_vm0, %v584_v57 }
 0x116   :  { %1006 = vmatprep.mubr.f32.mxu1 %v5081_v24 }
 0x119   :  { %3019 = vmatmul.mubr.msk.f32.gmra.mxu1 %vm690_vm0, %v585_v20 }
 0x11a   :  { %1012 = vmatprep.mubr.f32.mxu1 %v5081_v24 }
 0x11d   :  { %3020 = vmatmul.mubr.msk.f32.gmra.mxu1 %vm690_vm0, %v586_v26 }
 0x11e   :  { %1018 = vmatprep.mubr.f32.mxu1 %v5081_v24 }
 0x121   :  { %3021 = vmatmul.mubr.msk.f32.gmra.mxu1 %vm690_vm0, %v587_v49 }
 0x122   :  { %1024 = vmatprep.mubr.f32.mxu1 %v5081_v24 }
 0x125   :  { %3022 = vmatmul.mubr.msk.f32.gmra.mxu1 %vm690_vm0, %v588_v9 }
 0x126   :  { %1030 = vmatprep.mubr.f32.mxu1 %v5081_v24 }
 0x129   :  { %3023 = vmatmul.mubr.msk.f32.gmra.mxu1 %vm690_vm0, %v3917_v35 }
 0x12a   :  { %1036 = vmatprep.mubr.f32.mxu1 %v5081_v24 }
 0x12d   :  { %3024 = vmatmul.mubr.msk.f32.gmra.mxu1 %vm690_vm0, %v3945_v11  ;;  %v4093_v11 = vpop.permute.xlu0 %677 }
 0x12e   :  { %1042 = vmatprep.mubr.f32.mxu1 %v5081_v24 }
 0x131   :  { %3025 = vmatmul.mubr.msk.f32.gmra.mxu1 %vm690_vm0, %v3966_v54 }
 0x132   :  { %1048 = vmatprep.mubr.f32.mxu1 %v5081_v24 }
 0x135   :  { %3026 = vmatmul.mubr.msk.f32.gmra.mxu1 %vm690_vm0, %v3979_v47 }
 0x136   :  { %1054 = vmatprep.mubr.f32.mxu1 %v5081_v24 }
 0x139   :  { %3027 = vmatmul.mubr.msk.f32.gmra.mxu1 %vm690_vm0, %v593_v55  ;;  %v4119_v55 = vpop.permute.xlu0 %662 }
 0x13a   :  { %1734 = vmatprep.mubr.f32.mxu1 %v5081_v24 }
 0x1a8   :  { %v4065_v61 = vpop.f32.mrf.mxu0  ;;  %v871_v58 = vpop.f32.mrf.mxu1 }
 0x1a9   :  { %v872_v1 = vadd.f32 %v871_v58, %v4106_v41 }
 0x1aa   :  { %v4067_v4 = vpop.f32.mrf.mxu0  ;;  %v873_v27 = vpop.f32.mrf.mxu1 }
 0x1ab   :  { %v874_v34 = vadd.f32 %v873_v27, %v4106_v41  ;;  %v1105_v26 = vmul.f32 0.01, %v872_v1 }
 0x1ac   :  { %v4069_v14 = vpop.f32.mrf.mxu0 }
 0x1ad   :  { %v877_v42 = vpop.f32.mrf.mxu1  ;;  %v1106_v25 = vmul.f32 0.01, %v874_v34 }
 0x1ae   :  { %v4073_v35 = vpop.f32.mrf.mxu0  ;;  %v878_v54 = vadd.f32 %v877_v42, %v4087_v40 }
 0x1af   :  { %v879_v32 = vpop.f32.mrf.mxu1 }
 0x1b0   :  { %v4075_v43 = vpop.f32.mrf.mxu0  ;;  %v880_v63 = vadd.f32 %v879_v32, %v4087_v40  ;;  %v1109_v19 = vmul.f32 0.01, %v878_v54 }
 0x1b1   :  { %v883_v2 = vpop.f32.mrf.mxu1 }
 0x1b2   :  { %v4077_v60 = vpop.f32.mrf.mxu0  ;;  %v884_v28 = vadd.f32 %v883_v2, %v4093_v11  ;;  %v1110_v21 = vmul.f32 0.01, %v880_v63  ;;  %v1173_v42 = vmax.f32 %v878_v54, %v1109_v19  ;;  %v4125_v2 = vpop.permute.xlu1 %657 }
 0x1b3   :  { %v885_v44 = vpop.f32.mrf.mxu1 }
 0x1b4   :  { %v4081_v56 = vpop.f32.mrf.mxu0  ;;  %v886_v10 = vadd.f32 %v885_v44, %v4093_v11  ;;  %v1113_v53 = vmul.f32 0.01, %v884_v28  ;;  %v1174_v58 = vmax.f32 %v880_v63, %v1110_v21  ;;  %v1170_v44 = vmax.f32 %v874_v34, %v1106_v25 }
 0x1b5   :  { %v889_v36 = vpop.f32.mrf.mxu1 }
 0x1b6   :  { %v4083_v12 = vpop.f32.mrf.mxu0  ;;  %v890_v7 = vadd.f32 %v889_v36, %v4079_v6  ;;  %v1114_v52 = vmul.f32 0.01, %v886_v10  ;;  %v1177_v49 = vmax.f32 %v884_v28, %v1113_v53 }
 0x1b7   :  { %v891_v51 = vpop.f32.mrf.mxu1 }
 0x1b8   :  { %v4085_v5 = vpop.f32.mrf.mxu0  ;;  %v892_v62 = vadd.f32 %v891_v51, %v4079_v6  ;;  %v1117_v3 = vmul.f32 0.01, %v890_v7  ;;  %v1178_v57 = vmax.f32 %v886_v10, %v1114_v52  ;;  %v1169_v51 = vmax.f32 %v872_v1, %v1105_v26 }
 0x1b9   :  { %v895_v15 = vpop.f32.mrf.mxu1 }
 0x1ba   :  { %v896_v16 = vadd.f32 %v895_v15, %v4071_v17  ;;  %v4091_v30 = vpop.f32.mrf.mxu0  ;;  %v1118_v37 = vmul.f32 0.01, %v892_v62  ;;  %v1181_v18 = vmax.f32 %v890_v7, %v1117_v3 }
 0x1bb   :  { %v897_v48 = vpop.f32.mrf.mxu1 }
 0x1bc   :  { %v898_v8 = vadd.f32 %v897_v48, %v4071_v17  ;;  %v4098_v39 = vpop.f32.mrf.mxu0  ;;  %v1121_v31 = vmul.f32 0.01, %v896_v16  ;;  %v1182_v0 = vmax.f32 %v892_v62, %v1118_v37  ;;  %v4129_v62 = vpop.permute.xlu0 %652 }
 0x1bd   :  { %v4101_v46 = vpop.f32.mrf.mxu1 }
 0x1be   :  { %5087 = vst [vmem:[#allocation8_spill] sm:$0xff] %v4101_v46  ;;  %v1122_v13 = vmul.f32 0.01, %v898_v8  ;;  %v4104_v22 = vpop.f32.mrf.mxu0  ;;  %v1185_v29 = vmax.f32 %v896_v16, %v1121_v31 }
 0x1bf   :  { %v4109_v45 = vpop.f32.mrf.mxu1 }
 0x1c0   :  { %v1186_v59 = vmax.f32 %v898_v8, %v1122_v13  ;;  %v4112_v50 = vpop.f32.mrf.mxu0  ;;  %v4135_v8 = vpop.permute.xlu1 %647 }
 0x1c1   :  { %v4115_v47 = vpop.f32.mrf.mxu1  ;;  %v4139_v63 = vpop.permute.xlu0 %642 }
 0x1c2   :  { %1413 = vmatprep.subr.mxu0 %v1186_v59  ;;  %v843_v23 = vpop.f32.mrf.mxu0 }
 0x1c3   :  { %v4117_v38 = vpop.f32.mrf.mxu1  ;;  %1414 = vmatpush1.msra.mxu0 %v1185_v29 }
 0x1c4   :  { %1415 = vmatprep.subr.mxu0 %v1182_v0  ;;  %v847_v20 = vpop.f32.mrf.mxu0  ;;  %v4150_v29 = vpop.permute.xlu1 %637 }
 0x1c5   :  { %v4121_v9 = vpop.f32.mrf.mxu1  ;;  %1416 = vmatpush1.msra.mxu0 %v1181_v18  ;;  %v4156_v26 = vpop.permute.xlu0 %632 }
 0x1c6   :  { %1417 = vmatprep.subr.mxu0 %v1178_v57  ;;  %v849_v27 = vpop.f32.mrf.mxu0 }
 0x1c7   :  { %v4123_v32 = vpop.f32.mrf.mxu1  ;;  %1418 = vmatpush1.msra.mxu0 %v1177_v49  ;;  %v850_v19 = vadd.f32 %v849_v27, %v4135_v8  ;;  %v848_v49 = vadd.f32 %v847_v20, %v4135_v8 }
 0x1c8   :  { %1419 = vmatprep.subr.mxu0 %v1174_v58  ;;  %v853_v36 = vpop.f32.mrf.mxu0  ;;  %v4168_v20 = vpop.permute.xlu1 %627 }
 0x1c9   :  { %v4127_v15 = vpop.f32.mrf.mxu1  ;;  %1420 = vmatpush1.msra.mxu0 %v1173_v42  ;;  %v854_v21 = vadd.f32 %v853_v36, %v4129_v62  ;;  %v844_v42 = vadd.f32 %v843_v23, %v4139_v63  ;;  %v842_v36 = vadd.f32 %v4112_v50, %v4139_v63  ;;  %v836_v23 = vadd.f32 %v4098_v39, %v4150_v29 }
 0x1ca   :  { %1421 = vmatprep.subr.mxu0 %v1170_v44  ;;  %v855_v16 = vpop.f32.mrf.mxu0  ;;  %v832_v50 = vadd.f32 %v4091_v30, %v4156_v26  ;;  %v826_v39 = vadd.f32 %v4083_v12, %v4168_v20  ;;  %v824_v30 = vadd.f32 %v4081_v56, %v4168_v20 }
 0x1cb   :  { %v4131_v7 = vpop.f32.mrf.mxu1  ;;  %1422 = vmatpush1.msra.mxu0 %v1169_v51  ;;  %v856_v59 = vadd.f32 %v855_v16, %v4129_v62 }
 0x1cc   :  { %v859_v48 = vpop.f32.mrf.mxu0  ;;  %v4190_v12 = vpop.permute.xlu1 %617 }
 0x1cd   :  { %v4133_v10 = vpop.f32.mrf.mxu1  ;;  %v860_v34 = vadd.f32 %v859_v48, %v4125_v2  ;;  %v1094_v44 = vmul.f32 0.01, %v856_v59  ;;  %v1093_v48 = vmul.f32 0.01, %v854_v21  ;;  %v814_v56 = vadd.f32 %v4073_v35, %v4190_v12 }
 0x1ce   :  { %v861_v28 = vpop.f32.mrf.mxu0 }
 0x1cf   :  { %v4137_v31 = vpop.f32.mrf.mxu1  ;;  %v862_v13 = vadd.f32 %v861_v28, %v4125_v2  ;;  %v1097_v58 = vmul.f32 0.01, %v860_v34  ;;  %v838_v28 = vadd.f32 %v4104_v22, %v4150_v29  ;;  %v4176_v22 = vpop.permute.xlu0 %622 }
 0x1d0   :  { %v865_v37 = vpop.f32.mrf.mxu0 }
 0x1d1   :  { %v866_v54 = vadd.f32 %v865_v37, %v4119_v55  ;;  %v4143_v3 = vpop.f32.mrf.mxu1  ;;  %v1098_v18 = vmul.f32 0.01, %v862_v13  ;;  %v1090_v37 = vmul.f32 0.01, %v850_v19 }
 0x1d2   :  { %v867_v52 = vpop.f32.mrf.mxu0 }
 0x1d3   :  { %v868_v1 = vadd.f32 %v867_v52, %v4119_v55  ;;  %v4148_v53 = vpop.f32.mrf.mxu1  ;;  %v1101_v0 = vmul.f32 0.01, %v866_v54  ;;  %v1162_v52 = vmax.f32 %v862_v13, %v1098_v18  ;;  %v830_v13 = vadd.f32 %v4085_v5, %v4156_v26 }
 0x1d4   :  { %v1085_v18 = vmul.f32 0.01, %v842_v36  ;;  %v820_v5 = vadd.f32 %v4077_v60, %v4176_v22  ;;  %v4198_v60 = vpop.permute.xlu0 %612 }
 0x1d5   :  { %v1102_v25 = vmul.f32 0.01, %v868_v1  ;;  %v4154_v57 = vpop.f32.mrf.mxu1  ;;  %v1165_v27 = vmax.f32 %v866_v54, %v1101_v0  ;;  %v1086_v54 = vmul.f32 0.01, %v844_v42  ;;  %v1158_v0 = vmax.f32 %v856_v59, %v1094_v44 }
 0x1d6   :  { %v1081_v59 = vmul.f32 0.01, %v836_v23  ;;  %v806_v35 = vadd.f32 %v4065_v61, %v4198_v60 }
 0x1d7   :  { %v1166_v51 = vmax.f32 %v868_v1, %v1102_v25  ;;  %v4160_v16 = vpop.f32.mrf.mxu1  ;;  %v1089_v1 = vmul.f32 0.01, %v848_v49  ;;  %v1161_v25 = vmax.f32 %v860_v34, %v1097_v58  ;;  %v1082_v34 = vmul.f32 0.01, %v838_v28 }
 0x1d8   :  { %v1154_v58 = vmax.f32 %v850_v19, %v1090_v37  ;;  %v818_v19 = vadd.f32 %v4075_v43, %v4176_v22  ;;  %v1077_v37 = vmul.f32 0.01, %v830_v13  ;;  %v808_v43 = vadd.f32 %v4067_v4, %v4198_v60 }
 0x1d9   :  { %v4166_v24 = vpop.f32.mrf.mxu1  ;;  %1423 = vmatprep.subr.mxu0 %v1166_v51  ;;  %v1157_v51 = vmax.f32 %v854_v21, %v1093_v48  ;;  %v1153_v44 = vmax.f32 %v848_v49, %v1089_v1  ;;  %v1150_v21 = vmax.f32 %v844_v42, %v1086_v54  ;;  %v1074_v49 = vmul.f32 0.01, %v826_v39 }
 0x1da   :  { %1424 = vmatpush1.msra.mxu0 %v1165_v27  ;;  %v1146_v1 = vmax.f32 %v838_v28, %v1082_v34  ;;  %v812_v42 = vadd.f32 %v4069_v14, %v4190_v12  ;;  %v1073_v54 = vmul.f32 0.01, %v824_v30  ;;  %v1069_v28 = vmul.f32 0.01, %v818_v19 }
 0x1db   :  { %v4174_v33 = vpop.f32.mrf.mxu1  ;;  %1425 = vmatprep.subr.mxu0 %v1162_v52  ;;  %v1078_v52 = vmul.f32 0.01, %v832_v50  ;;  %v1141_v34 = vmax.f32 %v830_v13, %v1077_v37  ;;  %v1062_v4 = vmul.f32 0.01, %v808_v43 }
 0x1dc   :  { %1426 = vmatpush1.msra.mxu0 %v1161_v25  ;;  %v1149_v25 = vmax.f32 %v842_v36, %v1085_v18  ;;  %v1070_v36 = vmul.f32 0.01, %v820_v5 }
 0x1dd   :  { %v4182_v27 = vpop.f32.mrf.mxu1  ;;  %1427 = vmatprep.subr.mxu0 %v1158_v0  ;;  %v1142_v18 = vmax.f32 %v832_v50, %v1078_v52  ;;  %v1061_v52 = vmul.f32 0.01, %v806_v35  ;;  %v1126_v37 = vmax.f32 %v808_v43, %v1062_v4  ;;  %v4246_v4 = vld [vmem:[%s5072_s4 + $0x20] sm:$0xff] }
 0x1de   :  { %1428 = vmatpush1.msra.mxu0 %v1157_v51  ;;  %v1145_v51 = vmax.f32 %v836_v23, %v1081_v59  ;;  %v1065_v23 = vmul.f32 0.01, %v812_v42  ;;  %v1137_v59 = vmax.f32 %v824_v30, %v1073_v54  ;;  %v4213_v30 = vld [vmem:[%s5072_s4] sm:$0xff]  ;;  %5089 = vst [vmem:[#allocation9_spill] sm:$0xff] %v4246_v4 }
 0x1df   :  { %v4188_v48 = vpop.f32.mrf.mxu1  ;;  %1429 = vmatprep.subr.mxu0 %v1154_v58 }
 0x1e0   :  { %1430 = vmatpush1.msra.mxu0 %v1153_v44  ;;  %v1066_v44 = vmul.f32 0.01, %v814_v56  ;;  %v1129_v13 = vmax.f32 %v812_v42, %v1065_v23  ;;  %v4220_v42 = vld [vmem:[%s5072_s4 + $0x8] sm:$0xff] }
 0x1e1   :  { %v4196_v0 = vpop.f32.mrf.mxu1  ;;  %1431 = vmatprep.subr.mxu0 %v1150_v21  ;;  %v1138_v21 = vmax.f32 %v826_v39, %v1074_v49  ;;  %v1125_v49 = vmax.f32 %v806_v35, %v1061_v52 }
 0x1e2   :  { %1432 = vmatpush1.msra.mxu0 %v1149_v25  ;;  %v1134_v25 = vmax.f32 %v820_v5, %v1070_v36  ;;  %v1130_v46 = vmax.f32 %v814_v56, %v1066_v44  ;;  %v5088_v56 = vmov 0.0  }
 0x1e3   :  { %v4204_v58 = vpop.f32.mrf.mxu1  ;;  %1433 = vmatprep.subr.mxu0 %v1146_v1  ;;  %v1133_v1 = vmax.f32 %v818_v19, %v1069_v28 }
 0x1e4   :  { %1434 = vmatpush1.msra.mxu0 %v1145_v51  ;;  %v4227_v51 = vld [vmem:[%s5072_s4 + $0x10] sm:$0xff] }
 0x1e5   :  { %v4208_v14 = vpop.f32.mrf.mxu1  ;;  %1435 = vmatprep.subr.mxu0 %v1142_v18  ;;  %v4234_v18 = vld [vmem:[%s5072_s4 + $0x18] sm:$0xff] }
 0x1e6   :  { %1436 = vmatpush1.msra.mxu0 %v1141_v34 }
 0x1e7   :  { %v1028_v50 = vpop.f32.mrf.mxu1  ;;  %1437 = vmatprep.subr.mxu0 %v1138_v21 }
 0x1e8   :  { %1438 = vmatpush1.msra.mxu0 %v1137_v59 }
 0x1e9   :  { %v1032_v61 = vpop.f32.mrf.mxu1  ;;  %1439 = vmatprep.subr.mxu0 %v1134_v25 }
 0x1ea   :  { %1440 = vmatpush1.msra.mxu0 %v1133_v1 }
 0x1eb   :  { %v1034_v39 = vpop.f32.mrf.mxu1  ;;  %1441 = vmatprep.subr.mxu0 %v1130_v46 }
 0x1ec   :  { %1442 = vmatpush1.msra.mxu0 %v1129_v13 }
 0x1ed   :  { %v1038_v5 = vpop.f32.mrf.mxu1  ;;  %1443 = vmatprep.subr.mxu0 %v1126_v37 }
 0x1ee   :  { %1444 = vmatpush1.msra.mxu0 %v1125_v49  ;;  %v1039_v37 = vadd.f32 %v1038_v5, %v4087_v40 }
 0x1ef   :  { %v1040_v19 = vpop.f32.mrf.mxu1  ;;  %1478 = vmatmul.mubr.f32.vlgmr.msra.gmra.mxu0 %v4213_v30 }
 0x1f0   :  { %1483 = vmatprep.mubr.f32.mxu0 %v5088_v56  ;;  %v1041_v1 = vadd.f32 %v1040_v19, %v4087_v40  ;;  %v1033_v19 = vadd.f32 %v1032_v61, %v4106_v41  ;;  %v1029_v40 = vadd.f32 %v1028_v50, %v4119_v55  ;;  %v4270_v50 = vld [vmem:[%s5072_s4 + $0x30] sm:$0xff] }
 0x1f1   :  { %v1044_v46 = vpop.f32.mrf.mxu1 }
 0x1f2   :  { %v1045_v25 = vadd.f32 %v1044_v46, %v4093_v11  ;;  %v1112_v5 = vmul.f32 0.01, %v1041_v1 }
 0x1f3   :  { %v1046_v54 = vpop.f32.mrf.mxu1  ;;  %1484 = vmatmul.mubr.f32.gmra.mxu0 %v4220_v42 }
 0x1f4   :  { %1489 = vmatprep.mubr.f32.mxu0 %v5088_v56  ;;  %v1047_v23 = vadd.f32 %v1046_v54, %v4093_v11  ;;  %v4257_v11 = vld [vmem:[%s5072_s4 + $0x28] sm:$0xff]  ;;  %v1115_v46 = vmul.f32 0.01, %v1045_v25 }
 0x1f5   :  { %v1050_v43 = vpop.f32.mrf.mxu1 }
 0x1f6   :  { %v1051_v44 = vadd.f32 %v1050_v43, %v4079_v6  ;;  %v1116_v54 = vmul.f32 0.01, %v1047_v23  ;;  %v1179_v61 = vmax.f32 %v1045_v25, %v1115_v46 }
 0x1f7   :  { %v1052_v36 = vpop.f32.mrf.mxu1  ;;  %1490 = vmatmul.mubr.f32.gmra.mxu0 %v4227_v51 }
 0x1f8   :  { %1495 = vmatprep.mubr.f32.mxu0 %v5088_v56  ;;  %v1053_v28 = vadd.f32 %v1052_v36, %v4079_v6  ;;  %v1119_v49 = vmul.f32 0.01, %v1051_v44 }
 0x1f9   :  { %v1056_v35 = vpop.f32.mrf.mxu1 }
 0x1fa   :  { %v1057_v34 = vadd.f32 %v1056_v35, %v4071_v17  ;;  %v1120_v6 = vmul.f32 0.01, %v1053_v28 }
 0x1fb   :  { %v1058_v21 = vpop.f32.mrf.mxu1  ;;  %1496 = vmatmul.mubr.f32.gmra.mxu0 %v4234_v18 }
 0x1fc   :  { %v1059_v59 = vadd.f32 %v1058_v21, %v4071_v17  ;;  %1501 = vmatprep.mubr.f32.mxu0 %v5088_v56  ;;  %v1123_v52 = vmul.f32 0.01, %v1057_v34  ;;  %v1035_v17 = vadd.f32 %v1034_v39, %v4106_v41  ;;  %v1184_v35 = vmax.f32 %v1053_v28, %v1120_v6 }
 0x1fd   :  { %v1027_v39 = vadd.f32 %v4208_v14, %v4119_v55  ;;  %v1111_v21 = vmul.f32 0.01, %v1039_v37  ;;  %v1180_v41 = vmax.f32 %v1047_v23, %v1116_v54  ;;  %v1021_v55 = vadd.f32 %v4196_v0, %v4125_v2 }
 0x1fe   :  { %v1124_v13 = vmul.f32 0.01, %v1059_v59  ;;  %v1187_v36 = vmax.f32 %v1057_v34, %v1123_v52  ;;  %v1107_v14 = vmul.f32 0.01, %v1033_v19  ;;  %v1017_v28 = vadd.f32 %v4188_v48, %v4129_v62  ;;  %v4285_v48 = vld [vmem:[%s5072_s4 + $0x38] sm:$0xff] }
 0x1ff   :  { %1502 = vmatmul.mubr.f32.gmra.mxu0 %v4246_v4  ;;  %v1108_v4 = vmul.f32 0.01, %v1035_v17  ;;  %v1176_v34 = vmax.f32 %v1041_v1, %v1112_v5  ;;  %v1103_v23 = vmul.f32 0.01, %v1027_v39  ;;  %v1175_v52 = vmax.f32 %v1039_v37, %v1111_v21 }
 0x200   :  { %v1188_v43 = vmax.f32 %v1059_v59, %v1124_v13  ;;  %1507 = vmatprep.mubr.f32.mxu0 %v5088_v56  ;;  %v1183_v59 = vmax.f32 %v1051_v44, %v1119_v49  ;;  %v1023_v13 = vadd.f32 %v4204_v58, %v4125_v2  ;;  %v1104_v58 = vmul.f32 0.01, %v1029_v40 }
 0x201   :  { %v1015_v44 = vadd.f32 %v4182_v27, %v4129_v62  ;;  %v1011_v2 = vadd.f32 %v4174_v33, %v4135_v8  ;;  %v1172_v25 = vmax.f32 %v1035_v17, %v1108_v4  ;;  %v1009_v62 = vadd.f32 %v4166_v24, %v4135_v8 }
 0x202   :  { %1670 = vmatprep.subr.mxu1 %v1188_v43  ;;  %v1100_v0 = vmul.f32 0.01, %v1023_v13  ;;  %v1099_v27 = vmul.f32 0.01, %v1021_v55  ;;  %v1171_v1 = vmax.f32 %v1033_v19, %v1107_v14  ;;  %v1005_v6 = vadd.f32 %v4160_v16, %v4139_v63  ;;  %v4300_v16 = vld [vmem:[%s5072_s4 + $0x40] sm:$0xff] }
 0x203   :  { %1671 = vmatpush1.msra.mxu1 %v1187_v36  ;;  %1508 = vmatmul.mubr.f32.gmra.mxu0 %v4257_v11  ;;  %v1096_v33 = vmul.f32 0.01, %v1017_v28  ;;  %v1168_v37 = vmax.f32 %v1029_v40, %v1104_v58  ;;  %v1003_v4 = vadd.f32 %v4154_v57, %v4139_v63  ;;  %v1095_v49 = vmul.f32 0.01, %v1015_v44 }
 0x204   :  { %1672 = vmatprep.subr.mxu1 %v1184_v35  ;;  %1513 = vmatprep.mubr.f32.mxu0 %v5088_v56  ;;  %v1167_v17 = vmax.f32 %v1027_v39, %v1103_v23  ;;  %v999_v24 = vadd.f32 %v4148_v53, %v4150_v29  ;;  %v1092_v8 = vmul.f32 0.01, %v1011_v2  ;;  %v1164_v54 = vmax.f32 %v1023_v13, %v1100_v0 }
 0x205   :  { %1673 = vmatpush1.msra.mxu1 %v1183_v59  ;;  %v997_v63 = vadd.f32 %v4143_v3, %v4150_v29  ;;  %v1091_v57 = vmul.f32 0.01, %v1009_v62  ;;  %v1163_v43 = vmax.f32 %v1021_v55, %v1099_v27  ;;  %v993_v19 = vadd.f32 %v4137_v31, %v4156_v26  ;;  %v4315_v31 = vld [vmem:[%s5072_s4 + $0x48] sm:$0xff] }
 0x206   :  { %1674 = vmatprep.subr.mxu1 %v1180_v41  ;;  %v1088_v53 = vmul.f32 0.01, %v1005_v6  ;;  %v1160_v46 = vmax.f32 %v1017_v28, %v1096_v33  ;;  %v991_v36 = vadd.f32 %v4133_v10, %v4156_v26  ;;  %v1087_v40 = vmul.f32 0.01, %v1003_v4 }
 0x207   :  { %1675 = vmatpush1.msra.mxu1 %v1179_v61  ;;  %1514 = vmatmul.mubr.f32.gmra.mxu0 %v4270_v50  ;;  %v1159_v5 = vmax.f32 %v1015_v44, %v1095_v49  ;;  %v987_v3 = vadd.f32 %v4131_v7, %v4168_v20  ;;  %v1084_v29 = vmul.f32 0.01, %v999_v24  ;;  %v1156_v35 = vmax.f32 %v1011_v2, %v1092_v8  ;;  %v4357_v49 = vld [vmem:[%s5072_s4 + $0x68] sm:$0xff]  ;;  %v4411_v8 = vld [vmem:[%s5072_s4 + $0x98] sm:$0xff] }
 0x208   :  { %1676 = vmatprep.subr.mxu1 %v1176_v34  ;;  %1519 = vmatprep.mubr.f32.mxu0 %v5088_v56  ;;  %v985_v10 = vadd.f32 %v4127_v15, %v4168_v20  ;;  %v1083_v26 = vmul.f32 0.01, %v997_v63  ;;  %v1155_v39 = vmax.f32 %v1009_v62, %v1091_v57  ;;  %v981_v21 = vadd.f32 %v4123_v32, %v4176_v22  ;;  %v4330_v32 = vld [vmem:[%s5072_s4 + $0x50] sm:$0xff] }
 0x209   :  { %1677 = vmatpush1.msra.mxu1 %v1175_v52  ;;  %v1080_v7 = vmul.f32 0.01, %v993_v19  ;;  %v1152_v59 = vmax.f32 %v1005_v6, %v1088_v53  ;;  %v979_v13 = vadd.f32 %v4121_v9, %v4176_v22  ;;  %v1079_v41 = vmul.f32 0.01, %v991_v36  ;;  %v5090_v34 = vld [vmem:[#allocation8_spill] sm:$0xff]  ;;  %v4350_v6 = vld [vmem:[%s5072_s4 + $0x60] sm:$0xff] }
 0x20a   :  { %1678 = vmatprep.subr.mxu1 %v1172_v25  ;;  %v1151_v55 = vmax.f32 %v1003_v4, %v1087_v40  ;;  %v975_v15 = vadd.f32 %v4117_v38, %v4190_v12  ;;  %v1076_v20 = vmul.f32 0.01, %v987_v3  ;;  %v1148_v14 = vmax.f32 %v999_v24, %v1084_v29  ;;  %v5091_v24 = vld [vmem:[#allocation9_spill] sm:$0xff] }
 0x20b   :  { %1679 = vmatpush1.msra.mxu1 %v1171_v1  ;;  %1520 = vmatmul.mubr.f32.gmra.mxu0 %v4285_v48  ;;  %v973_v9 = vadd.f32 %v4115_v47, %v4190_v12  ;;  %v1075_v22 = vmul.f32 0.01, %v985_v10  ;;  %v1147_v61 = vmax.f32 %v997_v63, %v1083_v26  ;;  %v969_v28 = vadd.f32 %v4109_v45, %v4198_v60  ;;  %v4343_v45 = vld [vmem:[%s5072_s4 + $0x58] sm:$0xff]  ;;  %v1214_v63 = vld [vmem:[%s5072_s4 + $0xc8] sm:$0xff]  ;;  %v1215_v57 = vld [vmem:[%s5072_s4 + $0xd0] sm:$0xff] }
 0x20c   :  { %1680 = vmatprep.subr.mxu1 %v1168_v37  ;;  %1525 = vmatprep.mubr.f32.mxu0 %v5088_v56  ;;  %v1072_v38 = vmul.f32 0.01, %v981_v21  ;;  %v1144_v58 = vmax.f32 %v993_v19, %v1080_v7  ;;  %v967_v44 = vadd.f32 %v5090_v34, %v4198_v60  ;;  %v1071_v23 = vmul.f32 0.01, %v979_v13  ;;  %v1216_v19 = vld [vmem:[%s5072_s4 + $0xd8] sm:$0xff] }
 0x20d   :  { %1681 = vmatpush1.msra.mxu1 %v1167_v17  ;;  %v1143_v52 = vmax.f32 %v991_v36, %v1079_v41  ;;  %v1068_v2 = vmul.f32 0.01, %v975_v15  ;;  %v1140_v0 = vmax.f32 %v987_v3, %v1076_v20  ;;  %v1067_v47 = vmul.f32 0.01, %v973_v9  ;;  %v4366_v17 = vld [vmem:[%s5072_s4 + $0x70] sm:$0xff]  ;;  %v1218_v36 = vld [vmem:[%s5072_s4 + $0xe8] sm:$0xff] }
 0x20e   :  { %1682 = vmatprep.subr.mxu1 %v1164_v54  ;;  %v1139_v12 = vmax.f32 %v985_v10, %v1075_v22  ;;  %v1064_v25 = vmul.f32 0.01, %v969_v28  ;;  %v1136_v60 = vmax.f32 %v981_v21, %v1072_v38  ;;  %v1063_v62 = vmul.f32 0.01, %v967_v44  ;;  %v1212_v54 = vld [vmem:[%s5072_s4 + $0xb8] sm:$0xff] }
 0x20f   :  { %1683 = vmatpush1.msra.mxu1 %v1163_v43  ;;  %1526 = vmatmul.mubr.f32.gmra.mxu0 %v4300_v16  ;;  %v1135_v27 = vmax.f32 %v979_v13, %v1071_v23  ;;  %v1132_v1 = vmax.f32 %v975_v15, %v1068_v2  ;;  %v1131_v33 = vmax.f32 %v973_v9, %v1067_v47  ;;  %v4462_v43 = vpop.permute.xlu0 %1330  ;;  %v1220_v29 = vld [vmem:[%s5072_s4 + $0xf8] sm:$0xff] }
 0x210   :  { %1684 = vmatprep.subr.mxu1 %v1160_v46  ;;  %1531 = vmatprep.mubr.f32.mxu0 %v5088_v56  ;;  %v1128_v37 = vmax.f32 %v969_v28, %v1064_v25  ;;  %v1127_v4 = vmax.f32 %v967_v44, %v1063_v62  ;;  %v1217_v46 = vld [vmem:[%s5072_s4 + $0xe0] sm:$0xff] }
 0x211   :  { %1685 = vmatpush1.msra.mxu1 %v1159_v5  ;;  %v1219_v5 = vld [vmem:[%s5072_s4 + $0xf0] sm:$0xff] }
 0x212   :  { %1686 = vmatprep.subr.mxu1 %v1156_v35 }
 0x213   :  { %1687 = vmatpush1.msra.mxu1 %v1155_v39  ;;  %1532 = vmatmul.mubr.f32.gmra.mxu0 %v4315_v31  ;;  %v4471_v53 = vpop.permute.xlu0 %1325 }
 0x214   :  { %1688 = vmatprep.subr.mxu1 %v1152_v59  ;;  %1537 = vmatprep.mubr.f32.mxu0 %v5088_v56  ;;  %v4529_v59 = vpop.permute.xlu1 %1410 }
 0x215   :  { %1689 = vmatpush1.msra.mxu1 %v1151_v55 }
 0x216   :  { %1690 = vmatprep.subr.mxu1 %v1148_v14 }
 0x217   :  { %1691 = vmatpush1.msra.mxu1 %v1147_v61  ;;  %1538 = vmatmul.mubr.f32.gmra.mxu0 %v4330_v32  ;;  %v4484_v40 = vpop.permute.xlu0 %1320 }
 0x218   :  { %1692 = vmatprep.subr.mxu1 %v1144_v58  ;;  %1543 = vmatprep.mubr.f32.mxu0 %v5088_v56  ;;  %v4534_v41 = vpop.permute.xlu1 %1405 }
 0x219   :  { %1693 = vmatpush1.msra.mxu1 %v1143_v52 }
 0x21a   :  { %1694 = vmatprep.subr.mxu1 %v1140_v0 }
 0x21b   :  { %1695 = vmatpush1.msra.mxu1 %v1139_v12  ;;  %1544 = vmatmul.mubr.f32.gmra.mxu0 %v4343_v45  ;;  %v4493_v3 = vpop.permute.xlu0 %1315 }
 0x21c   :  { %1696 = vmatprep.subr.mxu1 %v1136_v60  ;;  %1549 = vmatprep.mubr.f32.mxu0 %v5088_v56  ;;  %v4539_v15 = vpop.permute.xlu1 %1400 }
 0x21d   :  { %1697 = vmatpush1.msra.mxu1 %v1135_v27 }
 0x21e   :  { %1698 = vmatprep.subr.mxu1 %v1132_v1 }
 0x21f   :  { %1699 = vmatpush1.msra.mxu1 %v1131_v33  ;;  %1550 = vmatmul.mubr.f32.gmra.mxu0 %v4350_v6  ;;  %v4502_v35 = vpop.permute.xlu0 %1310 }
 0x220   :  { %1700 = vmatprep.subr.mxu1 %v1128_v37  ;;  %1555 = vmatprep.mubr.f32.mxu0 %v5088_v56  ;;  %v4543_v14 = vpop.permute.xlu1 %1395 }
 0x221   :  { %1701 = vmatpush1.msra.mxu1 %v1127_v4 }
 0x222   :  { %1735 = vmatmul.mubr.f32.vlgmr.msra.gmra.mxu1 %v4213_v30  ;;  %v4375_v30 = vld [vmem:[%s5072_s4 + $0x78] sm:$0xff] }
 0x223   :  { %1556 = vmatmul.mubr.f32.gmra.mxu0 %v4357_v49  ;;  %1740 = vmatprep.mubr.f32.mxu1 %v5088_v56 }
 0x224   :  { %1561 = vmatprep.mubr.f32.mxu0 %v5088_v56  ;;  %v4547_v9 = vpop.permute.xlu1 %1390 }
 0x226   :  { %1741 = vmatmul.mubr.f32.gmra.mxu1 %v4220_v42  ;;  %v4384_v42 = vld [vmem:[%s5072_s4 + $0x80] sm:$0xff] }
 0x227   :  { %1562 = vmatmul.mubr.f32.gmra.mxu0 %v4366_v17  ;;  %1746 = vmatprep.mubr.f32.mxu1 %v5088_v56 }
 0x228   :  { %1567 = vmatprep.mubr.f32.mxu0 %v5088_v56  ;;  %v4553_v44 = vpop.permute.xlu1 %1385 }
 0x22a   :  { %1747 = vmatmul.mubr.f32.gmra.mxu1 %v4227_v51  ;;  %v4393_v51 = vld [vmem:[%s5072_s4 + $0x88] sm:$0xff] }
 0x22b   :  { %1568 = vmatmul.mubr.f32.gmra.mxu0 %v4375_v30  ;;  %1752 = vmatprep.mubr.f32.mxu1 %v5088_v56 }
 0x22c   :  { %1573 = vmatprep.mubr.f32.mxu0 %v5088_v56 }
 0x22e   :  { %1753 = vmatmul.mubr.f32.gmra.mxu1 %v4234_v18  ;;  %v4402_v18 = vld [vmem:[%s5072_s4 + $0x90] sm:$0xff] }
 0x22f   :  { %1574 = vmatmul.mubr.f32.gmra.mxu0 %v4384_v42  ;;  %1758 = vmatprep.mubr.f32.mxu1 %v5088_v56 }
 0x230   :  { %1579 = vmatprep.mubr.f32.mxu0 %v5088_v56 }
 0x232   :  { %1759 = vmatmul.mubr.f32.gmra.mxu1 %v5091_v24 }
 0x233   :  { %1580 = vmatmul.mubr.f32.gmra.mxu0 %v4393_v51  ;;  %1764 = vmatprep.mubr.f32.mxu1 %v5088_v56 }
 0x234   :  { %1585 = vmatprep.mubr.f32.mxu0 %v5088_v56 }
 0x236   :  { %1765 = vmatmul.mubr.f32.gmra.mxu1 %v4257_v11  ;;  %v4420_v11 = vld [vmem:[%s5072_s4 + $0xa0] sm:$0xff] }
 0x237   :  { %1586 = vmatmul.mubr.f32.gmra.mxu0 %v4402_v18  ;;  %1770 = vmatprep.mubr.f32.mxu1 %v5088_v56 }
 0x238   :  { %1591 = vmatprep.mubr.f32.mxu0 %v5088_v56 }
 0x23a   :  { %1771 = vmatmul.mubr.f32.gmra.mxu1 %v4270_v50  ;;  %v4429_v50 = vld [vmem:[%s5072_s4 + $0xa8] sm:$0xff] }
 0x23b   :  { %1592 = vmatmul.mubr.f32.gmra.mxu0 %v4411_v8  ;;  %1776 = vmatprep.mubr.f32.mxu1 %v5088_v56 }
 0x23c   :  { %1597 = vmatprep.mubr.f32.mxu0 %v5088_v56 }
 0x23e   :  { %1777 = vmatmul.mubr.f32.gmra.mxu1 %v4285_v48  ;;  %v1211_v48 = vld [vmem:[%s5072_s4 + $0xb0] sm:$0xff] }
 0x23f   :  { %1598 = vmatmul.mubr.f32.gmra.mxu0 %v4420_v11  ;;  %1782 = vmatprep.mubr.f32.mxu1 %v5088_v56 }
 0x240   :  { %1603 = vmatprep.mubr.f32.mxu0 %v5088_v56 }
 0x242   :  { %1783 = vmatmul.mubr.f32.gmra.mxu1 %v4300_v16  ;;  %v1213_v16 = vld [vmem:[%s5072_s4 + $0xc0] sm:$0xff] }
 0x243   :  { %1604 = vmatmul.mubr.f32.gmra.mxu0 %v4429_v50  ;;  %1788 = vmatprep.mubr.f32.mxu1 %v5088_v56 }
 0x244   :  { %1609 = vmatprep.mubr.f32.mxu0 %v5088_v56 }
 0x246   :  { %1789 = vmatmul.mubr.f32.gmra.mxu1 %v4315_v31  ;;  %v4507_v31 = vpop.permute.xlu0 %1305 }
 0x247   :  { %1610 = vmatmul.mubr.f32.gmra.mxu0 %v1211_v48  ;;  %1794 = vmatprep.mubr.f32.mxu1 %v5088_v56 }
 0x248   :  { %1615 = vmatprep.mubr.f32.mxu0 %v5088_v56 }
 0x24a   :  { %1795 = vmatmul.mubr.f32.gmra.mxu1 %v4330_v32  ;;  %v4512_v10 = vpop.permute.xlu0 %1300 }
 0x24b   :  { %1616 = vmatmul.mubr.f32.gmra.mxu0 %v1212_v54  ;;  %1800 = vmatprep.mubr.f32.mxu1 %v5088_v56 }
 0x24c   :  { %1621 = vmatprep.mubr.f32.mxu0 %v5088_v56 }
 0x24e   :  { %1801 = vmatmul.mubr.f32.gmra.mxu1 %v4343_v45  ;;  %v4515_v26 = vpop.permute.xlu0 %1295 }
 0x24f   :  { %1622 = vmatmul.mubr.f32.gmra.mxu0 %v1213_v16  ;;  %1806 = vmatprep.mubr.f32.mxu1 %v5088_v56 }
 0x250   :  { %1627 = vmatprep.mubr.f32.mxu0 %v5088_v56 }
 0x252   :  { %1807 = vmatmul.mubr.f32.gmra.mxu1 %v4350_v6  ;;  %v4519_v39 = vpop.permute.xlu0 %1290  ;;  %v4560_v6 = vpop.permute.xlu1 %1380 }
 0x253   :  { %1628 = vmatmul.mubr.f32.gmra.mxu0 %v1214_v63  ;;  %1812 = vmatprep.mubr.f32.mxu1 %v5088_v56 }
 0x254   :  { %1633 = vmatprep.mubr.f32.mxu0 %v5088_v56 }
 0x256   :  { %1813 = vmatmul.mubr.f32.gmra.mxu1 %v4357_v49  ;;  %v4522_v21 = vpop.permute.xlu0 %1285 }
 0x257   :  { %1634 = vmatmul.mubr.f32.gmra.mxu0 %v1215_v57  ;;  %1818 = vmatprep.mubr.f32.mxu1 %v5088_v56 }
 0x258   :  { %1639 = vmatprep.mubr.f32.mxu0 %v5088_v56 }
 0x25a   :  { %1819 = vmatmul.mubr.f32.gmra.mxu1 %v4366_v17  ;;  %v4526_v7 = vpop.permute.xlu0 %1280 }
 0x25b   :  { %1640 = vmatmul.mubr.f32.gmra.mxu0 %v1216_v19  ;;  %1824 = vmatprep.mubr.f32.mxu1 %v5088_v56 }
 0x25c   :  { %1645 = vmatprep.mubr.f32.mxu0 %v5088_v56 }
 0x25e   :  { %1825 = vmatmul.mubr.f32.gmra.mxu1 %v4375_v30  ;;  %v4531_v13 = vpop.permute.xlu0 %1275 }
 0x25f   :  { %1646 = vmatmul.mubr.f32.gmra.mxu0 %v1217_v46  ;;  %1830 = vmatprep.mubr.f32.mxu1 %v5088_v56 }
 0x260   :  { %1651 = vmatprep.mubr.f32.mxu0 %v5088_v56 }
 0x262   :  { %1831 = vmatmul.mubr.f32.gmra.mxu1 %v4384_v42  ;;  %v4537_v55 = vpop.permute.xlu0 %1270 }
 0x263   :  { %1652 = vmatmul.mubr.f32.gmra.mxu0 %v1218_v36  ;;  %1836 = vmatprep.mubr.f32.mxu1 %v5088_v56 }
 0x264   :  { %1657 = vmatprep.mubr.f32.mxu0 %v5088_v56 }
 0x266   :  { %1837 = vmatmul.mubr.f32.gmra.mxu1 %v4393_v51  ;;  %v4541_v20 = vpop.permute.xlu0 %1265 }
 0x267   :  { %1658 = vmatmul.mubr.f32.gmra.mxu0 %v1219_v5  ;;  %1842 = vmatprep.mubr.f32.mxu1 %v5088_v56 }
 0x268   :  { %1663 = vmatprep.mubr.f32.mxu0 %v5088_v56 }
 0x26a   :  { %1843 = vmatmul.mubr.f32.gmra.mxu1 %v4402_v18  ;;  %v4545_v32 = vpop.permute.xlu0 %1260 }
 0x26b   :  { %1664 = vmatmul.mubr.f32.gmra.mxu0 %v1220_v29  ;;  %1848 = vmatprep.mubr.f32.mxu1 %v5088_v56 }
 0x26e   :  { %1849 = vmatmul.mubr.f32.gmra.mxu1 %v4411_v8  ;;  %v4549_v22 = vpop.permute.xlu0 %1255 }
 0x26f   :  { %1854 = vmatprep.mubr.f32.mxu1 %v5088_v56 }
 0x272   :  { %1855 = vmatmul.mubr.f32.gmra.mxu1 %v4420_v11 }
 0x273   :  { %1860 = vmatprep.mubr.f32.mxu1 %v5088_v56 }
 0x276   :  { %1861 = vmatmul.mubr.f32.gmra.mxu1 %v4429_v50 }
 0x277   :  { %1866 = vmatprep.mubr.f32.mxu1 %v5088_v56 }
 0x27a   :  { %1867 = vmatmul.mubr.f32.gmra.mxu1 %v1211_v48 }
 0x27b   :  { %1872 = vmatprep.mubr.f32.mxu1 %v5088_v56 }
 0x27e   :  { %1873 = vmatmul.mubr.f32.gmra.mxu1 %v1212_v54  ;;  %v4567_v54 = vpop.permute.xlu1 %1375 }
 0x27f   :  { %1878 = vmatprep.mubr.f32.mxu1 %v5088_v56 }
 0x282   :  { %1879 = vmatmul.mubr.f32.gmra.mxu1 %v1213_v16 }
 0x283   :  { %1884 = vmatprep.mubr.f32.mxu1 %v5088_v56 }
 0x286   :  { %1885 = vmatmul.mubr.f32.gmra.mxu1 %v1214_v63 }
 0x287   :  { %1890 = vmatprep.mubr.f32.mxu1 %v5088_v56 }
 0x28a   :  { %1891 = vmatmul.mubr.f32.gmra.mxu1 %v1215_v57 }
 0x28b   :  { %1896 = vmatprep.mubr.f32.mxu1 %v5088_v56 }
 0x28e   :  { %1897 = vmatmul.mubr.f32.gmra.mxu1 %v1216_v19 }
 0x28f   :  { %1902 = vmatprep.mubr.f32.mxu1 %v5088_v56 }
 0x292   :  { %1903 = vmatmul.mubr.f32.gmra.mxu1 %v1217_v46 }
 0x293   :  { %1908 = vmatprep.mubr.f32.mxu1 %v5088_v56 }
 0x296   :  { %1909 = vmatmul.mubr.f32.gmra.mxu1 %v1218_v36 }
 0x297   :  { %1914 = vmatprep.mubr.f32.mxu1 %v5088_v56 }
 0x29a   :  { %1915 = vmatmul.mubr.f32.gmra.mxu1 %v1219_v5 }
 0x29b   :  { %1920 = vmatprep.mubr.f32.mxu1 %v5088_v56 }
 0x29e   :  { %1921 = vmatmul.mubr.f32.gmra.mxu1 %v1220_v29 }
 0x2af   :  { %v1479_v61 = vpop.f32.mrf.mxu0 }
 0x2b0   :  { %v1480_v28 = vadd.f32 %v1479_v61, %v4549_v22 }
 0x2b1   :  { %v1481_v38 = vpop.f32.mrf.mxu0 }
 0x2b2   :  { %v1927_v58 = vmul.f32 0.01, %v1480_v28  ;;  %v1482_v34 = vadd.f32 %v1481_v38, %v4549_v22 }
 0x2b3   :  { %v1485_v23 = vpop.f32.mrf.mxu0 }
 0x2b4   :  { %v1928_v52 = vmul.f32 0.01, %v1482_v34  ;;  %v1486_v2 = vadd.f32 %v1485_v23, %v4545_v32  ;;  %v2055_v45 = vmax.f32 %v1480_v28, %v1927_v58  ;;  %v4576_v23 = vpop.permute.xlu1 %1370 }
 0x2b5   :  { %v1487_v0 = vpop.f32.mrf.mxu0 }
 0x2b6   :  { %v2056_v47 = vmax.f32 %v1482_v34, %v1928_v52  ;;  %v1931_v12 = vmul.f32 0.01, %v1486_v2  ;;  %v1488_v25 = vadd.f32 %v1487_v0, %v4545_v32 }
 0x2b7   :  { %v1491_v60 = vpop.f32.mrf.mxu0 }
 0x2b8   :  { %v1932_v62 = vmul.f32 0.01, %v1488_v25  ;;  %v1492_v27 = vadd.f32 %v1491_v60, %v4541_v20  ;;  %v4558_v1 = vmax.f32 %v2055_v45, %v2056_v47  ;;  %v2059_v37 = vmax.f32 %v1486_v2, %v1931_v12 }
 0x2b9   :  { %v1493_v33 = vpop.f32.mrf.mxu0 }
 0x2ba   :  { %v2060_v4 = vmax.f32 %v1488_v25, %v1932_v62  ;;  %v1935_v49 = vmul.f32 0.01, %v1492_v27  ;;  %v1494_v17 = vadd.f32 %v1493_v33, %v4541_v20 }
 0x2bb   :  { %v1497_v30 = vpop.f32.mrf.mxu0 }
 0x2bc   :  { %v1936_v42 = vmul.f32 0.01, %v1494_v17  ;;  %v1498_v51 = vadd.f32 %v1497_v30, %v4537_v55  ;;  %v4564_v24 = vmax.f32 %v2059_v37, %v2060_v4  ;;  %v2063_v8 = vmax.f32 %v1492_v27, %v1935_v49 }
 0x2bd   :  { %v1499_v18 = vpop.f32.mrf.mxu0 }
 0x2be   :  { %v2064_v11 = vmax.f32 %v1494_v17, %v1936_v42  ;;  %v1939_v50 = vmul.f32 0.01, %v1498_v51  ;;  %v1500_v48 = vadd.f32 %v1499_v18, %v4537_v55  ;;  %v4581_v17 = vpop.permute.xlu1 %1365 }
 0x2bf   :  { %v1503_v16 = vpop.f32.mrf.mxu0 }
 0x2c0   :  { %v1940_v63 = vmul.f32 0.01, %v1500_v48  ;;  %v1504_v57 = vadd.f32 %v1503_v16, %v4531_v13  ;;  %v4570_v19 = vmax.f32 %v2063_v8, %v2064_v11  ;;  %v2067_v36 = vmax.f32 %v1498_v51, %v1939_v50 }
 0x2c1   :  { %v1505_v46 = vpop.f32.mrf.mxu0 }
 0x2c2   :  { %v2068_v5 = vmax.f32 %v1500_v48, %v1940_v63  ;;  %v1943_v29 = vmul.f32 0.01, %v1504_v57  ;;  %v1506_v61 = vadd.f32 %v1505_v46, %v4531_v13 }
 0x2c3   :  { %v1509_v28 = vpop.f32.mrf.mxu0 }
 0x2c4   :  { %v1944_v38 = vmul.f32 0.01, %v1506_v61  ;;  %v1510_v58 = vadd.f32 %v1509_v28, %v4526_v7  ;;  %v4574_v34 = vmax.f32 %v2067_v36, %v2068_v5  ;;  %v2071_v2 = vmax.f32 %v1504_v57, %v1943_v29  ;;  %v4586_v5 = vpop.permute.xlu1 %1360 }
 0x2c5   :  { %v1511_v52 = vpop.f32.mrf.mxu0 }
 0x2c6   :  { %v2072_v0 = vmax.f32 %v1506_v61, %v1944_v38  ;;  %v1947_v45 = vmul.f32 0.01, %v1510_v58  ;;  %v1512_v47 = vadd.f32 %v1511_v52, %v4526_v7 }
 0x2c7   :  { %v1515_v12 = vpop.f32.mrf.mxu0 }
 0x2c8   :  { %v1948_v25 = vmul.f32 0.01, %v1512_v47  ;;  %v1516_v60 = vadd.f32 %v1515_v12, %v4522_v21  ;;  %v2195_v62 = vmax.f32 %v2071_v2, %v2072_v0  ;;  %v2075_v33 = vmax.f32 %v1510_v58, %v1947_v45 }
 0x2c9   :  { %v1517_v27 = vpop.f32.mrf.mxu0 }
 0x2ca   :  { %v2076_v37 = vmax.f32 %v1512_v47, %v1948_v25  ;;  %v1951_v4 = vmul.f32 0.01, %v1516_v60  ;;  %v1518_v49 = vadd.f32 %v1517_v27, %v4522_v21  ;;  %2196 = vmax.xlane.f32.xlu0 %v2195_v62  ;;  %v4591_v27 = vpop.permute.xlu1 %1355 }
 0x2cb   :  { %v1521_v30 = vpop.f32.mrf.mxu0 }
 0x2cc   :  { %v1952_v42 = vmul.f32 0.01, %v1518_v49  ;;  %v1522_v51 = vadd.f32 %v1521_v30, %v4519_v39  ;;  %v2198_v18 = vmax.f32 %v2075_v33, %v2076_v37  ;;  %v2079_v11 = vmax.f32 %v1516_v60, %v1951_v4 }
 0x2cd   :  { %v1523_v8 = vpop.f32.mrf.mxu0 }
 0x2ce   :  { %v2080_v50 = vmax.f32 %v1518_v49, %v1952_v42  ;;  %v1955_v48 = vmul.f32 0.01, %v1522_v51  ;;  %v1524_v16 = vadd.f32 %v1523_v8, %v4519_v39  ;;  %2199 = vmax.xlane.f32.xlu0 %v2198_v18 }
 0x2cf   :  { %v1527_v63 = vpop.f32.mrf.mxu0 }
 0x2d0   :  { %v1956_v57 = vmul.f32 0.01, %v1524_v16  ;;  %v1528_v46 = vadd.f32 %v1527_v63, %v4515_v26  ;;  %v2201_v36 = vmax.f32 %v2079_v11, %v2080_v50  ;;  %v2083_v61 = vmax.f32 %v1522_v51, %v1955_v48  ;;  %v4596_v63 = vpop.permute.xlu1 %1350 }
 0x2d1   :  { %v1529_v29 = vpop.f32.mrf.mxu0 }
 0x2d2   :  { %v2084_v28 = vmax.f32 %v1524_v16, %v1956_v57  ;;  %v1959_v38 = vmul.f32 0.01, %v1528_v46  ;;  %v1530_v58 = vadd.f32 %v1529_v29, %v4515_v26  ;;  %2202 = vmax.xlane.f32.xlu0 %v2201_v36 }
 0x2d3   :  { %v1533_v52 = vpop.f32.mrf.mxu0 }
 0x2d4   :  { %v1960_v2 = vmul.f32 0.01, %v1530_v58  ;;  %v1534_v0 = vadd.f32 %v1533_v52, %v4512_v10  ;;  %v2204_v45 = vmax.f32 %v2083_v61, %v2084_v28  ;;  %v2087_v12 = vmax.f32 %v1528_v46, %v1959_v38 }
 0x2d5   :  { %v1535_v47 = vpop.f32.mrf.mxu0 }
 0x2d6   :  { %v2088_v25 = vmax.f32 %v1530_v58, %v1960_v2  ;;  %v1963_v60 = vmul.f32 0.01, %v1534_v0  ;;  %v1536_v62 = vadd.f32 %v1535_v47, %v4512_v10  ;;  %2205 = vmax.xlane.f32.xlu0 %v2204_v45 }
 0x2d7   :  { %v1539_v33 = vpop.f32.mrf.mxu0 }
 0x2d8   :  { %v1964_v37 = vmul.f32 0.01, %v1536_v62  ;;  %v1540_v4 = vadd.f32 %v1539_v33, %v4507_v31  ;;  %v2207_v49 = vmax.f32 %v2087_v12, %v2088_v25  ;;  %v2091_v42 = vmax.f32 %v1534_v0, %v1963_v60  ;;  %v4601_v60 = vpop.permute.xlu1 %1345 }
 0x2d9   :  { %v1541_v30 = vpop.f32.mrf.mxu0 }
 0x2da   :  { %v2092_v51 = vmax.f32 %v1536_v62, %v1964_v37  ;;  %v1967_v18 = vmul.f32 0.01, %v1540_v4  ;;  %v1542_v8 = vadd.f32 %v1541_v30, %v4507_v31  ;;  %2208 = vmax.xlane.f32.xlu0 %v2207_v49 }
 0x2db   :  { %v1545_v11 = vpop.f32.mrf.mxu0 }
 0x2dc   :  { %v1968_v50 = vmul.f32 0.01, %v1542_v8  ;;  %v1546_v48 = vadd.f32 %v1545_v11, %v4502_v35  ;;  %v2210_v16 = vmax.f32 %v2091_v42, %v2092_v51  ;;  %v2095_v46 = vmax.f32 %v1540_v4, %v1967_v18 }
 0x2dd   :  { %v1547_v57 = vpop.f32.mrf.mxu0 }
 0x2de   :  { %v2096_v36 = vmax.f32 %v1542_v8, %v1968_v50  ;;  %v1971_v29 = vmul.f32 0.01, %v1546_v48  ;;  %v1548_v61 = vadd.f32 %v1547_v57, %v4502_v35  ;;  %2211 = vmax.xlane.f32.xlu0 %v2210_v16 }
 0x2df   :  { %v1551_v28 = vpop.f32.mrf.mxu0 }
 0x2e0   :  { %v1972_v38 = vmul.f32 0.01, %v1548_v61  ;;  %v1552_v58 = vadd.f32 %v1551_v28, %v4493_v3  ;;  %v2213_v52 = vmax.f32 %v2095_v46, %v2096_v36  ;;  %v2099_v0 = vmax.f32 %v1546_v48, %v1971_v29 }
 0x2e1   :  { %v1553_v2 = vpop.f32.mrf.mxu0 }
 0x2e2   :  { %v2100_v45 = vmax.f32 %v1548_v61, %v1972_v38  ;;  %v1975_v47 = vmul.f32 0.01, %v1552_v58  ;;  %v1554_v12 = vadd.f32 %v1553_v2, %v4493_v3  ;;  %v1736_v25 = vpop.f32.mrf.mxu1  ;;  %2214 = vmax.xlane.f32.xlu0 %v2213_v52  ;;  %v4609_v52 = vpop.permute.xlu1 %1340 }
 0x2e3   :  { %v1737_v62 = vadd.f32 %v1736_v25, %v4549_v22  ;;  %v1557_v33 = vpop.f32.mrf.mxu0 }
 0x2e4   :  { %v1976_v37 = vmul.f32 0.01, %v1554_v12  ;;  %v1558_v4 = vadd.f32 %v1557_v33, %v4484_v40  ;;  %v1738_v49 = vpop.f32.mrf.mxu1  ;;  %v2216_v30 = vmax.f32 %v2099_v0, %v2100_v45  ;;  %v2103_v8 = vmax.f32 %v1552_v58, %v1975_v47 }
 0x2e5   :  { %v1929_v42 = vmul.f32 0.01, %v1737_v62  ;;  %v1739_v51 = vadd.f32 %v1738_v49, %v4549_v22  ;;  %v1559_v18 = vpop.f32.mrf.mxu0 }
 0x2e6   :  { %v2104_v11 = vmax.f32 %v1554_v12, %v1976_v37  ;;  %v1979_v50 = vmul.f32 0.01, %v1558_v4  ;;  %v1560_v48 = vadd.f32 %v1559_v18, %v4484_v40  ;;  %v1742_v16 = vpop.f32.mrf.mxu1  ;;  %2217 = vmax.xlane.f32.xlu0 %v2216_v30 }
 0x2e7   :  { %v1930_v57 = vmul.f32 0.01, %v1739_v51  ;;  %v1743_v46 = vadd.f32 %v1742_v16, %v4545_v32  ;;  %v1563_v36 = vpop.f32.mrf.mxu0  ;;  %v2057_v22 = vmax.f32 %v1737_v62, %v1929_v42 }
 0x2e8   :  { %v1980_v29 = vmul.f32 0.01, %v1560_v48  ;;  %v1564_v61 = vadd.f32 %v1563_v36, %v4471_v53  ;;  %v1744_v28 = vpop.f32.mrf.mxu1  ;;  %v2219_v38 = vmax.f32 %v2103_v8, %v2104_v11  ;;  %v2107_v47 = vmax.f32 %v1558_v4, %v1979_v50 }
 0x2e9   :  { %v2058_v2 = vmax.f32 %v1739_v51, %v1930_v57  ;;  %v1933_v58 = vmul.f32 0.01, %v1743_v46  ;;  %v1745_v0 = vadd.f32 %v1744_v28, %v4545_v32  ;;  %v1565_v45 = vpop.f32.mrf.mxu0 }
 0x2ea   :  { %v2108_v12 = vmax.f32 %v1560_v48, %v1980_v29  ;;  %v1983_v25 = vmul.f32 0.01, %v1564_v61  ;;  %v1566_v33 = vadd.f32 %v1565_v45, %v4471_v53  ;;  %v1748_v37 = vpop.f32.mrf.mxu1  ;;  %2220 = vmax.xlane.f32.xlu0 %v2219_v38 }
 0x2eb   :  { %v1934_v49 = vmul.f32 0.01, %v1745_v0  ;;  %v1749_v30 = vadd.f32 %v1748_v37, %v4541_v20  ;;  %v1569_v18 = vpop.f32.mrf.mxu0  ;;  %v4614_v8 = vmax.f32 %v2057_v22, %v2058_v2  ;;  %v2061_v32 = vmax.f32 %v1743_v46, %v1933_v58  ;;  %v4619_v22 = vpop.permute.xlu1 %1335 }
 0x2ec   :  { %v1984_v11 = vmul.f32 0.01, %v1566_v33  ;;  %v1570_v62 = vadd.f32 %v1569_v18, %v4462_v43  ;;  %v1750_v42 = vpop.f32.mrf.mxu1  ;;  %v2222_v51 = vmax.f32 %v2107_v47, %v2108_v12  ;;  %v2111_v57 = vmax.f32 %v1564_v61, %v1983_v25 }
 0x2ed   :  { %v2062_v16 = vmax.f32 %v1745_v0, %v1934_v49  ;;  %v1937_v4 = vmul.f32 0.01, %v1749_v30  ;;  %v1751_v50 = vadd.f32 %v1750_v42, %v4541_v20  ;;  %v1571_v48 = vpop.f32.mrf.mxu0 }
 0x2ee   :  { %v2112_v36 = vmax.f32 %v1566_v33, %v1984_v11  ;;  %v1987_v29 = vmul.f32 0.01, %v1570_v62  ;;  %v1572_v28 = vadd.f32 %v1571_v48, %v4462_v43  ;;  %v1754_v38 = vpop.f32.mrf.mxu1  ;;  %2223 = vmax.xlane.f32.xlu0 %v2222_v51 }
 0x2ef   :  { %v1938_v2 = vmul.f32 0.01, %v1751_v50  ;;  %v1755_v45 = vadd.f32 %v1754_v38, %v4537_v55  ;;  %v1575_v37 = vpop.f32.mrf.mxu0  ;;  %v4622_v47 = vmax.f32 %v2061_v32, %v2062_v16  ;;  %v2065_v61 = vmax.f32 %v1749_v30, %v1937_v4 }
 0x2f0   :  { %v1988_v46 = vmul.f32 0.01, %v1572_v28  ;;  %v1576_v58 = vadd.f32 %v1575_v37, %v4619_v22  ;;  %v1756_v20 = vpop.f32.mrf.mxu1  ;;  %v2225_v0 = vmax.f32 %v2111_v57, %v2112_v36  ;;  %v2115_v18 = vmax.f32 %v1570_v62, %v1987_v29 }
 0x2f1   :  { %v2066_v12 = vmax.f32 %v1751_v50, %v1938_v2  ;;  %v1941_v25 = vmul.f32 0.01, %v1755_v45  ;;  %v1757_v33 = vadd.f32 %v1756_v20, %v4537_v55  ;;  %v1577_v49 = vpop.f32.mrf.mxu0 }
 0x2f2   :  { %v2116_v11 = vmax.f32 %v1572_v28, %v1988_v46  ;;  %v1991_v42 = vmul.f32 0.01, %v1576_v58  ;;  %v1578_v51 = vadd.f32 %v1577_v49, %v4619_v22  ;;  %v1760_v48 = vpop.f32.mrf.mxu1  ;;  %2226 = vmax.xlane.f32.xlu0 %v2225_v0 }
 0x2f3   :  { %v1942_v32 = vmul.f32 0.01, %v1757_v33  ;;  %v1761_v16 = vadd.f32 %v1760_v48, %v4531_v13  ;;  %v1581_v38 = vpop.f32.mrf.mxu0  ;;  %v4628_v37 = vmax.f32 %v2065_v61, %v2066_v12  ;;  %v2069_v55 = vmax.f32 %v1755_v45, %v1941_v25 }
 0x2f4   :  { %v1992_v57 = vmul.f32 0.01, %v1578_v51  ;;  %v1582_v30 = vadd.f32 %v1581_v38, %v4609_v52  ;;  %v1762_v4 = vpop.f32.mrf.mxu1  ;;  %v2228_v50 = vmax.f32 %v2115_v18, %v2116_v11  ;;  %v2119_v2 = vmax.f32 %v1576_v58, %v1991_v42 }
 0x2f5   :  { %v2070_v36 = vmax.f32 %v1757_v33, %v1942_v32  ;;  %v1945_v62 = vmul.f32 0.01, %v1761_v16  ;;  %v1763_v29 = vadd.f32 %v1762_v4, %v4531_v13  ;;  %v1583_v28 = vpop.f32.mrf.mxu0 }
 0x2f6   :  { %v2120_v46 = vmax.f32 %v1578_v51, %v1992_v57  ;;  %v1995_v20 = vmul.f32 0.01, %v1582_v30  ;;  %v1584_v0 = vadd.f32 %v1583_v28, %v4609_v52  ;;  %v1766_v49 = vpop.f32.mrf.mxu1  ;;  %2229 = vmax.xlane.f32.xlu0 %v2228_v50 }
 0x2f7   :  { %v1946_v61 = vmul.f32 0.01, %v1763_v29  ;;  %v1767_v12 = vadd.f32 %v1766_v49, %v4526_v7  ;;  %v1587_v48 = vpop.f32.mrf.mxu0  ;;  %v4634_v38 = vmax.f32 %v2069_v55, %v2070_v36  ;;  %v2073_v13 = vmax.f32 %v1761_v16, %v1945_v62 }
 0x2f8   :  { %v1996_v18 = vmul.f32 0.01, %v1584_v0  ;;  %v1588_v45 = vadd.f32 %v1587_v48, %v4601_v60  ;;  %v1768_v25 = vpop.f32.mrf.mxu1  ;;  %v4637_v33 = vmax.f32 %v2119_v2, %v2120_v46  ;;  %v2123_v32 = vmax.f32 %v1582_v30, %v1995_v20 }
 0x2f9   :  { %v2074_v58 = vmax.f32 %v1763_v29, %v1946_v61  ;;  %v1949_v11 = vmul.f32 0.01, %v1767_v12  ;;  %v1769_v42 = vadd.f32 %v1768_v25, %v4526_v7  ;;  %v1589_v51 = vpop.f32.mrf.mxu0 }
 0x2fa   :  { %v2124_v57 = vmax.f32 %v1584_v0, %v1996_v18  ;;  %v1999_v4 = vmul.f32 0.01, %v1588_v45  ;;  %v1590_v50 = vadd.f32 %v1589_v51, %v4601_v60  ;;  %v1772_v28 = vpop.f32.mrf.mxu1 }
 0x2fb   :  { %v1950_v55 = vmul.f32 0.01, %v1769_v42  ;;  %v1773_v36 = vadd.f32 %v1772_v28, %v4522_v21  ;;  %v1593_v49 = vpop.f32.mrf.mxu0  ;;  %v2291_v48 = vmax.f32 %v2073_v13, %v2074_v58  ;;  %v2077_v29 = vmax.f32 %v1767_v12, %v1949_v11 }
 0x2fc   :  { %v2000_v56 = vmul.f32 0.01, %v1590_v50  ;;  %v1594_v2 = vadd.f32 %v1593_v49, %v4596_v63  ;;  %v1774_v16 = vpop.f32.mrf.mxu1  ;;  %v4643_v62 = vmax.f32 %v2123_v32, %v2124_v57  ;;  %v2127_v0 = vmax.f32 %v1588_v45, %v1999_v4 }
 0x2fd   :  { %v2078_v7 = vmax.f32 %v1769_v42, %v1950_v55  ;;  %v1953_v46 = vmul.f32 0.01, %v1773_v36  ;;  %v1775_v30 = vadd.f32 %v1774_v16, %v4522_v21  ;;  %2292 = vmax.xlane.f32.xlu1 %v2291_v48  ;;  %v1595_v20 = vpop.f32.mrf.mxu0 }
 0x2fe   :  { %v2128_v61 = vmax.f32 %v1590_v50, %v2000_v56  ;;  %v2003_v18 = vmul.f32 0.01, %v1594_v2  ;;  %v1596_v25 = vadd.f32 %v1595_v20, %v4596_v63  ;;  %v1778_v51 = vpop.f32.mrf.mxu1 }
 0x2ff   :  { %v1954_v13 = vmul.f32 0.01, %v1775_v30  ;;  %v1779_v58 = vadd.f32 %v1778_v51, %v4519_v39  ;;  %v1599_v28 = vpop.f32.mrf.mxu0  ;;  %v2294_v49 = vmax.f32 %v2077_v29, %v2078_v7  ;;  %v2081_v21 = vmax.f32 %v1773_v36, %v1953_v46 }
 0x300   :  { %v2004_v32 = vmul.f32 0.01, %v1596_v25  ;;  %v1600_v12 = vadd.f32 %v1599_v28, %v4591_v27  ;;  %v1780_v11 = vpop.f32.mrf.mxu1  ;;  %v4649_v42 = vmax.f32 %v2127_v0, %v2128_v61  ;;  %v2131_v4 = vmax.f32 %v1594_v2, %v2003_v18 }
 0x301   :  { %v2082_v57 = vmax.f32 %v1775_v30, %v1954_v13  ;;  %v1957_v55 = vmul.f32 0.01, %v1779_v58  ;;  %v1781_v56 = vadd.f32 %v1780_v11, %v4519_v39  ;;  %2295 = vmax.xlane.f32.xlu1 %v2294_v49  ;;  %v1601_v45 = vpop.f32.mrf.mxu0 }
 0x302   :  { %v2132_v50 = vmax.f32 %v1596_v25, %v2004_v32  ;;  %v2007_v48 = vmul.f32 0.01, %v1600_v12  ;;  %v1602_v16 = vadd.f32 %v1601_v45, %v4591_v27  ;;  %v1784_v20 = vpop.f32.mrf.mxu1 }
 0x303   :  { %v1958_v29 = vmul.f32 0.01, %v1781_v56  ;;  %v1785_v7 = vadd.f32 %v1784_v20, %v4515_v26  ;;  %v1605_v51 = vpop.f32.mrf.mxu0  ;;  %v2297_v28 = vmax.f32 %v2081_v21, %v2082_v57  ;;  %v2085_v39 = vmax.f32 %v1779_v58, %v1957_v55 }
 0x304   :  { %v2008_v0 = vmul.f32 0.01, %v1602_v16  ;;  %v1606_v36 = vadd.f32 %v1605_v51, %v4586_v5  ;;  %v1786_v46 = vpop.f32.mrf.mxu1  ;;  %v4655_v30 = vmax.f32 %v2131_v4, %v2132_v50  ;;  %v2135_v25 = vmax.f32 %v1600_v12, %v2007_v48 }
 0x305   :  { %v2086_v61 = vmax.f32 %v1781_v56, %v1958_v29  ;;  %v1961_v13 = vmul.f32 0.01, %v1785_v7  ;;  %v1787_v2 = vadd.f32 %v1786_v46, %v4515_v26  ;;  %2298 = vmax.xlane.f32.xlu1 %v2297_v28  ;;  %v1607_v18 = vpop.f32.mrf.mxu0 }
 0x306   :  { %v2136_v49 = vmax.f32 %v1602_v16, %v2008_v0  ;;  %v2011_v32 = vmul.f32 0.01, %v1606_v36  ;;  %v1608_v11 = vadd.f32 %v1607_v18, %v4586_v5  ;;  %v1790_v45 = vpop.f32.mrf.mxu1 }
 0x307   :  { %v1962_v21 = vmul.f32 0.01, %v1787_v2  ;;  %v1791_v57 = vadd.f32 %v1790_v45, %v4512_v10  ;;  %v1611_v20 = vpop.f32.mrf.mxu0  ;;  %v2300_v51 = vmax.f32 %v2085_v39, %v2086_v61  ;;  %v2089_v50 = vmax.f32 %v1785_v7, %v1961_v13 }
 0x308   :  { %v2012_v4 = vmul.f32 0.01, %v1608_v11  ;;  %v1612_v58 = vadd.f32 %v1611_v20, %v4581_v17  ;;  %v1792_v55 = vpop.f32.mrf.mxu1  ;;  %v2243_v56 = vmax.f32 %v2135_v25, %v2136_v49  ;;  %v2139_v16 = vmax.f32 %v1606_v36, %v2011_v32 }
 0x309   :  { %v2090_v26 = vmax.f32 %v1787_v2, %v1962_v21  ;;  %v1965_v29 = vmul.f32 0.01, %v1791_v57  ;;  %v1793_v12 = vadd.f32 %v1792_v55, %v4512_v10  ;;  %2301 = vmax.xlane.f32.xlu1 %v2300_v51  ;;  %v1613_v48 = vpop.f32.mrf.mxu0 }
 0x30a   :  { %v2140_v28 = vmax.f32 %v1608_v11, %v2012_v4  ;;  %v2015_v0 = vmul.f32 0.01, %v1612_v58  ;;  %v1614_v46 = vadd.f32 %v1613_v48, %v4581_v17  ;;  %v1796_v18 = vpop.f32.mrf.mxu1  ;;  %2244 = vmax.xlane.f32.xlu0 %v2243_v56 }
 0x30b   :  { %v1966_v39 = vmul.f32 0.01, %v1793_v12  ;;  %v1797_v61 = vadd.f32 %v1796_v18, %v4507_v31  ;;  %v1617_v45 = vpop.f32.mrf.mxu0  ;;  %v2303_v20 = vmax.f32 %v2089_v50, %v2090_v26  ;;  %v2093_v10 = vmax.f32 %v1791_v57, %v1965_v29 }
 0x30c   :  { %v2016_v25 = vmul.f32 0.01, %v1614_v46  ;;  %v1618_v7 = vadd.f32 %v1617_v45, %v4576_v23  ;;  %v1798_v13 = vpop.f32.mrf.mxu1  ;;  %v2246_v2 = vmax.f32 %v2139_v16, %v2140_v28  ;;  %v2143_v11 = vmax.f32 %v1612_v58, %v2015_v0 }
 0x30d   :  { %v2094_v49 = vmax.f32 %v1793_v12, %v1966_v39  ;;  %v1969_v21 = vmul.f32 0.01, %v1797_v61  ;;  %v1799_v36 = vadd.f32 %v1798_v13, %v4507_v31  ;;  %2304 = vmax.xlane.f32.xlu1 %v2303_v20  ;;  %v1619_v32 = vpop.f32.mrf.mxu0 }
 0x30e   :  { %v2144_v51 = vmax.f32 %v1614_v46, %v2016_v25  ;;  %v2019_v4 = vmul.f32 0.01, %v1618_v7  ;;  %v1620_v55 = vadd.f32 %v1619_v32, %v4576_v23  ;;  %v1802_v56 = vpop.f32.mrf.mxu1  ;;  %2247 = vmax.xlane.f32.xlu0 %v2246_v2 }
 0x30f   :  { %v1970_v50 = vmul.f32 0.01, %v1799_v36  ;;  %v1803_v26 = vadd.f32 %v1802_v56, %v4502_v35  ;;  %v1623_v48 = vpop.f32.mrf.mxu0  ;;  %v2306_v18 = vmax.f32 %v2093_v10, %v2094_v49  ;;  %v2097_v31 = vmax.f32 %v1797_v61, %v1969_v21 }
 0x310   :  { %v2020_v16 = vmul.f32 0.01, %v1620_v55  ;;  %v1624_v57 = vadd.f32 %v1623_v48, %v4567_v54  ;;  %v1804_v29 = vpop.f32.mrf.mxu1  ;;  %v2249_v12 = vmax.f32 %v2143_v11, %v2144_v51  ;;  %v2147_v46 = vmax.f32 %v1618_v7, %v2019_v4 }
 0x311   :  { %v2098_v28 = vmax.f32 %v1799_v36, %v1970_v50  ;;  %v1973_v39 = vmul.f32 0.01, %v1803_v26  ;;  %v1805_v58 = vadd.f32 %v1804_v29, %v4502_v35  ;;  %2307 = vmax.xlane.f32.xlu1 %v2306_v18  ;;  %v1625_v0 = vpop.f32.mrf.mxu0 }
 0x312   :  { %v2148_v45 = vmax.f32 %v1620_v55, %v2020_v16  ;;  %v2023_v20 = vmul.f32 0.01, %v1624_v57  ;;  %v1626_v25 = vadd.f32 %v1625_v0, %v4567_v54  ;;  %v1808_v13 = vpop.f32.mrf.mxu1  ;;  %2250 = vmax.xlane.f32.xlu0 %v2249_v12 }
 0x313   :  { %v1974_v2 = vmul.f32 0.01, %v1805_v58  ;;  %v1809_v10 = vadd.f32 %v1808_v13, %v4493_v3  ;;  %v1629_v49 = vpop.f32.mrf.mxu0  ;;  %v2309_v32 = vmax.f32 %v2097_v31, %v2098_v28  ;;  %v2101_v35 = vmax.f32 %v1803_v26, %v1973_v39 }
 0x314   :  { %v2024_v11 = vmul.f32 0.01, %v1626_v25  ;;  %v1630_v61 = vadd.f32 %v1629_v49, %v4560_v6  ;;  %v1810_v21 = vpop.f32.mrf.mxu1  ;;  %v2252_v36 = vmax.f32 %v2147_v46, %v2148_v45  ;;  %v2151_v55 = vmax.f32 %v1624_v57, %v2023_v20 }
 0x315   :  { %v2102_v51 = vmax.f32 %v1805_v58, %v1974_v2  ;;  %v1977_v56 = vmul.f32 0.01, %v1809_v10  ;;  %v1811_v7 = vadd.f32 %v1810_v21, %v4493_v3  ;;  %2310 = vmax.xlane.f32.xlu1 %v2309_v32  ;;  %v1631_v4 = vpop.f32.mrf.mxu0 }
 0x316   :  { %v2152_v50 = vmax.f32 %v1626_v25, %v2024_v11  ;;  %v2027_v48 = vmul.f32 0.01, %v1630_v61  ;;  %v1632_v18 = vadd.f32 %v1631_v4, %v4560_v6  ;;  %v1814_v16 = vpop.f32.mrf.mxu1  ;;  %2253 = vmax.xlane.f32.xlu0 %v2252_v36 }
 0x317   :  { %v1978_v29 = vmul.f32 0.01, %v1811_v7  ;;  %v1815_v12 = vadd.f32 %v1814_v16, %v4484_v40  ;;  %v1635_v31 = vpop.f32.mrf.mxu0  ;;  %v2312_v28 = vmax.f32 %v2101_v35, %v2102_v51  ;;  %v2105_v3 = vmax.f32 %v1809_v10, %v1977_v56 }
 0x318   :  { %v2028_v0 = vmul.f32 0.01, %v1632_v18  ;;  %v1636_v26 = vadd.f32 %v1635_v31, %v4553_v44  ;;  %v1816_v39 = vpop.f32.mrf.mxu1  ;;  %v2255_v58 = vmax.f32 %v2151_v55, %v2152_v50  ;;  %v2155_v25 = vmax.f32 %v1630_v61, %v2027_v48 }
 0x319   :  { %v2106_v46 = vmax.f32 %v1811_v7, %v1978_v29  ;;  %v1981_v45 = vmul.f32 0.01, %v1815_v12  ;;  %v1817_v57 = vadd.f32 %v1816_v39, %v4484_v40  ;;  %2313 = vmax.xlane.f32.xlu1 %v2312_v28  ;;  %v1637_v20 = vpop.f32.mrf.mxu0 }
 0x31a   :  { %v2156_v13 = vmax.f32 %v1632_v18, %v2028_v0  ;;  %v2031_v2 = vmul.f32 0.01, %v1636_v26  ;;  %v1638_v49 = vadd.f32 %v1637_v20, %v4553_v44  ;;  %v1820_v32 = vpop.f32.mrf.mxu1  ;;  %2256 = vmax.xlane.f32.xlu0 %v2255_v58 }
 0x31b   :  { %v1982_v11 = vmul.f32 0.01, %v1817_v57  ;;  %v1821_v21 = vadd.f32 %v1820_v32, %v4471_v53  ;;  %v1641_v36 = vpop.f32.mrf.mxu0  ;;  %v2315_v35 = vmax.f32 %v2105_v3, %v2106_v46  ;;  %v2109_v40 = vmax.f32 %v1815_v12, %v1981_v45 }
 0x31c   :  { %v2032_v51 = vmul.f32 0.01, %v1638_v49  ;;  %v1642_v10 = vadd.f32 %v1641_v36, %v4547_v9  ;;  %v1822_v56 = vpop.f32.mrf.mxu1  ;;  %v2258_v7 = vmax.f32 %v2155_v25, %v2156_v13  ;;  %v2159_v48 = vmax.f32 %v1636_v26, %v2031_v2 }
 0x31d   :  { %v2110_v4 = vmax.f32 %v1817_v57, %v1982_v11  ;;  %v1985_v55 = vmul.f32 0.01, %v1821_v21  ;;  %v1823_v61 = vadd.f32 %v1822_v56, %v4471_v53  ;;  %2316 = vmax.xlane.f32.xlu1 %v2315_v35  ;;  %v1643_v50 = vpop.f32.mrf.mxu0 }
 0x31e   :  { %v2160_v18 = vmax.f32 %v1638_v49, %v2032_v51  ;;  %v2035_v16 = vmul.f32 0.01, %v1642_v10  ;;  %v1644_v29 = vadd.f32 %v1643_v50, %v4547_v9  ;;  %v1826_v31 = vpop.f32.mrf.mxu1  ;;  %2259 = vmax.xlane.f32.xlu0 %v2258_v7 }
 0x31f   :  { %v1986_v28 = vmul.f32 0.01, %v1823_v61  ;;  %v1827_v0 = vadd.f32 %v1826_v31, %v4462_v43  ;;  %v1647_v39 = vpop.f32.mrf.mxu0  ;;  %v2318_v58 = vmax.f32 %v2109_v40, %v2110_v4  ;;  %v2113_v53 = vmax.f32 %v1821_v21, %v1985_v55 }
 0x320   :  { %v2036_v3 = vmul.f32 0.01, %v1644_v29  ;;  %v1648_v12 = vadd.f32 %v1647_v39, %v4543_v14  ;;  %v1828_v46 = vpop.f32.mrf.mxu1  ;;  %v2261_v45 = vmax.f32 %v2159_v48, %v2160_v18  ;;  %v2163_v13 = vmax.f32 %v1642_v10, %v2035_v16 }
 0x321   :  { %v2114_v57 = vmax.f32 %v1823_v61, %v1986_v28  ;;  %v1989_v20 = vmul.f32 0.01, %v1827_v0  ;;  %v1829_v26 = vadd.f32 %v1828_v46, %v4462_v43  ;;  %2319 = vmax.xlane.f32.xlu1 %v2318_v58  ;;  %v1649_v25 = vpop.f32.mrf.mxu0 }
 0x322   :  { %v2164_v2 = vmax.f32 %v1644_v29, %v2036_v3  ;;  %v2039_v49 = vmul.f32 0.01, %v1648_v12  ;;  %v1650_v32 = vadd.f32 %v1649_v25, %v4543_v14  ;;  %v1832_v11 = vpop.f32.mrf.mxu1  ;;  %2262 = vmax.xlane.f32.xlu0 %v2261_v45 }
 0x323   :  { %v1990_v36 = vmul.f32 0.01, %v1829_v26  ;;  %v1833_v35 = vadd.f32 %v1832_v11, %v4619_v22  ;;  %v1653_v51 = vpop.f32.mrf.mxu0  ;;  %v2321_v56 = vmax.f32 %v2113_v53, %v2114_v57  ;;  %v2117_v43 = vmax.f32 %v1827_v0, %v1989_v20 }
 0x324   :  { %v2040_v7 = vmul.f32 0.01, %v1650_v32  ;;  %v1654_v21 = vadd.f32 %v1653_v51, %v4539_v15  ;;  %v1834_v40 = vpop.f32.mrf.mxu1  ;;  %v2264_v4 = vmax.f32 %v2163_v13, %v2164_v2  ;;  %v2167_v48 = vmax.f32 %v1648_v12, %v2039_v49 }
 0x325   :  { %v2118_v55 = vmax.f32 %v1829_v26, %v1990_v36  ;;  %v1993_v61 = vmul.f32 0.01, %v1833_v35  ;;  %v1835_v10 = vadd.f32 %v1834_v40, %v4619_v22  ;;  %2322 = vmax.xlane.f32.xlu1 %v2321_v56  ;;  %v1655_v50 = vpop.f32.mrf.mxu0 }
 0x326   :  { %v2168_v18 = vmax.f32 %v1650_v32, %v2040_v7  ;;  %v2043_v16 = vmul.f32 0.01, %v1654_v21  ;;  %v1656_v29 = vadd.f32 %v1655_v50, %v4539_v15  ;;  %v1838_v31 = vpop.f32.mrf.mxu1  ;;  %2265 = vmax.xlane.f32.xlu0 %v2264_v4 }
 0x327   :  { %v1994_v28 = vmul.f32 0.01, %v1835_v10  ;;  %v1839_v39 = vadd.f32 %v1838_v31, %v4609_v52  ;;  %v1659_v58 = vpop.f32.mrf.mxu0  ;;  %v2324_v3 = vmax.f32 %v2117_v43, %v2118_v55  ;;  %v2121_v22 = vmax.f32 %v1833_v35, %v1993_v61 }
 0x328   :  { %v2044_v46 = vmul.f32 0.01, %v1656_v29  ;;  %v1660_v0 = vadd.f32 %v1659_v58, %v4534_v41  ;;  %v1840_v45 = vpop.f32.mrf.mxu1  ;;  %v2267_v53 = vmax.f32 %v2167_v48, %v2168_v18  ;;  %v2171_v25 = vmax.f32 %v1654_v21, %v2043_v16 }
 0x329   :  { %v2122_v57 = vmax.f32 %v1835_v10, %v1994_v28  ;;  %v1997_v20 = vmul.f32 0.01, %v1839_v39  ;;  %v1841_v12 = vadd.f32 %v1840_v45, %v4609_v52  ;;  %2325 = vmax.xlane.f32.xlu1 %v2324_v3  ;;  %v1661_v26 = vpop.f32.mrf.mxu0 }
 0x32a   :  { %v2172_v13 = vmax.f32 %v1656_v29, %v2044_v46  ;;  %v2047_v2 = vmul.f32 0.01, %v1660_v0  ;;  %v1662_v49 = vadd.f32 %v1661_v26, %v4534_v41  ;;  %v4695_v32 = vpop.f32.mrf.mxu1  ;;  %2268 = vmax.xlane.f32.xlu0 %v2267_v53 }
 0x32b   :  { %v1998_v11 = vmul.f32 0.01, %v1841_v12  ;;  %v1665_v36 = vpop.f32.mrf.mxu0  ;;  %v4697_v51 = vmax.f32 %v2121_v22, %v2122_v57  ;;  %v2125_v40 = vmax.f32 %v1839_v39, %v1997_v20 }
 0x32c   :  { %v2048_v56 = vmul.f32 0.01, %v1662_v49  ;;  %v1666_v35 = vadd.f32 %v1665_v36, %v4529_v59  ;;  %v4700_v7 = vpop.f32.mrf.mxu1  ;;  %v2270_v52 = vmax.f32 %v2171_v25, %v2172_v13  ;;  %v2175_v43 = vmax.f32 %v1660_v0, %v2047_v2 }
 0x32d   :  { %v2126_v4 = vmax.f32 %v1841_v12, %v1998_v11  ;;  %v1667_v21 = vpop.f32.mrf.mxu0 }
 0x32e   :  { %v2176_v55 = vmax.f32 %v1662_v49, %v2048_v56  ;;  %v2051_v61 = vmul.f32 0.01, %v1666_v35  ;;  %v1668_v10 = vadd.f32 %v1667_v21, %v4529_v59  ;;  %v4703_v50 = vpop.f32.mrf.mxu1  ;;  %2271 = vmax.xlane.f32.xlu0 %v2270_v52 }
 0x32f   :  { %v4705_v48 = vmax.f32 %v2125_v40, %v2126_v4 }
 0x330   :  { %v2052_v18 = vmul.f32 0.01, %v1668_v10  ;;  %v4707_v16 = vpop.f32.mrf.mxu1  ;;  %v2273_v29 = vmax.f32 %v2175_v43, %v2176_v55  ;;  %v2179_v31 = vmax.f32 %v1666_v35, %v2051_v61 }
 0x332   :  { %v2180_v28 = vmax.f32 %v1668_v10, %v2052_v18  ;;  %v1856_v58 = vpop.f32.mrf.mxu1  ;;  %2274 = vmax.xlane.f32.xlu0 %v2273_v29 }
 0x333   :  { %v1857_v39 = vadd.f32 %v1856_v58, %v4591_v27 }
 0x334   :  { %v1858_v3 = vpop.f32.mrf.mxu1  ;;  %v2276_v46 = vmax.f32 %v2179_v31, %v2180_v28 }
 0x335   :  { %v2009_v0 = vmul.f32 0.01, %v1857_v39  ;;  %v1859_v45 = vadd.f32 %v1858_v3, %v4591_v27 }
 0x336   :  { %v1862_v53 = vpop.f32.mrf.mxu1  ;;  %2277 = vmax.xlane.f32.xlu1 %v2276_v46 }
 0x337   :  { %v2010_v22 = vmul.f32 0.01, %v1859_v45  ;;  %v1863_v57 = vadd.f32 %v1862_v53, %v4586_v5  ;;  %v2137_v12 = vmax.f32 %v1857_v39, %v2009_v0 }
 0x338   :  { %v1864_v20 = vpop.f32.mrf.mxu1 }
 0x339   :  { %v2138_v26 = vmax.f32 %v1859_v45, %v2010_v22  ;;  %v2013_v25 = vmul.f32 0.01, %v1863_v57  ;;  %v1865_v13 = vadd.f32 %v1864_v20, %v4586_v5 }
 0x33a   :  { %v1868_v2 = vpop.f32.mrf.mxu1 }
 0x33b   :  { %v2014_v49 = vmul.f32 0.01, %v1865_v13  ;;  %v1869_v11 = vadd.f32 %v1868_v2, %v4581_v17  ;;  %v2339_v36 = vmax.f32 %v2137_v12, %v2138_v26  ;;  %v2141_v35 = vmax.f32 %v1863_v57, %v2013_v25 }
 0x33c   :  { %v1870_v56 = vpop.f32.mrf.mxu1 }
 0x33d   :  { %v2142_v52 = vmax.f32 %v1865_v13, %v2014_v49  ;;  %v2017_v27 = vmul.f32 0.01, %v1869_v11  ;;  %v1871_v40 = vadd.f32 %v1870_v56, %v4581_v17  ;;  %2340 = vmax.xlane.f32.xlu1 %v2339_v36 }
 0x33e   :  { %v1874_v4 = vpop.f32.mrf.mxu1 }
 0x33f   :  { %v2018_v21 = vmul.f32 0.01, %v1871_v40  ;;  %v1875_v43 = vadd.f32 %v1874_v4, %v4576_v23  ;;  %v2342_v55 = vmax.f32 %v2141_v35, %v2142_v52  ;;  %v2145_v10 = vmax.f32 %v1869_v11, %v2017_v27 }
 0x340   :  { %v1876_v61 = vpop.f32.mrf.mxu1 }
 0x341   :  { %v2146_v5 = vmax.f32 %v1871_v40, %v2018_v21  ;;  %v2021_v18 = vmul.f32 0.01, %v1875_v43  ;;  %v1877_v29 = vadd.f32 %v1876_v61, %v4576_v23  ;;  %2343 = vmax.xlane.f32.xlu1 %v2342_v55 }
 0x342   :  { %v1880_v31 = vpop.f32.mrf.mxu1 }
 0x343   :  { %v2022_v28 = vmul.f32 0.01, %v1877_v29  ;;  %v1881_v58 = vadd.f32 %v1880_v31, %v4567_v54  ;;  %v2345_v39 = vmax.f32 %v2145_v10, %v2146_v5  ;;  %v2149_v17 = vmax.f32 %v1875_v43, %v2021_v18 }
 0x344   :  { %v1882_v3 = vpop.f32.mrf.mxu1 }
 0x345   :  { %v2150_v46 = vmax.f32 %v1877_v29, %v2022_v28  ;;  %v2025_v0 = vmul.f32 0.01, %v1881_v58  ;;  %v1883_v45 = vadd.f32 %v1882_v3, %v4567_v54  ;;  %2346 = vmax.xlane.f32.xlu1 %v2345_v39 }
 0x346   :  { %v1886_v53 = vpop.f32.mrf.mxu1 }
 0x347   :  { %v2026_v22 = vmul.f32 0.01, %v1883_v45  ;;  %v1887_v57 = vadd.f32 %v1886_v53, %v4560_v6  ;;  %v2348_v20 = vmax.f32 %v2149_v17, %v2150_v46  ;;  %v2153_v23 = vmax.f32 %v1881_v58, %v2025_v0 }
 0x348   :  { %v1888_v12 = vpop.f32.mrf.mxu1 }
 0x349   :  { %v2154_v26 = vmax.f32 %v1883_v45, %v2026_v22  ;;  %v2029_v25 = vmul.f32 0.01, %v1887_v57  ;;  %v1889_v13 = vadd.f32 %v1888_v12, %v4560_v6  ;;  %2349 = vmax.xlane.f32.xlu1 %v2348_v20 }
 0x34a   :  { %v1892_v2 = vpop.f32.mrf.mxu1 }
 0x34b   :  { %v2030_v49 = vmul.f32 0.01, %v1889_v13  ;;  %v1893_v11 = vadd.f32 %v1892_v2, %v4553_v44  ;;  %v2351_v36 = vmax.f32 %v2153_v23, %v2154_v26  ;;  %v2157_v54 = vmax.f32 %v1887_v57, %v2029_v25 }
 0x34c   :  { %v1894_v56 = vpop.f32.mrf.mxu1  ;;  %v1853_v26 = vadd.f32 %v4707_v16, %v4596_v63  ;;  %v1851_v2 = vadd.f32 %v4703_v50, %v4596_v63  ;;  %v1847_v50 = vadd.f32 %v4700_v7, %v4601_v60 }
 0x34d   :  { %v2158_v35 = vmax.f32 %v1889_v13, %v2030_v49  ;;  %v2033_v52 = vmul.f32 0.01, %v1893_v11  ;;  %v1895_v27 = vadd.f32 %v1894_v56, %v4553_v44  ;;  %2352 = vmax.xlane.f32.xlu1 %v2351_v36 }
 0x34e   :  { %v1898_v40 = vpop.f32.mrf.mxu1 }
 0x34f   :  { %v2034_v4 = vmul.f32 0.01, %v1895_v27  ;;  %v1899_v21 = vadd.f32 %v1898_v40, %v4547_v9  ;;  %v2354_v43 = vmax.f32 %v2157_v54, %v2158_v35  ;;  %v2161_v6 = vmax.f32 %v1893_v11, %v2033_v52 }
 0x350   :  { %v1900_v55 = vpop.f32.mrf.mxu1  ;;  %v2006_v35 = vmul.f32 0.01, %v1853_v26  ;;  %v2005_v40 = vmul.f32 0.01, %v1851_v2 }
 0x351   :  { %v2162_v61 = vmax.f32 %v1895_v27, %v2034_v4  ;;  %v2037_v10 = vmul.f32 0.01, %v1899_v21  ;;  %v1901_v5 = vadd.f32 %v1900_v55, %v4547_v9  ;;  %2355 = vmax.xlane.f32.xlu1 %v2354_v43 }
 0x352   :  { %v1904_v18 = vpop.f32.mrf.mxu1 }
 0x353   :  { %v2038_v29 = vmul.f32 0.01, %v1901_v5  ;;  %v1905_v31 = vadd.f32 %v1904_v18, %v4543_v14  ;;  %v2357_v28 = vmax.f32 %v2161_v6, %v2162_v61  ;;  %v2165_v44 = vmax.f32 %v1899_v21, %v2037_v10 }
 0x354   :  { %v1906_v58 = vpop.f32.mrf.mxu1  ;;  %v2134_v6 = vmax.f32 %v1853_v26, %v2006_v35  ;;  %v1845_v10 = vadd.f32 %v4695_v32, %v4601_v60  ;;  %v2449_v26 = vld [vmem:[%s5075_s7 + $0x48] sm:$0xff]  ;;  %v2448_v35 = vld [vmem:[%s5075_s7 + $0x40] sm:$0xff] }
 0x355   :  { %v2166_v39 = vmax.f32 %v1901_v5, %v2038_v29  ;;  %v2041_v3 = vmul.f32 0.01, %v1905_v31  ;;  %v1907_v17 = vadd.f32 %v1906_v58, %v4543_v14  ;;  %2358 = vmax.xlane.f32.xlu1 %v2357_v28  ;;  %v2133_v5 = vmax.f32 %v1851_v2, %v2005_v40  ;;  %v2441_v40 = vld [vmem:[%s5075_s7 + $0x8] sm:$0xff] }
 0x356   :  { %v1910_v46 = vpop.f32.mrf.mxu1 }
 0x357   :  { %v2042_v0 = vmul.f32 0.01, %v1907_v17  ;;  %v1911_v45 = vadd.f32 %v1910_v46, %v4539_v15  ;;  %v2360_v53 = vmax.f32 %v2165_v44, %v2166_v39  ;;  %v2169_v9 = vmax.f32 %v1905_v31, %v2041_v3  ;;  %v2197_v39 = vpop.xlane.xlu0 %2196 }
 0x358   :  { %v1912_v22 = vpop.f32.mrf.mxu1  ;;  %v2002_v31 = vmul.f32 0.01, %v1847_v50  ;;  %v2336_v28 = vmax.f32 %v2133_v5, %v2134_v6  ;;  %v2001_v44 = vmul.f32 0.01, %v1845_v10  ;;  %v2727_v5 = vld [vmem:[%s5077_s9 + $0x30] sm:$0xff] }
 0x359   :  { %v2170_v57 = vmax.f32 %v1907_v17, %v2042_v0  ;;  %v2045_v20 = vmul.f32 0.01, %v1911_v45  ;;  %v1913_v12 = vadd.f32 %v1912_v22, %v4539_v15  ;;  %2361 = vmax.xlane.f32.xlu1 %v2360_v53 }
 0x35a   :  { %v1916_v23 = vpop.f32.mrf.mxu1  ;;  %v2129_v3 = vmax.f32 %v1845_v10, %v2001_v44  ;;  %v2724_v10 = vld [vmem:[%s5077_s9 + $0x18] sm:$0xff]  ;;  %v2891_v44 = vld [vmem:[#allocation3] sm:$0x1] }
 0x35b   :  { %v2046_v25 = vmul.f32 0.01, %v1913_v12  ;;  %v1917_v14 = vadd.f32 %v1916_v23, %v4534_v41  ;;  %v2363_v13 = vmax.f32 %v2169_v9, %v2170_v57  ;;  %v2173_v11 = vmax.f32 %v1911_v45, %v2045_v20  ;;  %v2200_v60 = vpop.xlane.xlu0 %2199  ;;  %v2453_v45 = vld [vmem:[%s5075_s7 + $0x68] sm:$0xff]  ;;  %v2451_v9 = vld [vmem:[%s5075_s7 + $0x58] sm:$0xff] }
 0x35c   :  { %v1918_v49 = vpop.f32.mrf.mxu1  ;;  %v2455_v20 = vld [vmem:[%s5075_s7 + $0x78] sm:$0xff] }
 0x35d   :  { %v2174_v36 = vmax.f32 %v1913_v12, %v2046_v25  ;;  %v2049_v56 = vmul.f32 0.01, %v1917_v14  ;;  %v1919_v54 = vadd.f32 %v1918_v49, %v4534_v41  ;;  %2364 = vmax.xlane.f32.xlu1 %v2363_v13  ;;  %v2452_v25 = vld [vmem:[%s5075_s7 + $0x60] sm:$0xff]  ;;  %v2447_v49 = vld [vmem:[%s5075_s7 + $0x38] sm:$0xff] }
 0x35e   :  { %v1922_v15 = vpop.f32.mrf.mxu1 }
 0x35f   :  { %v2050_v52 = vmul.f32 0.01, %v1919_v54  ;;  %v1923_v27 = vadd.f32 %v1922_v15, %v4529_v59  ;;  %v2366_v16 = vmax.f32 %v2173_v11, %v2174_v36  ;;  %v2177_v21 = vmax.f32 %v1917_v14, %v2049_v56  ;;  %v2203_v32 = vpop.xlane.xlu0 %2202  ;;  %v2450_v11 = vld [vmem:[%s5075_s7 + $0x50] sm:$0xff] }
 0x360   :  { %v1924_v4 = vpop.f32.mrf.mxu1 }
 0x361   :  { %v2178_v43 = vmax.f32 %v1919_v54, %v2050_v52  ;;  %v2053_v55 = vmul.f32 0.01, %v1923_v27  ;;  %v1925_v63 = vadd.f32 %v1924_v4, %v4529_v59  ;;  %2367 = vmax.xlane.f32.xlu1 %v2366_v16  ;;  %v2130_v59 = vmax.f32 %v1847_v50, %v2002_v31  ;;  %v2445_v54 = vld [vmem:[%s5075_s7 + $0x28] sm:$0xff]  ;;  %v2443_v52 = vld [vmem:[%s5075_s7 + $0x18] sm:$0xff]  ;;  %v2444_v4 = vld [vmem:[%s5075_s7 + $0x20] sm:$0xff] }
 0x362   :  { %v2726_v50 = vld [vmem:[%s5077_s9 + $0x28] sm:$0xff] }
 0x363   :  { %v2054_v41 = vmul.f32 0.01, %v1925_v63  ;;  %v2369_v61 = vmax.f32 %v2177_v21, %v2178_v43  ;;  %v2181_v18 = vmax.f32 %v1923_v27, %v2053_v55  ;;  %v2333_v7 = vmax.f32 %v2129_v3, %v2130_v59  ;;  %v2446_v27 = vld [vmem:[%s5075_s7 + $0x30] sm:$0xff]  ;;  %v2728_v55 = vld [vmem:[%s5077_s9 + $0x38] sm:$0xff]  ;;  %v2722_v31 = vld [vmem:[%s5077_s9 + $0x8] sm:$0xff] }
 0x365   :  { %v2182_v29 = vmax.f32 %v1925_v63, %v2054_v41  ;;  %2370 = vmax.xlane.f32.xlu1 %v2369_v61  ;;  %v2442_v63 = vld [vmem:[%s5075_s7 + $0x10] sm:$0xff]  ;;  %v2440_v61 = vld [vmem:[%s5075_s7] sm:$0xff] }
 0x367   :  { %v2372_v58 = vmax.f32 %v2181_v18, %v2182_v29 }
 0x369   :  { %2337 = vmax.xlane.f32.xlu1 %v2336_v28  ;;  %2373 = vmax.xlane.f32.xlu0 %v2372_v58  ;;  %v2725_v28 = vld [vmem:[%s5077_s9 + $0x20] sm:$0xff] }
 0x36d   :  { %2289 = vmax.xlane.f32.xlu1 %v4634_v38  ;;  %2241 = vmax.xlane.f32.xlu0 %v4655_v30  ;;  %v2206_v38 = vpop.xlane.xlu0 %2205 }
 0x371   :  { %2334 = vmax.xlane.f32.xlu1 %v2333_v7  ;;  %2193 = vmax.xlane.f32.xlu0 %v4574_v34  ;;  %v2209_v34 = vpop.xlane.xlu0 %2208  ;;  %v2721_v7 = vld [vmem:[%s5077_s9] sm:$0xff] }
 0x375   :  { %2286 = vmax.xlane.f32.xlu1 %v4628_v37  ;;  %2238 = vmax.xlane.f32.xlu0 %v4649_v42 }
 0x379   :  { %2331 = vmax.xlane.f32.xlu1 %v4705_v48  ;;  %2190 = vmax.xlane.f32.xlu0 %v4570_v19  ;;  %v2212_v19 = vpop.xlane.xlu0 %2211 }
 0x37d   :  { %2283 = vmax.xlane.f32.xlu1 %v4622_v47  ;;  %2235 = vmax.xlane.f32.xlu0 %v4643_v62 }
 0x381   :  { %2328 = vmax.xlane.f32.xlu1 %v4697_v51  ;;  %2187 = vmax.xlane.f32.xlu0 %v4564_v24  ;;  %v2215_v51 = vpop.xlane.xlu0 %2214 }
 0x385   :  { %2280 = vmax.xlane.f32.xlu1 %v4614_v8  ;;  %2232 = vmax.xlane.f32.xlu0 %v4637_v33  ;;  %v2454_v33 = vld [vmem:[%s5075_s7 + $0x70] sm:$0xff]  ;;  %v2218_v17 = vpop.xlane.xlu0 %2217 }
 0x386   :  { %v2293_v37 = vpop.xlane.xlu1 %2292 }
 0x387   :  { %v4755_v42 = vsel %vm2375_vm1, %v2197_v39, %v2293_v37  ;;  %v2723_v39 = vld [vmem:[%s5077_s9 + $0x10] sm:$0xff]  ;;  %s3257_s9 = scalar_lea.vmem %s2983_s0, 32 }
 0x388   :  { %p3259_p2 = scmp.lt.s32.totalorder %s3257_s9, %s3253_s30 }
 0x389   :  { %2184 = vmax.xlane.f32.xlu0 %v4558_v1  ;;  %v2409_v1 = vld [vmem:[%s5074_s6 + $0x8] sm:$0xff]  ;;  %v2221_v57 = vpop.xlane.xlu0 %2220 }
 0x38a   :  { %v2296_v47 = vpop.xlane.xlu1 %2295  ;;  %2600 = vmatprep.mubr.f32.mxu0 %v2409_v1  ;;  %p3260_p3 = por %p3259_p2, %p3258_p1 }
 0x38b   :  { %v4759_v62 = vsel %vm2375_vm1, %v2200_v60, %v2296_v47 }
 0x38c   :  { %p3261_p4 = pnand %p3260_p3, %p3254_p0 }
 0x38d   :  { %v4797_v14 = vpop.xlane.xlu0 %2223 }
 0x38e   :  { %v2299_v30 = vpop.xlane.xlu1 %2298 }
 0x38f   :  { %v4762_v24 = vsel %vm2375_vm1, %v2203_v32, %v2299_v30 }
 0x391   :  { %v4814_v15 = vpop.xlane.xlu0 %2226 }
 0x392   :  { %v2302_v48 = vpop.xlane.xlu1 %2301 }
 0x393   :  { %v4765_v8 = vsel %vm2375_vm1, %v2206_v38, %v2302_v48 }
 0x395   :  { %v2230_v16 = vpop.xlane.xlu0 %2229 }
 0x396   :  { %v2305_v46 = vpop.xlane.xlu1 %2304  ;;  %2528 = vperm.xlu1 %3251, %v2454_v33  }
 0x397   :  { %v4774_v0 = vsel %vm2375_vm1, %v2209_v34, %v2305_v46 }
 0x399   :  { %v4831_v21 = vpop.xlane.xlu0 %2244 }
 0x39a   :  { %v2308_v53 = vpop.xlane.xlu1 %2307  ;;  %2523 = vperm.xlu1 %3251, %v2453_v45  }
 0x39b   :  { %v4780_v22 = vsel %vm2375_vm1, %v2212_v19, %v2308_v53 }
 0x39d   :  { %v4844_v6 = vpop.xlane.xlu0 %2247 }
 0x39e   :  { %v2311_v12 = vpop.xlane.xlu1 %2310  ;;  %2513 = vperm.xlu1 %3251, %v2451_v9  }
 0x39f   :  { %v4789_v23 = vsel %vm2375_vm1, %v2215_v51, %v2311_v12  ;;  %2533 = vperm.xlu0 %3252, %v2455_v20  }
 0x3a1   :  { %v4855_v18 = vpop.xlane.xlu0 %2250 }
 0x3a2   :  { %v2314_v13 = vpop.xlane.xlu1 %2313  ;;  %2503 = vperm.xlu1 %3251, %v2449_v26  }
 0x3a3   :  { %v4800_v2 = vsel %vm2375_vm1, %v2218_v17, %v2314_v13  ;;  %2518 = vperm.xlu0 %3252, %v2452_v25  }
 0x3a5   :  { %v2254_v59 = vpop.xlane.xlu0 %2253 }
 0x3a6   :  { %v2317_v36 = vpop.xlane.xlu1 %2316  ;;  %2493 = vperm.xlu1 %3251, %v2447_v49  }
 0x3a7   :  { %v4809_v56 = vsel %vm2375_vm1, %v2221_v57, %v2317_v36  ;;  %2508 = vperm.xlu0 %3252, %v2450_v11  }
 0x3a9   :  { %v2257_v60 = vpop.xlane.xlu0 %2256 }
 0x3aa   :  { %2483 = vperm.xlu1 %3251, %v2445_v54   ;;  %v4833_v43 = vpop.xlane.xlu1 %2319 }
 0x3ab   :  { %2498 = vperm.xlu0 %3252, %v2448_v35   ;;  %v2389_v54 = vsel %vm2375_vm1, %v4797_v14, %v4833_v43 }
 0x3ad   :  { %v2260_v34 = vpop.xlane.xlu0 %2259 }
 0x3ae   :  { %2473 = vperm.xlu1 %3251, %v2443_v52   ;;  %v2323_v41 = vpop.xlane.xlu1 %2322 }
 0x3af   :  { %2488 = vperm.xlu0 %3252, %v2446_v27   ;;  %v2390_v13 = vsel %vm2375_vm1, %v4814_v15, %v2323_v41 }
 0x3b1   :  { %v2263_v19 = vpop.xlane.xlu0 %2262 }
 0x3b2   :  { %2463 = vperm.xlu1 %3251, %v2441_v40   ;;  %v2326_v29 = vpop.xlane.xlu1 %2325 }
 0x3b3   :  { %2478 = vperm.xlu0 %3252, %v2444_v4   ;;  %v2391_v26 = vsel %vm2375_vm1, %v2230_v16, %v2326_v29 }
 0x3b5   :  { %v2266_v51 = vpop.xlane.xlu0 %2265 }
 0x3b6   :  { %2766 = vperm.xlu1 %3251, %v2728_v55  }
 0x3b7   :  { %2468 = vperm.xlu0 %3252, %v2442_v63  }
 0x3b9   :  { %v2269_v33 = vpop.xlane.xlu0 %2268 }
 0x3ba   :  { %2756 = vperm.xlu1 %3251, %v2726_v50  }
 0x3bb   :  { %2458 = vperm.xlu0 %3252, %v2440_v61  }
 0x3bd   :  { %v2272_v46 = vpop.xlane.xlu0 %2271 }
 0x3be   :  { %2746 = vperm.xlu1 %3251, %v2724_v10  }
 0x3bf   :  { %2761 = vperm.xlu0 %3252, %v2727_v5   ;;  %v2278_v58 = vpop.xlane.xlu1 %2277 }
 0x3c1   :  { %v2275_v53 = vpop.xlane.xlu0 %2274 }
 0x3c2   :  { %2736 = vperm.xlu1 %3251, %v2722_v31   ;;  %v2408_v31 = vld [vmem:[%s5074_s6] sm:$0xff] }
 0x3c3   :  { %2751 = vperm.xlu0 %3252, %v2725_v28  }
 0x3c6   :  { %2894 = vperm.xlu1 %3251, %v2891_v44   ;;  %v4866_v3 = vpop.xlane.xlu1 %2340  ;;  %v2410_v44 = vld [vmem:[%s5074_s6 + $0x10] sm:$0xff] }
 0x3c7   :  { %2741 = vperm.xlu0 %3252, %v2723_v39   ;;  %v2412_v39 = vld [vmem:[%s5074_s6 + $0x20] sm:$0xff] }
 0x3ca   :  { %v4871_v32 = vpop.xlane.xlu1 %2343 }
 0x3cb   :  { %2731 = vperm.xlu0 %3252, %v2721_v7   ;;  %v2414_v7 = vld [vmem:[%s5074_s6 + $0x30] sm:$0xff] }
 0x3ce   :  { %v2347_v38 = vpop.xlane.xlu1 %2346 }
 0x3d2   :  { %v2350_v37 = vpop.xlane.xlu1 %2349 }
 0x3d6   :  { %v2353_v47 = vpop.xlane.xlu1 %2352 }
 0x3d7   :  { %v2400_v43 = vsel %vm2375_vm1, %v2257_v60, %v2353_v47  ;;  %v2417_v60 = vld [vmem:[%s5074_s6 + $0x48] sm:$0xff]  ;;  %v2423_v47 = vld [vmem:[%s5074_s6 + $0x78] sm:$0xff] }
 0x3da   :  { %v2356_v30 = vpop.xlane.xlu1 %2355 }
 0x3db   :  { %v2401_v14 = vsel %vm2375_vm1, %v2260_v34, %v2356_v30  ;;  %v2418_v34 = vld [vmem:[%s5074_s6 + $0x50] sm:$0xff] }
 0x3dc   :  { %v2422_v30 = vld [vmem:[%s5074_s6 + $0x70] sm:$0xff] }
 0x3de   :  { %v2359_v48 = vpop.xlane.xlu1 %2358 }
 0x3df   :  { %v2402_v16 = vsel %vm2375_vm1, %v2263_v19, %v2359_v48  ;;  %v2420_v19 = vld [vmem:[%s5074_s6 + $0x60] sm:$0xff] }
 0x3e0   :  { %v2424_v48 = vld [vmem:[%s5074_s6 + $0x80] sm:$0xff] }
 0x3e2   :  { %v2362_v1 = vpop.xlane.xlu1 %2361 }
 0x3e3   :  { %v2403_v15 = vsel %vm2375_vm1, %v2266_v51, %v2362_v1  ;;  %v2425_v51 = vld [vmem:[%s5074_s6 + $0x88] sm:$0xff]  ;;  %v2426_v1 = vld [vmem:[%s5074_s6 + $0x90] sm:$0xff] }
 0x3e6   :  { %v2365_v17 = vpop.xlane.xlu1 %2364 }
 0x3e7   :  { %v2404_v35 = vsel %vm2375_vm1, %v2269_v33, %v2365_v17  ;;  %v2427_v33 = vld [vmem:[%s5074_s6 + $0x98] sm:$0xff]  ;;  %v2429_v17 = vld [vmem:[%s5074_s6 + $0xa8] sm:$0xff] }
 0x3ea   :  { %v2368_v45 = vpop.xlane.xlu1 %2367 }
 0x3eb   :  { %v2405_v36 = vsel %vm2375_vm1, %v2272_v46, %v2368_v45  ;;  %v2428_v46 = vld [vmem:[%s5074_s6 + $0xa0] sm:$0xff]  ;;  %v2431_v45 = vld [vmem:[%s5074_s6 + $0xb8] sm:$0xff] }
 0x3ee   :  { %v2371_v9 = vpop.xlane.xlu1 %2370 }
 0x3ef   :  { %v2406_v25 = vsel %vm2375_vm1, %v2275_v53, %v2371_v9  ;;  %v2430_v53 = vld [vmem:[%s5074_s6 + $0xb0] sm:$0xff]  ;;  %v2433_v9 = vld [vmem:[%s5074_s6 + $0xc8] sm:$0xff] }
 0x3f2   :  { %v2338_v57 = vpop.xlane.xlu1 %2337  ;;  %v2374_v20 = vpop.xlane.xlu0 %2373 }
 0x3f3   :  { %v2407_v12 = vsel %vm2375_vm1, %v2278_v58, %v2374_v20  ;;  %v2411_v58 = vld [vmem:[%s5074_s6 + $0x18] sm:$0xff] }
 0x3f4   :  { %3029 = vmatprep.subr.mxu0 %v2407_v12  ;;  %v2435_v20 = vld [vmem:[%s5074_s6 + $0xd8] sm:$0xff]  ;;  %v2434_v12 = vld [vmem:[%s5074_s6 + $0xd0] sm:$0xff] }
 0x3f5   :  { %3030 = vmatpush3.msra.mxu0 %v2391_v26  ;;  %v2437_v26 = vld [vmem:[%s5074_s6 + $0xe8] sm:$0xff] }
 0x3f6   :  { %v2290_v49 = vpop.xlane.xlu1 %2289  ;;  %3031 = vmatprep.subr.mxu0 %v2406_v25  ;;  %v2242_v11 = vpop.xlane.xlu0 %2241  ;;  %v2436_v25 = vld [vmem:[%s5074_s6 + $0xe0] sm:$0xff] }
 0x3f7   :  { %3032 = vmatpush3.msra.mxu0 %v2390_v13  ;;  %v2395_v41 = vsel %vm2375_vm1, %v2242_v11, %v2338_v57  ;;  %v2432_v57 = vld [vmem:[%s5074_s6 + $0xc0] sm:$0xff]  ;;  %v2439_v13 = vld [vmem:[%s5074_s6 + $0xf8] sm:$0xff] }
 0x3f8   :  { %3033 = vmatprep.subr.mxu0 %v2405_v36  ;;  %v2713_v11 = vld [vmem:[%s5076_s8] sm:$0xff] }
 0x3f9   :  { %3034 = vmatpush3.msra.mxu0 %v2389_v54  ;;  %3174 = vmatprep.mubr.f32.mxu1 %v2713_v11 }
 0x3fa   :  { %v2335_v52 = vpop.xlane.xlu1 %2334  ;;  %3035 = vmatprep.subr.mxu0 %v2404_v35  ;;  %v2194_v27 = vpop.xlane.xlu0 %2193 }
 0x3fb   :  { %3036 = vmatpush3.msra.mxu0 %v4809_v56  ;;  %v2379_v61 = vsel %vm2375_vm1, %v2194_v27, %v2290_v49  ;;  %v2438_v49 = vld [vmem:[%s5074_s6 + $0xf0] sm:$0xff] }
 0x3fc   :  { %3037 = vmatprep.subr.mxu0 %v2403_v15 }
 0x3fd   :  { %3038 = vmatpush3.msra.mxu0 %v4800_v2  ;;  %v2399_v2 = vsel %vm2375_vm1, %v2254_v59, %v2350_v37  ;;  %v2413_v59 = vld [vmem:[%s5074_s6 + $0x28] sm:$0xff] }
 0x3fe   :  { %v2287_v40 = vpop.xlane.xlu1 %2286  ;;  %3039 = vmatprep.subr.mxu0 %v2402_v16  ;;  %v2239_v4 = vpop.xlane.xlu0 %2238  ;;  %v2421_v37 = vld [vmem:[%s5074_s6 + $0x68] sm:$0xff] }
 0x3ff   :  { %3040 = vmatpush3.msra.mxu0 %v4789_v23  ;;  %v2398_v23 = vsel %vm2375_vm1, %v4855_v18, %v2347_v38  ;;  %v2419_v38 = vld [vmem:[%s5074_s6 + $0x58] sm:$0xff] }
 0x400   :  { %3041 = vmatprep.subr.mxu0 %v2401_v14 }
 0x401   :  { %3042 = vmatpush3.msra.mxu0 %v4780_v22  ;;  %v2397_v22 = vsel %vm2375_vm1, %v4844_v6, %v4871_v32  ;;  %v2394_v6 = vsel %vm2375_vm1, %v2239_v4, %v2335_v52  ;;  %v2416_v32 = vld [vmem:[%s5074_s6 + $0x40] sm:$0xff] }
 0x402   :  { %v2332_v56 = vpop.xlane.xlu1 %2331  ;;  %3043 = vmatprep.subr.mxu0 %v2400_v43  ;;  %v2191_v55 = vpop.xlane.xlu0 %2190 }
 0x403   :  { %3044 = vmatpush3.msra.mxu0 %v4774_v0  ;;  %v2396_v0 = vsel %vm2375_vm1, %v4831_v21, %v4866_v3  ;;  %v2378_v10 = vsel %vm2375_vm1, %v2191_v55, %v2287_v40  ;;  %v2415_v3 = vld [vmem:[%s5074_s6 + $0x38] sm:$0xff] }
 0x404   :  { %3045 = vmatprep.subr.mxu0 %v2399_v2 }
 0x405   :  { %3046 = vmatpush3.msra.mxu0 %v4765_v8 }
 0x406   :  { %v2284_v63 = vpop.xlane.xlu1 %2283  ;;  %3047 = vmatprep.subr.mxu0 %v2398_v23  ;;  %v2236_v50 = vpop.xlane.xlu0 %2235 }
 0x407   :  { %3048 = vmatpush3.msra.mxu0 %v4762_v24  ;;  %v2393_v21 = vsel %vm2375_vm1, %v2236_v50, %v2332_v56 }
 0x408   :  { %3049 = vmatprep.subr.mxu0 %v2397_v22 }
 0x409   :  { %3050 = vmatpush3.msra.mxu0 %v4759_v62 }
 0x40a   :  { %3051 = vmatprep.subr.mxu0 %v2396_v0  ;;  %v2188_v8 = vpop.xlane.xlu0 %2187  ;;  %v2329_v24 = vpop.xlane.xlu1 %2328 }
 0x40b   :  { %3052 = vmatpush3.msra.mxu0 %v4755_v42  ;;  %v2377_v5 = vsel %vm2375_vm1, %v2188_v8, %v2284_v63 }
 0x40c   :  { %3053 = vmatprep.subr.mxu0 %v2395_v41 }
 0x40d   :  { %3054 = vmatpush3.msra.mxu0 %v2379_v61 }
 0x40e   :  { %3055 = vmatprep.subr.mxu0 %v2394_v6  ;;  %v2233_v62 = vpop.xlane.xlu0 %2232  ;;  %v2281_v18 = vpop.xlane.xlu1 %2280 }
 0x40f   :  { %3056 = vmatpush3.msra.mxu0 %v2378_v10  ;;  %v2392_v42 = vsel %vm2375_vm1, %v2233_v62, %v2329_v24 }
 0x410   :  { %3057 = vmatprep.subr.mxu0 %v2393_v21 }
 0x411   :  { %3058 = vmatpush3.msra.mxu0 %v2377_v5 }
 0x412   :  { %3059 = vmatprep.subr.mxu0 %v2392_v42  ;;  %v2185_v29 = vpop.xlane.xlu0 %2184  ;;  %v2529_v42 = vpop.permute.xlu1 %2528 }
 0x413   :  { %v2376_v28 = vsel %vm2375_vm1, %v2185_v29, %v2281_v18 }
 0x414   :  { %3060 = vmatpush3.msra.mxu0 %v2376_v28 }
 0x415   :  { %2601 = vmatmul.mubr.f32.vlgmr.msra.gmra.mxu0 %v2408_v31 }
 0x416   :  { %2605 = vmatprep.mubr.f32.mxu0 %v2411_v58  ;;  %v2524_v58 = vpop.permute.xlu1 %2523 }
 0x419   :  { %2606 = vmatmul.mubr.f32.gmra.mxu0 %v2410_v44 }
 0x41a   :  { %2610 = vmatprep.mubr.f32.mxu0 %v2413_v59  ;;  %v2534_v29 = vpop.permute.xlu0 %2533 }
 0x41d   :  { %2611 = vmatmul.mubr.f32.gmra.mxu0 %v2412_v39 }
 0x41e   :  { %2615 = vmatprep.mubr.f32.mxu0 %v2415_v3  ;;  %v2519_v59 = vpop.permute.xlu0 %2518 }
 0x421   :  { %2616 = vmatmul.mubr.f32.gmra.mxu0 %v2414_v7  ;;  %v2514_v7 = vpop.permute.xlu1 %2513 }
 0x422   :  { %2620 = vmatprep.mubr.f32.mxu0 %v2417_v60 }
 0x425   :  { %2621 = vmatmul.mubr.f32.gmra.mxu0 %v2416_v32 }
 0x426   :  { %2625 = vmatprep.mubr.f32.mxu0 %v2419_v38  ;;  %v2509_v38 = vpop.permute.xlu0 %2508 }
 0x429   :  { %2626 = vmatmul.mubr.f32.gmra.mxu0 %v2418_v34 }
 0x42a   :  { %2630 = vmatprep.mubr.f32.mxu0 %v2421_v37 }
 0x42d   :  { %2631 = vmatmul.mubr.f32.gmra.mxu0 %v2420_v19 }
 0x42e   :  { %2635 = vmatprep.mubr.f32.mxu0 %v2423_v47 }
 0x431   :  { %2636 = vmatmul.mubr.f32.gmra.mxu0 %v2422_v30 }
 0x432   :  { %2640 = vmatprep.mubr.f32.mxu0 %v2425_v51 }
 0x435   :  { %2641 = vmatmul.mubr.f32.gmra.mxu0 %v2424_v48  ;;  %v2504_v48 = vpop.permute.xlu1 %2503 }
 0x436   :  { %2645 = vmatprep.mubr.f32.mxu0 %v2427_v33 }
 0x439   :  { %2646 = vmatmul.mubr.f32.gmra.mxu0 %v2426_v1 }
 0x43a   :  { %2650 = vmatprep.mubr.f32.mxu0 %v2429_v17 }
 0x43d   :  { %2651 = vmatmul.mubr.f32.gmra.mxu0 %v2428_v46  ;;  %v2499_v46 = vpop.permute.xlu0 %2498 }
 0x43e   :  { %2655 = vmatprep.mubr.f32.mxu0 %v2431_v45 }
 0x441   :  { %2656 = vmatmul.mubr.f32.gmra.mxu0 %v2430_v53 }
 0x442   :  { %2660 = vmatprep.mubr.f32.mxu0 %v2433_v9 }
 0x445   :  { %2661 = vmatmul.mubr.f32.gmra.mxu0 %v2432_v57 }
 0x446   :  { %2665 = vmatprep.mubr.f32.mxu0 %v2435_v20 }
 0x449   :  { %2666 = vmatmul.mubr.f32.gmra.mxu0 %v2434_v12 }
 0x44a   :  { %2670 = vmatprep.mubr.f32.mxu0 %v2437_v26 }
 0x44d   :  { %2671 = vmatmul.mubr.f32.gmra.mxu0 %v2436_v25 }
 0x44e   :  { %2675 = vmatprep.mubr.f32.mxu0 %v2439_v13  ;;  %v2494_v13 = vpop.permute.xlu1 %2493 }
 0x451   :  { %2676 = vmatmul.mubr.f32.gmra.mxu0 %v2438_v49 }
 0x4d5   :  { %v3061_v36 = vpop.f32.mrf.mxu0 }
 0x4d7   :  { %v3062_v54 = vpop.f32.mrf.mxu0 }
 0x4d8   :  { %v5009_v35 = vadd.f32 %v3062_v54, %v3061_v36 }
 0x4d9   :  { %v3064_v52 = vpop.f32.mrf.mxu0 }
 0x4db   :  { %v3065_v27 = vpop.f32.mrf.mxu0 }
 0x4dc   :  { %v5011_v15 = vadd.f32 %v3065_v27, %v3064_v52  ;;  %v2489_v52 = vpop.permute.xlu0 %2488 }
 0x4dd   :  { %v3067_v16 = vpop.f32.mrf.mxu0 }
 0x4df   :  { %v3068_v40 = vpop.f32.mrf.mxu0 }
 0x4e0   :  { %v5013_v4 = vadd.f32 %v3068_v40, %v3067_v16 }
 0x4e1   :  { %v3070_v14 = vpop.f32.mrf.mxu0 }
 0x4e3   :  { %v3071_v43 = vpop.f32.mrf.mxu0 }
 0x4e4   :  { %v5015_v56 = vadd.f32 %v3071_v43, %v3070_v14 }
 0x4e5   :  { %v3073_v55 = vpop.f32.mrf.mxu0 }
 0x4e7   :  { %v3074_v2 = vpop.f32.mrf.mxu0 }
 0x4e8   :  { %v5017_v23 = vadd.f32 %v3074_v2, %v3073_v55 }
 0x4e9   :  { %v5019_v63 = vpop.f32.mrf.mxu0 }
 0x4eb   :  { %v5021_v50 = vpop.f32.mrf.mxu0 }
 0x4ed   :  { %v3079_v22 = vpop.f32.mrf.mxu0 }
 0x4ef   :  { %v3080_v0 = vpop.f32.mrf.mxu0 }
 0x4f0   :  { %v3081_v43 = vadd.f32 %v3080_v0, %v3079_v22 }
 0x4f1   :  { %v3082_v8 = vpop.f32.mrf.mxu0 }
 0x4f3   :  { %v3083_v41 = vpop.f32.mrf.mxu0 }
 0x4f4   :  { %v3084_v27 = vadd.f32 %v3083_v41, %v3082_v8  ;;  %v2479_v8 = vpop.permute.xlu0 %2478  ;;  %v2633_v41 = vadd.f32 %v3081_v43, %v2489_v52 }
 0x4f5   :  { %v3085_v61 = vpop.f32.mrf.mxu0 }
 0x4f7   :  { %v3086_v24 = vpop.f32.mrf.mxu0 }
 0x4f8   :  { %v3087_v49 = vadd.f32 %v3086_v24, %v3085_v61  ;;  %v3078_v61 = vadd.f32 %v5021_v50, %v5019_v63  ;;  %v2638_v24 = vadd.f32 %v3084_v27, %v2494_v13  ;;  %v2687_v63 = vmul.f32 0.01, %v2633_v41 }
 0x4f9   :  { %v3088_v6 = vpop.f32.mrf.mxu0 }
 0x4fa   :  { %v2643_v55 = vadd.f32 %v3087_v49, %v2499_v46  ;;  %v2688_v0 = vmul.f32 0.01, %v2638_v24  ;;  %v2717_v46 = vld [vmem:[%s5076_s8 + $0x20] sm:$0xff] }
 0x4fb   :  { %v3089_v10 = vpop.f32.mrf.mxu0 }
 0x4fc   :  { %v3090_v20 = vadd.f32 %v3089_v10, %v3088_v6  ;;  %v2484_v10 = vpop.permute.xlu1 %2483 }
 0x4fd   :  { %v3091_v62 = vpop.f32.mrf.mxu0  ;;  %v2628_v22 = vadd.f32 %v3078_v61, %v2484_v10 }
 0x4fe   :  { %v2648_v16 = vadd.f32 %v3090_v20, %v2504_v48 }
 0x4ff   :  { %v3092_v21 = vpop.f32.mrf.mxu0 }
 0x500   :  { %v3093_v45 = vadd.f32 %v3092_v21, %v3091_v62  ;;  %v2690_v62 = vmul.f32 0.01, %v2648_v16 }
 0x501   :  { %v3094_v5 = vpop.f32.mrf.mxu0 }
 0x502   :  { %v2653_v11 = vadd.f32 %v3093_v45, %v2509_v38  ;;  %v2718_v45 = vld [vmem:[%s5076_s8 + $0x28] sm:$0xff] }
 0x503   :  { %v3095_v18 = vpop.f32.mrf.mxu0 }
 0x504   :  { %v3096_v33 = vadd.f32 %v3095_v18, %v3094_v5  ;;  %v2691_v2 = vmul.f32 0.01, %v2653_v11  ;;  %v2689_v5 = vmul.f32 0.01, %v2643_v55  ;;  %v2706_v18 = vmax.f32 %v2648_v16, %v2690_v62 }
 0x505   :  { %v3097_v31 = vpop.f32.mrf.mxu0 }
 0x506   :  { %v2658_v12 = vadd.f32 %v3096_v33, %v2514_v7  ;;  %v2705_v50 = vmax.f32 %v2643_v55, %v2689_v5  ;;  %v2703_v7 = vmax.f32 %v2633_v41, %v2687_v63  ;;  %v2715_v33 = vld [vmem:[%s5076_s8 + $0x10] sm:$0xff] }
 0x507   :  { %v3098_v28 = vpop.f32.mrf.mxu0 }
 0x508   :  { %v3099_v47 = vadd.f32 %v3098_v28, %v3097_v31  ;;  %v2692_v40 = vmul.f32 0.01, %v2658_v12  ;;  %v2623_v31 = vadd.f32 %v5017_v23, %v2479_v8  ;;  %v2469_v28 = vpop.permute.xlu0 %2468 }
 0x509   :  { %v3100_v44 = vpop.f32.mrf.mxu0 }
 0x50a   :  { %v2663_v53 = vadd.f32 %v3099_v47, %v2519_v59  ;;  %v2708_v21 = vmax.f32 %v2658_v12, %v2692_v40  ;;  %v2704_v59 = vmax.f32 %v2638_v24, %v2688_v0 }
 0x50b   :  { %v3101_v39 = vpop.f32.mrf.mxu0 }
 0x50c   :  { %v3102_v37 = vadd.f32 %v3101_v39, %v3100_v44  ;;  %v2693_v36 = vmul.f32 0.01, %v2663_v53  ;;  %v2686_v44 = vmul.f32 0.01, %v2628_v22  ;;  %v2613_v39 = vadd.f32 %v5013_v4, %v2469_v28 }
 0x50d   :  { %v3103_v3 = vpop.f32.mrf.mxu0 }
 0x50e   :  { %v2668_v1 = vadd.f32 %v3102_v37, %v2524_v58  ;;  %v2709_v6 = vmax.f32 %v2663_v53, %v2693_v36  ;;  %v2702_v38 = vmax.f32 %v2628_v22, %v2686_v44  ;;  %v2683_v37 = vmul.f32 0.01, %v2613_v39  ;;  %v2719_v53 = vld [vmem:[%s5076_s8 + $0x30] sm:$0xff] }
 0x50f   :  { %v3104_v60 = vpop.f32.mrf.mxu0 }
 0x510   :  { %v3105_v32 = vadd.f32 %v3104_v60, %v3103_v3  ;;  %v2694_v26 = vmul.f32 0.01, %v2668_v1  ;;  %v2685_v3 = vmul.f32 0.01, %v2623_v31 }
 0x511   :  { %v3106_v34 = vpop.f32.mrf.mxu0 }
 0x512   :  { %v2673_v30 = vadd.f32 %v3105_v32, %v2529_v42  ;;  %v2710_v14 = vmax.f32 %v2668_v1, %v2694_v26  ;;  %v2707_v42 = vmax.f32 %v2653_v11, %v2691_v2  ;;  %v5092_v1 = vmov 0.0  }
 0x513   :  { %v3107_v19 = vpop.f32.mrf.mxu0 }
 0x514   :  { %v3108_v51 = vadd.f32 %v3107_v19, %v3106_v34  ;;  %v2695_v9 = vmul.f32 0.01, %v2673_v30  ;;  %v2459_v34 = vpop.permute.xlu0 %2458  ;;  %v2701_v19 = vmax.f32 %v2623_v31, %v2685_v3  ;;  %v2890_v3 = vld [vmem:[%s5078_s10] sm:$0x1] }
 0x516   :  { %v2678_v17 = vadd.f32 %v3108_v51, %v2534_v29  ;;  %v2711_v54 = vmax.f32 %v2673_v30, %v2695_v9  ;;  %v2474_v29 = vpop.permute.xlu1 %2473  ;;  %v2699_v51 = vmax.f32 %v2613_v39, %v2683_v37  ;;  %v2720_v9 = vld [vmem:[%s5076_s8 + $0x38] sm:$0xff] }
 0x517   :  { %v2618_v58 = vadd.f32 %v5015_v56, %v2474_v29  ;;  %v2603_v56 = vadd.f32 %v5009_v35, %v2459_v34  ;;  %v2714_v35 = vld [vmem:[%s5076_s8 + $0x8] sm:$0xff] }
 0x518   :  { %v2696_v57 = vmul.f32 0.01, %v2678_v17  ;;  %v2762_v26 = vpop.permute.xlu0 %2761 }
 0x519   :  { %v2684_v32 = vmul.f32 0.01, %v2618_v58  ;;  %v2681_v30 = vmul.f32 0.01, %v2603_v56 }
 0x51a   :  { %v2712_v25 = vmax.f32 %v2678_v17, %v2696_v57  ;;  %v2464_v60 = vpop.permute.xlu1 %2463  ;;  %v2716_v17 = vld [vmem:[%s5076_s8 + $0x18] sm:$0xff] }
 0x51b   :  { %v2608_v23 = vadd.f32 %v5011_v15, %v2464_v60  ;;  %v2700_v4 = vmax.f32 %v2618_v58, %v2684_v32  ;;  %v2697_v48 = vmax.f32 %v2603_v56, %v2681_v30  ;;  %v5093_v60 = vld [vmem:[#allocation7_spill] sm:$0xff] }
 0x51c   :  { %3142 = vmatprep.subr.mxu1 %v2712_v25  ;;  %v2752_v36 = vpop.permute.xlu0 %2751 }
 0x51d   :  { %3143 = vmatpush3.msra.mxu1 %v2712_v25  ;;  %v2682_v47 = vmul.f32 0.01, %v2608_v23 }
 0x51e   :  { %3144 = vmatprep.subr.mxu1 %v2711_v54  ;;  %v2767_v20 = vpop.permute.xlu1 %2766 }
 0x51f   :  { %3145 = vmatpush3.msra.mxu1 %v2711_v54  ;;  %v2698_v15 = vmax.f32 %v2608_v23, %v2682_v47 }
 0x520   :  { %3146 = vmatprep.subr.mxu1 %v2710_v14 }
 0x521   :  { %3147 = vmatpush3.msra.mxu1 %v2710_v14 }
 0x522   :  { %3148 = vmatprep.subr.mxu1 %v2709_v6  ;;  %v2757_v49 = vpop.permute.xlu1 %2756 }
 0x523   :  { %3149 = vmatpush3.msra.mxu1 %v2709_v6  ;;  %v2742_v6 = vpop.permute.xlu0 %2741 }
 0x524   :  { %3150 = vmatprep.subr.mxu1 %v2708_v21 }
 0x525   :  { %3151 = vmatpush3.msra.mxu1 %v2708_v21 }
 0x526   :  { %3152 = vmatprep.subr.mxu1 %v2707_v42  ;;  %v2747_v40 = vpop.permute.xlu1 %2746 }
 0x527   :  { %3153 = vmatpush3.msra.mxu1 %v2707_v42 }
 0x528   :  { %3154 = vmatprep.subr.mxu1 %v2706_v18 }
 0x529   :  { %3155 = vmatpush3.msra.mxu1 %v2706_v18  ;;  %v2732_v18 = vpop.permute.xlu0 %2731 }
 0x52a   :  { %3156 = vmatprep.subr.mxu1 %v2705_v50  ;;  %v2737_v5 = vpop.permute.xlu1 %2736 }
 0x52b   :  { %3157 = vmatpush3.msra.mxu1 %v2705_v50 }
 0x52c   :  { %3158 = vmatprep.subr.mxu1 %v2704_v59 }
 0x52d   :  { %3159 = vmatpush3.msra.mxu1 %v2704_v59 }
 0x52e   :  { %3160 = vmatprep.subr.mxu1 %v2703_v7 }
 0x52f   :  { %3161 = vmatpush3.msra.mxu1 %v2703_v7  ;;  %v2895_v7 = vpop.permute.xlu1 %2894 }
 0x530   :  { %3162 = vmatprep.subr.mxu1 %v2702_v38  ;;  %v2900_v23 = vrot.slane %v2895_v7, %v5093_v60 }
 0x531   :  { %3163 = vmatpush3.msra.mxu1 %v2702_v38 }
 0x532   :  { %3164 = vmatprep.subr.mxu1 %v2701_v19 }
 0x533   :  { %3165 = vmatpush3.msra.mxu1 %v2701_v19 }
 0x534   :  { %3166 = vmatprep.subr.mxu1 %v2700_v4 }
 0x535   :  { %3167 = vmatpush3.msra.mxu1 %v2700_v4 }
 0x536   :  { %3168 = vmatprep.subr.mxu1 %v2699_v51 }
 0x537   :  { %3169 = vmatpush3.msra.mxu1 %v2699_v51 }
 0x538   :  { %3170 = vmatprep.subr.mxu1 %v2698_v15 }
 0x539   :  { %3171 = vmatpush3.msra.mxu1 %v2698_v15 }
 0x53a   :  { %3172 = vmatprep.subr.mxu1 %v2697_v48 }
 0x53b   :  { %3173 = vmatpush3.msra.mxu1 %v2697_v48 }
 0x53c   :  { %3175 = vmatmul.mubr.f32.vlgmr.msra.gmra.mxu1 %v2714_v35  ;;  %3186 = vmatprep.subr.mxu1 %v5092_v1 }
 0x53d   :  { %3177 = vmatprep.mubr.f32.mxu1 %v2715_v33 }
 0x540   :  { %3178 = vmatmul.mubr.f32.gmra.mxu1 %v2716_v17 }
 0x541   :  { %3180 = vmatprep.mubr.f32.mxu1 %v2717_v46 }
 0x544   :  { %3181 = vmatmul.mubr.f32.gmra.mxu1 %v2718_v45 }
 0x545   :  { %3183 = vmatprep.mubr.f32.mxu1 %v2719_v53 }
 0x548   :  { %3184 = vmatmul.mubr.f32.gmra.mxu1 %v2720_v9 }
 0x549   :  { %3202 = vmatprep.mubr.msk.f32.mxu1 %vm3280_vm2, %v5092_v1 }
 0x5fc   :  { %v3176_v57 = vpop.f32.mrf.mxu1 }
 0x5fd   :  { %v2841_v42 = vadd.f32 %v3176_v57, %v2737_v5 }
 0x5fe   :  { %v2835_v12 = vpop.f32.mrf.mxu1 }
 0x5ff   :  { %v2836_v29 = vadd.f32 %v2835_v12, %v2732_v18  ;;  %v2875_v50 = vmul.f32 0.01, %v2841_v42 }
 0x600   :  { %v3179_v25 = vpop.f32.mrf.mxu1 }
 0x601   :  { %v2851_v10 = vadd.f32 %v3179_v25, %v2747_v40  ;;  %v2874_v58 = vmul.f32 0.01, %v2836_v29  ;;  %v2883_v59 = vmax.f32 %v2841_v42, %v2875_v50 }
 0x602   :  { %v2845_v13 = vpop.f32.mrf.mxu1 }
 0x603   :  { %v2846_v21 = vadd.f32 %v2845_v13, %v2742_v6  ;;  %v2877_v22 = vmul.f32 0.01, %v2851_v10  ;;  %v2882_v39 = vmax.f32 %v2836_v29, %v2874_v58 }
 0x604   :  { %v3182_v11 = vpop.f32.mrf.mxu1 }
 0x605   :  { %v2861_v27 = vadd.f32 %v3182_v11, %v2757_v49  ;;  %v2876_v31 = vmul.f32 0.01, %v2846_v21  ;;  %v2885_v28 = vmax.f32 %v2851_v10, %v2877_v22 }
 0x606   :  { %v2855_v54 = vpop.f32.mrf.mxu1 }
 0x607   :  { %v2856_v43 = vadd.f32 %v2855_v54, %v2752_v36  ;;  %v2879_v61 = vmul.f32 0.01, %v2861_v27  ;;  %v2884_v44 = vmax.f32 %v2846_v21, %v2876_v31 }
 0x608   :  { %v3185_v52 = vpop.f32.mrf.mxu1 }
 0x609   :  { %v2871_v16 = vadd.f32 %v3185_v52, %v2767_v20  ;;  %v2878_v8 = vmul.f32 0.01, %v2856_v43  ;;  %v2887_v0 = vmax.f32 %v2861_v27, %v2879_v61 }
 0x60a   :  { %v2865_v14 = vpop.f32.mrf.mxu1 }
 0x60b   :  { %v2881_v55 = vmul.f32 0.01, %v2871_v16  ;;  %v2866_v2 = vadd.f32 %v2865_v14, %v2762_v26  ;;  %v2886_v63 = vmax.f32 %v2856_v43, %v2878_v8 }
 0x60d   :  { %v2889_v24 = vmax.f32 %v2871_v16, %v2881_v55  ;;  %v2880_v62 = vmul.f32 0.01, %v2866_v2 }
 0x60f   :  { %v2888_v41 = vmax.f32 %v2866_v2, %v2880_v62  ;;  %3187 = vmatpush3.msra.mxu1 %v2889_v24 }
 0x610   :  { %3188 = vmatprep.subr.mxu1 %v5092_v1 }
 0x611   :  { %3189 = vmatpush3.msra.mxu1 %v2888_v41 }
 0x612   :  { %3190 = vmatprep.subr.mxu1 %v5092_v1 }
 0x613   :  { %3191 = vmatpush3.msra.mxu1 %v2887_v0 }
 0x614   :  { %3192 = vmatprep.subr.mxu1 %v5092_v1 }
 0x615   :  { %3193 = vmatpush3.msra.mxu1 %v2886_v63 }
 0x616   :  { %3194 = vmatprep.subr.mxu1 %v5092_v1 }
 0x617   :  { %3195 = vmatpush3.msra.mxu1 %v2885_v28 }
 0x618   :  { %3196 = vmatprep.subr.mxu1 %v5092_v1 }
 0x619   :  { %3197 = vmatpush3.msra.mxu1 %v2884_v44 }
 0x61a   :  { %3198 = vmatprep.subr.mxu1 %v5092_v1 }
 0x61b   :  { %3199 = vmatpush3.msra.mxu1 %v2883_v59 }
 0x61c   :  { %3200 = vmatprep.subr.mxu1 %v5092_v1 }
 0x61d   :  { %3201 = vmatpush3.msra.mxu1 %v2882_v39 }
 0x61e   :  { %3203 = vmatmul.mubr.msk.f32.vlgmr.msra.gmra.mxu1 %vm690_vm0, %v2890_v3 }
 0x6de   :  { %v2970_v32 = vpop.f32.mrf.mxu1 }
 0x6df   :  { %v2971_v38 = vadd.f32 %v2970_v32, %v2900_v23 }
 0x6e0   :  { %v3204_v34 = vpop.f32.mrf.mxu1 }
 0x6e1   :  { %2975 = vst.msk [vmem:[#allocation4] sm:$0x1] %vm2974_vm3, %v2971_v38 }
 0x6e2   :  { %3264 = shalt.err (!%p3261_p4)
}
 0x6e3   :  { %2985 = dma.vmem_to_hbm [thread:$0]  %s2983_s0, 16, %s5080_s12, [#allocation5]  }
 0x6e4   :  { %3273 = dma.done.wait [#allocation5], 16  }
 0x6e5   :  { %3274 = vsyncadd [#allocation5], 4294967280 }
 0x6e6   :  { %2989 = vsyncpa [#allocation5], 1 }

</bundles_post_ra>
